<compile_context>
chip_gen: v5e
topology: v5e:2x2
jax: 0.10.0
libtpu: 0.0.40
codegen_flags: <defaults>
</compile_context>

<pallas_src>
import jax
import jax.numpy as jnp
import numpy as np
from jax.experimental import pallas as pl
from jax.experimental.pallas import tpu as pltpu

LRELU_SLOPE = 0.1


def get_padding(kernel_size, dilation=1):
    return int((kernel_size * dilation - dilation) / 2)


def _leaky(x, slope=LRELU_SLOPE):
    return jnp.where(x >= 0, x, slope * x)


def _round_up(x, m):
    return -(-x // m) * m


# ----------------------------- fused ResBlock1 kernel --------------------------

def _make_resblock_kernel(K, dilations, T_tile, H_pad, C, T_valid, slope):
    """Whole ResBlock1 fused: for each branch i,
         x <- x + conv2_i(lrelu(conv1_i[dil=d_i](lrelu(x))))
    computed channels-last on a halo'd time tile kept in VMEM.

    Kernel refs (grid dims squeezed):
      x_ref   : (T_tile, C)       f32  non-overlapping main tile of x
      halo_ref: (2*H_pad, C)      f32  [left halo rows | right halo rows]
      w1s_ref : (n_br, K*C, C)    bf16 tap-folded conv1 weights
      b1s_ref : (n_br, 1, C)      f32
      w2s_ref : (n_br, K*C, C)    bf16 tap-folded conv2 weights
      b2s_ref : (n_br, 1, C)      f32
      o_ref   : (T_tile, C)       f32
    Slab row j of the current working window maps to global time position
    (t*T_tile - cur_halo + j).
    """
    n_br = len(dilations)

    def kernel(x_ref, halo_ref, w1s_ref, b1s_ref, w2s_ref, b2s_ref, o_ref):
        t = pl.program_id(0)
        base = t * T_tile                      # position of main-tile row 0

        # Stitch halo'd window; all three pieces are 8-row aligned (cheap).
        cur = jnp.concatenate(
            [halo_ref[0:H_pad, :], x_ref[...], halo_ref[H_pad:2 * H_pad, :]],
            axis=0)                            # (T_tile + 2*H_pad, C) f32
        cur_halo = H_pad

        for i, d in enumerate(dilations):
            Tc = T_tile + 2 * cur_halo
            xa = _leaky(cur, slope).astype(jnp.bfloat16)

            # conv1 (K taps, dilation d): one tap-folded MXU contraction.
            T1 = Tc - 2 * d
            u1 = jnp.concatenate(
                [xa[k * d:k * d + T1, :] for k in range(K)], axis=1)  # (T1, K*C)
            acc1 = jnp.dot(u1, w1s_ref[i],
                           preferred_element_type=jnp.float32) + b1s_ref[i]
            m1 = _leaky(acc1, slope)

            # conv2's zero padding lives at positions <0 and >=T_valid: zero the
            # intermediate there (identity / cheap filler on interior tiles).
            pos1 = (base - (cur_halo - d)
                    + jax.lax.broadcasted_iota(jnp.int32, (T1, 1), 0))
            m1 = jnp.where((pos1 >= 0) & (pos1 < T_valid),
                           m1, 0.0).astype(jnp.bfloat16)

            # conv2 (K taps, dilation 1) + bias + residual (residual in f32,
            # so x passes through exactly).
            T2 = T1 - 2
            u2 = jnp.concatenate(
                [m1[k:k + T2, :] for k in range(K)], axis=1)          # (T2, K*C)
            acc2 = jnp.dot(u2, w2s_ref[i],
                           preferred_element_type=jnp.float32) + b2s_ref[i]
            nxt = acc2 + cur[d + 1:d + 1 + T2, :]

            cur_halo = cur_halo - (d + 1)
            if i < n_br - 1:
                # Next branch's conv1 zero padding requires the running residual
                # to be 0 outside [0, T_valid) (only matters on boundary tiles).
                pos2 = (base - cur_halo
                        + jax.lax.broadcasted_iota(jnp.int32, (T2, 1), 0))
                nxt = jnp.where((pos2 >= 0) & (pos2 < T_valid), nxt, 0.0)
            cur = nxt

        o_ref[...] = cur[cur_halo:cur_halo + T_tile, :].astype(o_ref.dtype)

    return kernel


def resblock1_pallas(x_ncl, packed, *, t_tile=1024):
    """Matches ResBlock1.forward(x); x_ncl is PyTorch-layout (B, C, T) f32.

    `packed` comes from pack_resblock_params (weights pre-packed once).
    """
    dilations = packed["dilations"]
    w1s, b1s, w2s, b2s = packed["w1s"], packed["b1s"], packed["w2s"], packed["b2s"]
    n_br, KC, C = w1s.shape
    K = KC // C

    x = jnp.transpose(x_ncl, (0, 2, 1))        # NCL -> NLC once per ResBlock
    B, T, C_ = x.shape
    assert C_ == C

    H = sum(d + 1 for d in dilations)          # halo consumed by the fused branches
    H_pad = _round_up(H, 8)                    # 8-row aligned halo slabs

    T_tile = min(int(t_tile), _round_up(T, 8))
    assert T_tile % 8 == 0, "t_tile must be a multiple of 8"
    n_t = -(-T // T_tile)
    T_grid = n_t * T_tile

    # Main non-overlapping tiles (zero pad == conv zero padding since
    # leaky_relu(0) == 0; out-of-range intermediates are masked in-kernel).
    x_g = x if T_grid == T else jnp.pad(x, ((0, 0), (0, T_grid - T), (0, 0)))

    # Tiny per-tile halo slabs (2*H_pad rows each), built from strided slices:
    # the activation itself is NOT duplicated in HBM.
    pad_back = T_grid + T_tile - T
    xp = jnp.pad(x, ((0, 0), (H_pad, pad_back), (0, 0)))
    left = xp[:, :T_grid, :].reshape(B, n_t, T_tile, C)[:, :, :H_pad, :]
    right = xp[:, T_tile + H_pad:T_tile + H_pad + T_grid, :] \
        .reshape(B, n_t, T_tile, C)[:, :, :H_pad, :]
    halos = jnp.concatenate([left, right], axis=2)        # (B, n_t, 2*H_pad, C)

    kernel = _make_resblock_kernel(K, dilations, T_tile, H_pad, C, T, LRELU_SLOPE)

    flops = 2 * (2 * n_br) * K * C * C * T_grid * B       # 6 convs
    bytes_acc = (x_g.size + halos.size + B * T_grid * C) * 4 \
        + (w1s.size + w2s.size) * 2 + (b1s.size + b2s.size) * 4

    out = pl.pallas_call(
        kernel,
        out_shape=jax.ShapeDtypeStruct((B, T_grid, C), x.dtype),
        grid_spec=pltpu.PrefetchScalarGridSpec(
            num_scalar_prefetch=0,
            grid=(n_t, B),                     # both parallel; weights stay resident
            in_specs=[
                pl.BlockSpec((None, T_tile, C), lambda t, b: (b, t, 0)),
                pl.BlockSpec((None, None, 2 * H_pad, C),
                             lambda t, b: (b, t, 0, 0)),
                pl.BlockSpec((n_br, KC, C), lambda t, b: (0, 0, 0)),
                pl.BlockSpec((n_br, 1, C), lambda t, b: (0, 0, 0)),
                pl.BlockSpec((n_br, KC, C), lambda t, b: (0, 0, 0)),
                pl.BlockSpec((n_br, 1, C), lambda t, b: (0, 0, 0)),
            ],
            out_specs=pl.BlockSpec((None, T_tile, C), lambda t, b: (b, t, 0)),
        ),
        compiler_params=pltpu.CompilerParams(
            dimension_semantics=("parallel", "parallel"),
            vmem_limit_bytes=48 * 1024 * 1024),
        cost_estimate=pl.CostEstimate(
            flops=flops, transcendentals=0, bytes_accessed=bytes_acc),
    )(x_g, halos, w1s, b1s, w2s, b2s)

    out = out if T_grid == T else out[:, :T, :]
    return jnp.transpose(out, (0, 2, 1))       # back to PyTorch NCL


# ------------------------------ param plumbing ---------------------------------

def pack_conv_weight_folded(w):
    """PyTorch Conv1d (C_out, C_in, K) f32 -> tap-folded (K*C_in, C_out) bf16."""
    C_out, C_in, K = w.shape
    return jnp.transpose(w, (2, 1, 0)).reshape(K * C_in, C_out).astype(jnp.bfloat16)


def pack_resblock_params(params):
    """One-time (hoisted) packing of raw PyTorch-layout params for the kernel."""
    w1s = jnp.stack([pack_conv_weight_folded(p["w1"]) for p in params])
    w2s = jnp.stack([pack_conv_weight_folded(p["w2"]) for p in params])
    b1s = jnp.stack([p["b1"].reshape(1, -1) for p in params]).astype(jnp.float32)
    b2s = jnp.stack([p["b2"].reshape(1, -1) for p in params]).astype(jnp.float32)
    return {"w1s": w1s, "b1s": b1s, "w2s": w2s, "b2s": b2s,
            "dilations": tuple(int(p["dilation"]) for p in params)}


def init_params(key, channels, kernel_size=3, dilation=(1, 3, 5)):
    """Deterministic weights in PyTorch layout (weight_norm at init == identity)."""
    pairs = []
    for d in dilation:
        k1, k2, k3, k4, key = jax.random.split(key, 5)
        w1 = 0.01 * jax.random.normal(k1, (channels, channels, kernel_size), jnp.float32)
        b1 = 0.01 * jax.random.normal(k2, (channels,), jnp.float32)
        w2 = 0.01 * jax.random.normal(k3, (channels, channels, kernel_size), jnp.float32)
        b2 = 0.01 * jax.random.normal(k4, (channels,), jnp.float32)
        pairs.append({"w1": w1, "b1": b1, "w2": w2, "b2": b2, "dilation": int(d)})
    return pairs


# --------------------------- pure-JAX reference ---------------------------------

def conv1d_ref(x_ncl, w, b, *, dilation):
    pad = get_padding(w.shape[-1], dilation)
    y = jax.lax.conv_general_dilated(
        x_ncl, w, window_strides=(1,), padding=[(pad, pad)],
        rhs_dilation=(dilation,),
        dimension_numbers=("NCH", "OIH", "NCH"),
        precision=jax.lax.Precision.HIGHEST)
    return y + b[None, :, None]


def resblock1_ref(x_ncl, params):
    x = x_ncl
    for p in params:
        xt = _leaky(x)
        xt = conv1d_ref(xt, p["w1"], p["b1"], dilation=p["dilation"])
        xt = _leaky(xt)
        xt = conv1d_ref(xt, p["w2"], p["b2"], dilation=1)
        x = xt + x
    return x


# ----------------------------------- main ---------------------------------------

def _check_close(a, r, tol=2e-2):
    a = np.asarray(a)
    r = np.asarray(r)
    scale = max(float(np.abs(r).max()), 1.0)
    err = float(np.abs(a - r).max())
    assert err <= tol * scale, f"mismatch: max abs err {err} vs scale {scale}"


if __name__ == "__main__":
    key = jax.random.PRNGKey(0)
    pkey, xkey = jax.random.split(key)

    # C = 128 -> channels fill the 128-wide lane dim; T = 250 (not a tile
    # multiple) exercises the padding / boundary-mask path.
    B, C, T = 2, 128, 250
    params = init_params(pkey, channels=C, kernel_size=3, dilation=(1, 3, 5))
    packed = pack_resblock_params(params)      # weights packed once (hoisted)

    x = jax.random.normal(xkey, (B, C, T), jnp.float32)   # PyTorch NCL input

    # t_tile=128 -> 2 time tiles x 2 batches: exercises halos + boundary masks
    # and gives an even parallel grid extent (v7x megacore).
    out = resblock1_pallas(x, packed, t_tile=128)
    out = jax.block_until_ready(out)

    ref = resblock1_ref(x, params)
    _check_close(out, ref)

    print("KERNEL_OK")
</pallas_src>

<mosaic_0001>
module attributes {stable_mosaic.version = 11 : i64} {
  func.func @kernel(%arg0: i32, %arg1: i32, %arg2: memref<1x128x128xf32, #tpu.memory_space<vmem>>, %arg3: memref<1x1x32x128xf32, #tpu.memory_space<vmem>>, %arg4: memref<3x384x128xbf16, #tpu.memory_space<vmem>>, %arg5: memref<3x1x128xf32, #tpu.memory_space<vmem>>, %arg6: memref<3x384x128xbf16, #tpu.memory_space<vmem>>, %arg7: memref<3x1x128xf32, #tpu.memory_space<vmem>>, %arg8: memref<1x128x128xf32, #tpu.memory_space<vmem>>) attributes {dimension_semantics = [#tpu.dimension_semantics<parallel>, #tpu.dimension_semantics<parallel>], iteration_bounds = array<i64: 2, 2>, scalar_prefetch = 0 : i64, scratch_operands = 0 : i64, tpu.core_type = #tpu.core_type<tc>, window_params = [{transform_indices = @transform_0, window_bounds = array<i64: 1, 128, 128>}, {transform_indices = @transform_1, window_bounds = array<i64: 1, 1, 32, 128>}, {pipeline_mode = #tpu.pipeline_mode<synchronous>, transform_indices = @transform_2, window_bounds = array<i64: 3, 384, 128>}, {pipeline_mode = #tpu.pipeline_mode<synchronous>, transform_indices = @transform_3, window_bounds = array<i64: 3, 1, 128>}, {pipeline_mode = #tpu.pipeline_mode<synchronous>, transform_indices = @transform_4, window_bounds = array<i64: 3, 384, 128>}, {pipeline_mode = #tpu.pipeline_mode<synchronous>, transform_indices = @transform_5, window_bounds = array<i64: 3, 1, 128>}, {transform_indices = @transform_6, window_bounds = array<i64: 1, 128, 128>}]} {
    %c128_i32 = arith.constant 128 : i32
    %0 = arith.muli %arg0, %c128_i32 : i32
    %c0 = arith.constant 0 : index
    %c0_0 = arith.constant 0 : index
    %c0_1 = arith.constant 0 : index
    %c0_2 = arith.constant 0 : index
    %1 = vector.load %arg3[%c0, %c0_0, %c0_1, %c0_2] : memref<1x1x32x128xf32, #tpu.memory_space<vmem>>, vector<1x1x16x128xf32>
    %2 = vector.shape_cast %1 : vector<1x1x16x128xf32> to vector<16x128xf32>
    %c0_3 = arith.constant 0 : index
    %c0_4 = arith.constant 0 : index
    %c0_5 = arith.constant 0 : index
    %3 = vector.load %arg2[%c0_3, %c0_4, %c0_5] : memref<1x128x128xf32, #tpu.memory_space<vmem>>, vector<1x128x128xf32>
    %4 = vector.shape_cast %3 : vector<1x128x128xf32> to vector<128x128xf32>
    %c0_6 = arith.constant 0 : index
    %c0_7 = arith.constant 0 : index
    %c16 = arith.constant 16 : index
    %c0_8 = arith.constant 0 : index
    %5 = vector.load %arg3[%c0_6, %c0_7, %c16, %c0_8] : memref<1x1x32x128xf32, #tpu.memory_space<vmem>>, vector<1x1x16x128xf32>
    %6 = vector.shape_cast %5 : vector<1x1x16x128xf32> to vector<16x128xf32>
    %7 = tpu.concatenate %2, %4, %6 in 0 : vector<16x128xf32>, vector<128x128xf32>, vector<16x128xf32> -> vector<160x128xf32>
    %cst = arith.constant 0.000000e+00 : f32
    %8 = vector.broadcast %cst : f32 to vector<160x128xf32>
    %9 = arith.cmpf oge, %7, %8 : vector<160x128xf32>
    %cst_9 = arith.constant 1.000000e-01 : f32
    %10 = vector.broadcast %cst_9 : f32 to vector<160x128xf32>
    %11 = arith.mulf %10, %7 : vector<160x128xf32>
    %12 = arith.select %9, %7, %11 : vector<160x128xi1>, vector<160x128xf32>
    %13 = arith.truncf %12 : vector<160x128xf32> to vector<160x128xbf16>
    %14 = vector.extract_strided_slice %13 {offsets = [0, 0], sizes = [158, 128], strides = [1, 1]} : vector<160x128xbf16> to vector<158x128xbf16>
    %15 = vector.extract_strided_slice %13 {offsets = [1, 0], sizes = [158, 128], strides = [1, 1]} : vector<160x128xbf16> to vector<158x128xbf16>
    %16 = vector.extract_strided_slice %13 {offsets = [2, 0], sizes = [158, 128], strides = [1, 1]} : vector<160x128xbf16> to vector<158x128xbf16>
    %17 = tpu.concatenate %14, %15, %16 in 1 : vector<158x128xbf16>, vector<158x128xbf16>, vector<158x128xbf16> -> vector<158x384xbf16>
    %c0_10 = arith.constant 0 : index
    %c0_11 = arith.constant 0 : index
    %c0_12 = arith.constant 0 : index
    %18 = vector.load %arg4[%c0_10, %c0_11, %c0_12] : memref<3x384x128xbf16, #tpu.memory_space<vmem>>, vector<1x384x128xbf16>
    %19 = vector.shape_cast %18 : vector<1x384x128xbf16> to vector<384x128xbf16>
    %cst_13 = arith.constant dense<0.000000e+00> : vector<158x128xf32>
    %20 = tpu.matmul %17, %19, %cst_13 {dimension_numbers = #tpu.dot_dimension_numbers<[1], [0], [0], [1], [0, 0, 1, 1], [], []>} : vector<158x384xbf16>, vector<384x128xbf16>, vector<158x128xf32> -> vector<158x128xf32>
    %c0_14 = arith.constant 0 : index
    %c0_15 = arith.constant 0 : index
    %c0_16 = arith.constant 0 : index
    %21 = vector.load %arg5[%c0_14, %c0_15, %c0_16] : memref<3x1x128xf32, #tpu.memory_space<vmem>>, vector<1x1x128xf32>
    %22 = vector.shape_cast %21 : vector<1x1x128xf32> to vector<1x128xf32>
    %23 = vector.broadcast %22 : vector<1x128xf32> to vector<158x128xf32>
    %24 = arith.addf %20, %23 : vector<158x128xf32>
    %cst_17 = arith.constant 0.000000e+00 : f32
    %25 = vector.broadcast %cst_17 : f32 to vector<158x128xf32>
    %26 = arith.cmpf oge, %24, %25 : vector<158x128xf32>
    %cst_18 = arith.constant 1.000000e-01 : f32
    %27 = vector.broadcast %cst_18 : f32 to vector<158x128xf32>
    %28 = arith.mulf %27, %24 : vector<158x128xf32>
    %29 = arith.select %26, %24, %28 : vector<158x128xi1>, vector<158x128xf32>
    %c15_i32 = arith.constant 15 : i32
    %30 = arith.subi %0, %c15_i32 : i32
    %31 = tpu.iota {dimensions = array<i32: 0>} : vector<158x1xi32>
    %32 = vector.broadcast %30 : i32 to vector<158x1xi32>
    %33 = arith.addi %32, %31 : vector<158x1xi32>
    %c0_i32 = arith.constant 0 : i32
    %34 = vector.broadcast %c0_i32 : i32 to vector<158x1xi32>
    %35 = arith.cmpi sge, %33, %34 : vector<158x1xi32>
    %c250_i32 = arith.constant 250 : i32
    %36 = vector.broadcast %c250_i32 : i32 to vector<158x1xi32>
    %37 = arith.cmpi slt, %33, %36 : vector<158x1xi32>
    %38 = arith.andi %35, %37 : vector<158x1xi1>
    %cst_19 = arith.constant 0.000000e+00 : f32
    %39 = vector.shape_cast %38 : vector<158x1xi1> to vector<158x1xi1>
    %40 = vector.broadcast %39 : vector<158x1xi1> to vector<158x128xi1>
    %41 = vector.broadcast %cst_19 : f32 to vector<158x128xf32>
    %42 = arith.select %40, %29, %41 : vector<158x128xi1>, vector<158x128xf32>
    %43 = arith.truncf %42 : vector<158x128xf32> to vector<158x128xbf16>
    %44 = vector.extract_strided_slice %43 {offsets = [0, 0], sizes = [156, 128], strides = [1, 1]} : vector<158x128xbf16> to vector<156x128xbf16>
    %45 = vector.extract_strided_slice %43 {offsets = [1, 0], sizes = [156, 128], strides = [1, 1]} : vector<158x128xbf16> to vector<156x128xbf16>
    %46 = vector.extract_strided_slice %43 {offsets = [2, 0], sizes = [156, 128], strides = [1, 1]} : vector<158x128xbf16> to vector<156x128xbf16>
    %47 = tpu.concatenate %44, %45, %46 in 1 : vector<156x128xbf16>, vector<156x128xbf16>, vector<156x128xbf16> -> vector<156x384xbf16>
    %c0_20 = arith.constant 0 : index
    %c0_21 = arith.constant 0 : index
    %c0_22 = arith.constant 0 : index
    %48 = vector.load %arg6[%c0_20, %c0_21, %c0_22] : memref<3x384x128xbf16, #tpu.memory_space<vmem>>, vector<1x384x128xbf16>
    %49 = vector.shape_cast %48 : vector<1x384x128xbf16> to vector<384x128xbf16>
    %cst_23 = arith.constant dense<0.000000e+00> : vector<156x128xf32>
    %50 = tpu.matmul %47, %49, %cst_23 {dimension_numbers = #tpu.dot_dimension_numbers<[1], [0], [0], [1], [0, 0, 1, 1], [], []>} : vector<156x384xbf16>, vector<384x128xbf16>, vector<156x128xf32> -> vector<156x128xf32>
    %c0_24 = arith.constant 0 : index
    %c0_25 = arith.constant 0 : index
    %c0_26 = arith.constant 0 : index
    %51 = vector.load %arg7[%c0_24, %c0_25, %c0_26] : memref<3x1x128xf32, #tpu.memory_space<vmem>>, vector<1x1x128xf32>
    %52 = vector.shape_cast %51 : vector<1x1x128xf32> to vector<1x128xf32>
    %53 = vector.broadcast %52 : vector<1x128xf32> to vector<156x128xf32>
    %54 = arith.addf %50, %53 : vector<156x128xf32>
    %55 = vector.extract_strided_slice %7 {offsets = [2, 0], sizes = [156, 128], strides = [1, 1]} : vector<160x128xf32> to vector<156x128xf32>
    %56 = arith.addf %54, %55 : vector<156x128xf32>
    %c14_i32 = arith.constant 14 : i32
    %57 = arith.subi %0, %c14_i32 : i32
    %58 = tpu.iota {dimensions = array<i32: 0>} : vector<156x1xi32>
    %59 = vector.broadcast %57 : i32 to vector<156x1xi32>
    %60 = arith.addi %59, %58 : vector<156x1xi32>
    %c0_i32_27 = arith.constant 0 : i32
    %61 = vector.broadcast %c0_i32_27 : i32 to vector<156x1xi32>
    %62 = arith.cmpi sge, %60, %61 : vector<156x1xi32>
    %c250_i32_28 = arith.constant 250 : i32
    %63 = vector.broadcast %c250_i32_28 : i32 to vector<156x1xi32>
    %64 = arith.cmpi slt, %60, %63 : vector<156x1xi32>
    %65 = arith.andi %62, %64 : vector<156x1xi1>
    %cst_29 = arith.constant 0.000000e+00 : f32
    %66 = vector.shape_cast %65 : vector<156x1xi1> to vector<156x1xi1>
    %67 = vector.broadcast %66 : vector<156x1xi1> to vector<156x128xi1>
    %68 = vector.broadcast %cst_29 : f32 to vector<156x128xf32>
    %69 = arith.select %67, %56, %68 : vector<156x128xi1>, vector<156x128xf32>
    %cst_30 = arith.constant 0.000000e+00 : f32
    %70 = vector.broadcast %cst_30 : f32 to vector<156x128xf32>
    %71 = arith.cmpf oge, %69, %70 : vector<156x128xf32>
    %cst_31 = arith.constant 1.000000e-01 : f32
    %72 = vector.broadcast %cst_31 : f32 to vector<156x128xf32>
    %73 = arith.mulf %72, %69 : vector<156x128xf32>
    %74 = arith.select %71, %69, %73 : vector<156x128xi1>, vector<156x128xf32>
    %75 = arith.truncf %74 : vector<156x128xf32> to vector<156x128xbf16>
    %76 = vector.extract_strided_slice %75 {offsets = [0, 0], sizes = [150, 128], strides = [1, 1]} : vector<156x128xbf16> to vector<150x128xbf16>
    %77 = vector.extract_strided_slice %75 {offsets = [3, 0], sizes = [150, 128], strides = [1, 1]} : vector<156x128xbf16> to vector<150x128xbf16>
    %78 = vector.extract_strided_slice %75 {offsets = [6, 0], sizes = [150, 128], strides = [1, 1]} : vector<156x128xbf16> to vector<150x128xbf16>
    %79 = tpu.concatenate %76, %77, %78 in 1 : vector<150x128xbf16>, vector<150x128xbf16>, vector<150x128xbf16> -> vector<150x384xbf16>
    %c1 = arith.constant 1 : index
    %c0_32 = arith.constant 0 : index
    %c0_33 = arith.constant 0 : index
    %80 = vector.load %arg4[%c1, %c0_32, %c0_33] : memref<3x384x128xbf16, #tpu.memory_space<vmem>>, vector<1x384x128xbf16>
    %81 = vector.shape_cast %80 : vector<1x384x128xbf16> to vector<384x128xbf16>
    %cst_34 = arith.constant dense<0.000000e+00> : vector<150x128xf32>
    %82 = tpu.matmul %79, %81, %cst_34 {dimension_numbers = #tpu.dot_dimension_numbers<[1], [0], [0], [1], [0, 0, 1, 1], [], []>} : vector<150x384xbf16>, vector<384x128xbf16>, vector<150x128xf32> -> vector<150x128xf32>
    %c1_35 = arith.constant 1 : index
    %c0_36 = arith.constant 0 : index
    %c0_37 = arith.constant 0 : index
    %83 = vector.load %arg5[%c1_35, %c0_36, %c0_37] : memref<3x1x128xf32, #tpu.memory_space<vmem>>, vector<1x1x128xf32>
    %84 = vector.shape_cast %83 : vector<1x1x128xf32> to vector<1x128xf32>
    %85 = vector.broadcast %84 : vector<1x128xf32> to vector<150x128xf32>
    %86 = arith.addf %82, %85 : vector<150x128xf32>
    %cst_38 = arith.constant 0.000000e+00 : f32
    %87 = vector.broadcast %cst_38 : f32 to vector<150x128xf32>
    %88 = arith.cmpf oge, %86, %87 : vector<150x128xf32>
    %cst_39 = arith.constant 1.000000e-01 : f32
    %89 = vector.broadcast %cst_39 : f32 to vector<150x128xf32>
    %90 = arith.mulf %89, %86 : vector<150x128xf32>
    %91 = arith.select %88, %86, %90 : vector<150x128xi1>, vector<150x128xf32>
    %c11_i32 = arith.constant 11 : i32
    %92 = arith.subi %0, %c11_i32 : i32
    %93 = tpu.iota {dimensions = array<i32: 0>} : vector<150x1xi32>
    %94 = vector.broadcast %92 : i32 to vector<150x1xi32>
    %95 = arith.addi %94, %93 : vector<150x1xi32>
    %c0_i32_40 = arith.constant 0 : i32
    %96 = vector.broadcast %c0_i32_40 : i32 to vector<150x1xi32>
    %97 = arith.cmpi sge, %95, %96 : vector<150x1xi32>
    %c250_i32_41 = arith.constant 250 : i32
    %98 = vector.broadcast %c250_i32_41 : i32 to vector<150x1xi32>
    %99 = arith.cmpi slt, %95, %98 : vector<150x1xi32>
    %100 = arith.andi %97, %99 : vector<150x1xi1>
    %cst_42 = arith.constant 0.000000e+00 : f32
    %101 = vector.shape_cast %100 : vector<150x1xi1> to vector<150x1xi1>
    %102 = vector.broadcast %101 : vector<150x1xi1> to vector<150x128xi1>
    %103 = vector.broadcast %cst_42 : f32 to vector<150x128xf32>
    %104 = arith.select %102, %91, %103 : vector<150x128xi1>, vector<150x128xf32>
    %105 = arith.truncf %104 : vector<150x128xf32> to vector<150x128xbf16>
    %106 = vector.extract_strided_slice %105 {offsets = [0, 0], sizes = [148, 128], strides = [1, 1]} : vector<150x128xbf16> to vector<148x128xbf16>
    %107 = vector.extract_strided_slice %105 {offsets = [1, 0], sizes = [148, 128], strides = [1, 1]} : vector<150x128xbf16> to vector<148x128xbf16>
    %108 = vector.extract_strided_slice %105 {offsets = [2, 0], sizes = [148, 128], strides = [1, 1]} : vector<150x128xbf16> to vector<148x128xbf16>
    %109 = tpu.concatenate %106, %107, %108 in 1 : vector<148x128xbf16>, vector<148x128xbf16>, vector<148x128xbf16> -> vector<148x384xbf16>
    %c1_43 = arith.constant 1 : index
    %c0_44 = arith.constant 0 : index
    %c0_45 = arith.constant 0 : index
    %110 = vector.load %arg6[%c1_43, %c0_44, %c0_45] : memref<3x384x128xbf16, #tpu.memory_space<vmem>>, vector<1x384x128xbf16>
    %111 = vector.shape_cast %110 : vector<1x384x128xbf16> to vector<384x128xbf16>
    %cst_46 = arith.constant dense<0.000000e+00> : vector<148x128xf32>
    %112 = tpu.matmul %109, %111, %cst_46 {dimension_numbers = #tpu.dot_dimension_numbers<[1], [0], [0], [1], [0, 0, 1, 1], [], []>} : vector<148x384xbf16>, vector<384x128xbf16>, vector<148x128xf32> -> vector<148x128xf32>
    %c1_47 = arith.constant 1 : index
    %c0_48 = arith.constant 0 : index
    %c0_49 = arith.constant 0 : index
    %113 = vector.load %arg7[%c1_47, %c0_48, %c0_49] : memref<3x1x128xf32, #tpu.memory_space<vmem>>, vector<1x1x128xf32>
    %114 = vector.shape_cast %113 : vector<1x1x128xf32> to vector<1x128xf32>
    %115 = vector.broadcast %114 : vector<1x128xf32> to vector<148x128xf32>
    %116 = arith.addf %112, %115 : vector<148x128xf32>
    %117 = vector.extract_strided_slice %69 {offsets = [4, 0], sizes = [148, 128], strides = [1, 1]} : vector<156x128xf32> to vector<148x128xf32>
    %118 = arith.addf %116, %117 : vector<148x128xf32>
    %c10_i32 = arith.constant 10 : i32
    %119 = arith.subi %0, %c10_i32 : i32
    %120 = tpu.iota {dimensions = array<i32: 0>} : vector<148x1xi32>
    %121 = vector.broadcast %119 : i32 to vector<148x1xi32>
    %122 = arith.addi %121, %120 : vector<148x1xi32>
    %c0_i32_50 = arith.constant 0 : i32
    %123 = vector.broadcast %c0_i32_50 : i32 to vector<148x1xi32>
    %124 = arith.cmpi sge, %122, %123 : vector<148x1xi32>
    %c250_i32_51 = arith.constant 250 : i32
    %125 = vector.broadcast %c250_i32_51 : i32 to vector<148x1xi32>
    %126 = arith.cmpi slt, %122, %125 : vector<148x1xi32>
    %127 = arith.andi %124, %126 : vector<148x1xi1>
    %cst_52 = arith.constant 0.000000e+00 : f32
    %128 = vector.shape_cast %127 : vector<148x1xi1> to vector<148x1xi1>
    %129 = vector.broadcast %128 : vector<148x1xi1> to vector<148x128xi1>
    %130 = vector.broadcast %cst_52 : f32 to vector<148x128xf32>
    %131 = arith.select %129, %118, %130 : vector<148x128xi1>, vector<148x128xf32>
    %cst_53 = arith.constant 0.000000e+00 : f32
    %132 = vector.broadcast %cst_53 : f32 to vector<148x128xf32>
    %133 = arith.cmpf oge, %131, %132 : vector<148x128xf32>
    %cst_54 = arith.constant 1.000000e-01 : f32
    %134 = vector.broadcast %cst_54 : f32 to vector<148x128xf32>
    %135 = arith.mulf %134, %131 : vector<148x128xf32>
    %136 = arith.select %133, %131, %135 : vector<148x128xi1>, vector<148x128xf32>
    %137 = arith.truncf %136 : vector<148x128xf32> to vector<148x128xbf16>
    %138 = vector.extract_strided_slice %137 {offsets = [0, 0], sizes = [138, 128], strides = [1, 1]} : vector<148x128xbf16> to vector<138x128xbf16>
    %139 = vector.extract_strided_slice %137 {offsets = [5, 0], sizes = [138, 128], strides = [1, 1]} : vector<148x128xbf16> to vector<138x128xbf16>
    %140 = vector.extract_strided_slice %137 {offsets = [10, 0], sizes = [138, 128], strides = [1, 1]} : vector<148x128xbf16> to vector<138x128xbf16>
    %141 = tpu.concatenate %138, %139, %140 in 1 : vector<138x128xbf16>, vector<138x128xbf16>, vector<138x128xbf16> -> vector<138x384xbf16>
    %c2 = arith.constant 2 : index
    %c0_55 = arith.constant 0 : index
    %c0_56 = arith.constant 0 : index
    %142 = vector.load %arg4[%c2, %c0_55, %c0_56] : memref<3x384x128xbf16, #tpu.memory_space<vmem>>, vector<1x384x128xbf16>
    %143 = vector.shape_cast %142 : vector<1x384x128xbf16> to vector<384x128xbf16>
    %cst_57 = arith.constant dense<0.000000e+00> : vector<138x128xf32>
    %144 = tpu.matmul %141, %143, %cst_57 {dimension_numbers = #tpu.dot_dimension_numbers<[1], [0], [0], [1], [0, 0, 1, 1], [], []>} : vector<138x384xbf16>, vector<384x128xbf16>, vector<138x128xf32> -> vector<138x128xf32>
    %c2_58 = arith.constant 2 : index
    %c0_59 = arith.constant 0 : index
    %c0_60 = arith.constant 0 : index
    %145 = vector.load %arg5[%c2_58, %c0_59, %c0_60] : memref<3x1x128xf32, #tpu.memory_space<vmem>>, vector<1x1x128xf32>
    %146 = vector.shape_cast %145 : vector<1x1x128xf32> to vector<1x128xf32>
    %147 = vector.broadcast %146 : vector<1x128xf32> to vector<138x128xf32>
    %148 = arith.addf %144, %147 : vector<138x128xf32>
    %cst_61 = arith.constant 0.000000e+00 : f32
    %149 = vector.broadcast %cst_61 : f32 to vector<138x128xf32>
    %150 = arith.cmpf oge, %148, %149 : vector<138x128xf32>
    %cst_62 = arith.constant 1.000000e-01 : f32
    %151 = vector.broadcast %cst_62 : f32 to vector<138x128xf32>
    %152 = arith.mulf %151, %148 : vector<138x128xf32>
    %153 = arith.select %150, %148, %152 : vector<138x128xi1>, vector<138x128xf32>
    %c5_i32 = arith.constant 5 : i32
    %154 = arith.subi %0, %c5_i32 : i32
    %155 = tpu.iota {dimensions = array<i32: 0>} : vector<138x1xi32>
    %156 = vector.broadcast %154 : i32 to vector<138x1xi32>
    %157 = arith.addi %156, %155 : vector<138x1xi32>
    %c0_i32_63 = arith.constant 0 : i32
    %158 = vector.broadcast %c0_i32_63 : i32 to vector<138x1xi32>
    %159 = arith.cmpi sge, %157, %158 : vector<138x1xi32>
    %c250_i32_64 = arith.constant 250 : i32
    %160 = vector.broadcast %c250_i32_64 : i32 to vector<138x1xi32>
    %161 = arith.cmpi slt, %157, %160 : vector<138x1xi32>
    %162 = arith.andi %159, %161 : vector<138x1xi1>
    %cst_65 = arith.constant 0.000000e+00 : f32
    %163 = vector.shape_cast %162 : vector<138x1xi1> to vector<138x1xi1>
    %164 = vector.broadcast %163 : vector<138x1xi1> to vector<138x128xi1>
    %165 = vector.broadcast %cst_65 : f32 to vector<138x128xf32>
    %166 = arith.select %164, %153, %165 : vector<138x128xi1>, vector<138x128xf32>
    %167 = arith.truncf %166 : vector<138x128xf32> to vector<138x128xbf16>
    %168 = vector.extract_strided_slice %167 {offsets = [0, 0], sizes = [136, 128], strides = [1, 1]} : vector<138x128xbf16> to vector<136x128xbf16>
    %169 = vector.extract_strided_slice %167 {offsets = [1, 0], sizes = [136, 128], strides = [1, 1]} : vector<138x128xbf16> to vector<136x128xbf16>
    %170 = vector.extract_strided_slice %167 {offsets = [2, 0], sizes = [136, 128], strides = [1, 1]} : vector<138x128xbf16> to vector<136x128xbf16>
    %171 = tpu.concatenate %168, %169, %170 in 1 : vector<136x128xbf16>, vector<136x128xbf16>, vector<136x128xbf16> -> vector<136x384xbf16>
    %c2_66 = arith.constant 2 : index
    %c0_67 = arith.constant 0 : index
    %c0_68 = arith.constant 0 : index
    %172 = vector.load %arg6[%c2_66, %c0_67, %c0_68] : memref<3x384x128xbf16, #tpu.memory_space<vmem>>, vector<1x384x128xbf16>
    %173 = vector.shape_cast %172 : vector<1x384x128xbf16> to vector<384x128xbf16>
    %cst_69 = arith.constant dense<0.000000e+00> : vector<136x128xf32>
    %174 = tpu.matmul %171, %173, %cst_69 {dimension_numbers = #tpu.dot_dimension_numbers<[1], [0], [0], [1], [0, 0, 1, 1], [], []>} : vector<136x384xbf16>, vector<384x128xbf16>, vector<136x128xf32> -> vector<136x128xf32>
    %c2_70 = arith.constant 2 : index
    %c0_71 = arith.constant 0 : index
    %c0_72 = arith.constant 0 : index
    %175 = vector.load %arg7[%c2_70, %c0_71, %c0_72] : memref<3x1x128xf32, #tpu.memory_space<vmem>>, vector<1x1x128xf32>
    %176 = vector.shape_cast %175 : vector<1x1x128xf32> to vector<1x128xf32>
    %177 = vector.broadcast %176 : vector<1x128xf32> to vector<136x128xf32>
    %178 = arith.addf %174, %177 : vector<136x128xf32>
    %179 = vector.extract_strided_slice %131 {offsets = [6, 0], sizes = [136, 128], strides = [1, 1]} : vector<148x128xf32> to vector<136x128xf32>
    %180 = arith.addf %178, %179 : vector<136x128xf32>
    %181 = vector.extract_strided_slice %180 {offsets = [4, 0], sizes = [128, 128], strides = [1, 1]} : vector<136x128xf32> to vector<128x128xf32>
    %c0_73 = arith.constant 0 : index
    %c0_74 = arith.constant 0 : index
    %c0_75 = arith.constant 0 : index
    %182 = vector.load %arg8[%c0_73, %c0_74, %c0_75] : memref<1x128x128xf32, #tpu.memory_space<vmem>>, vector<1x128x128xf32>
    %183 = vector.shape_cast %182 : vector<1x128x128xf32> to vector<128x128xf32>
    %184 = vector.shape_cast %181 : vector<128x128xf32> to vector<1x128x128xf32>
    tpu.vector_store %arg8[%c0_73, %c0_74, %c0_75], %184 {strides = array<i32>} : memref<1x128x128xf32, #tpu.memory_space<vmem>>, vector<1x128x128xf32>,
    return
  }
  func.func @transform_0(%arg0: i32, %arg1: i32) -> (i32, i32, i32) {
    %c0_i32 = arith.constant 0 : i32
    %c0_i32_0 = arith.constant 0 : i32
    return %arg1, %arg0, %c0_i32 : i32, i32, i32
  }
  func.func @transform_1(%arg0: i32, %arg1: i32) -> (i32, i32, i32, i32) {
    %c0_i32 = arith.constant 0 : i32
    %c0_i32_0 = arith.constant 0 : i32
    %c0_i32_1 = arith.constant 0 : i32
    return %arg1, %arg0, %c0_i32, %c0_i32_0 : i32, i32, i32, i32
  }
  func.func @transform_2(%arg0: i32, %arg1: i32) -> (i32, i32, i32) {
    %c0_i32 = arith.constant 0 : i32
    %c0_i32_0 = arith.constant 0 : i32
    %c0_i32_1 = arith.constant 0 : i32
    %c0_i32_2 = arith.constant 0 : i32
    return %c0_i32, %c0_i32_0, %c0_i32_1 : i32, i32, i32
  }
  func.func @transform_3(%arg0: i32, %arg1: i32) -> (i32, i32, i32) {
    %c0_i32 = arith.constant 0 : i32
    %c0_i32_0 = arith.constant 0 : i32
    %c0_i32_1 = arith.constant 0 : i32
    %c0_i32_2 = arith.constant 0 : i32
    return %c0_i32, %c0_i32_0, %c0_i32_1 : i32, i32, i32
  }
  func.func @transform_4(%arg0: i32, %arg1: i32) -> (i32, i32, i32) {
    %c0_i32 = arith.constant 0 : i32
    %c0_i32_0 = arith.constant 0 : i32
    %c0_i32_1 = arith.constant 0 : i32
    %c0_i32_2 = arith.constant 0 : i32
    return %c0_i32, %c0_i32_0, %c0_i32_1 : i32, i32, i32
  }
  func.func @transform_5(%arg0: i32, %arg1: i32) -> (i32, i32, i32) {
    %c0_i32 = arith.constant 0 : i32
    %c0_i32_0 = arith.constant 0 : i32
    %c0_i32_1 = arith.constant 0 : i32
    %c0_i32_2 = arith.constant 0 : i32
    return %c0_i32, %c0_i32_0, %c0_i32_1 : i32, i32, i32
  }
  func.func @transform_6(%arg0: i32, %arg1: i32) -> (i32, i32, i32) {
    %c0_i32 = arith.constant 0 : i32
    %c0_i32_0 = arith.constant 0 : i32
    return %arg1, %arg0, %c0_i32 : i32, i32, i32
  }
}

</mosaic_0001>

<bundles_post_ra>
// kernel: tpu_custom_call.1
= control target key start
LH: loop header
LB: loop body
LE: loop exit
PB: predicated region body
PF: predicated region fallthrough
CT: control target
= control target key end

     0   :  { %s7898_s0 = inlined_call_operand.hbm [shape: f32[2,256,128], index: 0, kind: input, shape index: {}]   ;;  %s7899_s1 = inlined_call_operand.hbm [shape: f32[2,2,32,128], index: 1, kind: input, shape index: {}]   ;;  %s7900_s2 = inlined_call_operand.hbm [shape: bf16[3,384,128], index: 2, kind: input, shape index: {}]   ;;  %s7901_s3 = inlined_call_operand.hbm [shape: f32[3,1,128], index: 3, kind: input, shape index: {}]   ;;  %s7902_s4 = inlined_call_operand.hbm [shape: bf16[3,384,128], index: 4, kind: input, shape index: {}]   ;;  %s7903_s5 = inlined_call_operand.vmem [shape: f32[3,1,128], index: 5, kind: input, shape index: {}]   ;;  %s7904_s6 = inlined_call_operand.hbm [shape: f32[2,256,128], index: 6, kind: output, shape index: {}]  }
   0x1   :  { %7915 = sst [smem:[#allocation29_spill]] %s7900_s2 }
   0x2   :  { %7916 = sst [smem:[#allocation30_spill]] %s7901_s3 }
   0x3   :  { %7917 = sst [smem:[#allocation31_spill]] %s7902_s4 }
   0x4   :  { %7918 = sst [smem:[#allocation32_spill]] %s7904_s6 }
   0x5   :  { %11 = vsyncpa [#allocation3], 0 }
   0x6   :  { %13 = vsyncpa [#allocation3 + $0x1], 0 }
   0x7   :  { %14 = vsyncpa [#allocation6], 0 }
   0x8   :  { %16 = vsyncpa [#allocation6 + $0x1], 0 }
   0x9   :  { %17 = vsyncpa [#allocation9], 0 }
   0xa   :  { %18 = vsyncpa [#allocation4], 0 }
   0xb   :  { %20 = vsyncpa [#allocation4 + $0x1], 0  ;;  %s6540_s21 = smov 0   ;;  %s6542_s22 = smov 0  }
   0xc   :  { %s6544_s23 = smov 0   ;;  %s6546_s24 = smov 0  }
   0xd   :  { %s6548_s25 = smov 0   ;;  %s6550_s26 = smov 0  }
   0xe   :  { %s6552_s27 = smov 0   ;;  %s6554_s28 = smov 0  }
   0xf LB: > { %7919 = sst [smem:[#allocation17_spill]] %s6464_s21  ;;  %s6581_s29 = sadd.s32 4294967295, %s6492_s28   ;;  %s6492_s28 = sphi %s6554_s28, %s26_s28   ;;  %s6488_s27 = sphi %s6552_s27, %s7961_s27   ;;  %s6484_s26 = sphi %s6550_s26, %s7960_s26   ;;  %s6480_s25 = sphi %s6548_s25, %s7959_s25   ;;  %s6476_s24 = sphi %s6546_s24, %s7958_s24   ;;  %s6472_s23 = sphi %s6544_s23, %s7953_s23   ;;  %s6468_s22 = sphi %s6542_s22, %s7957_s22   ;;  %s6464_s21 = sphi %s6540_s21, %s7956_s21  }
  0x10   : > { %7920 = sst [smem:[#allocation18_spill]] %s6472_s23  ;;  %s5312_s30 = sadd.s32 4294967294, %s6492_s28  }
  0x11   : > { %7921 = sst [smem:[#allocation19_spill]] %s6476_s24  ;;  %p60_p0 = scmp.ne.s32.totalorder %s6468_s22, %s6464_s21 }
  0x12   : > { %p61_p1 = scmp.eq.s32.totalorder %s6581_s29, 0  ;;  %p198_p2 = scmp.eq.s32.totalorder %s6581_s29, 3 }
  0x13   : > { %p204_p3 = scmp.eq.s32.totalorder %s5312_s30, 3  ;;  %p5313_p5 = scmp.ge.s32.totalorder %s6492_s28, 1 }
  0x14   : > { %p6590_p4 = por %p61_p1, %p60_p0  ;;  %p211_p7 = scmp.lt.s32.totalorder %s6492_s28, 5 }
  0x15   : > { %p6595_p6 = por %p204_p3, %p60_p0  ;;  %s7925_s2 = sld [smem:[#allocation29_spill]] }
  0x16   : > { %p6603_p8 = pnand %p5313_p5, %p211_p7  ;;  %s6494_s13 = smov [#allocation7]  }
  0x17   : > { %s7923_s8 = scalar_select %p6595_p6, 1, 0 }
  0x18   : > { %p6101_p9 = pneg %p6603_p8  ;;  %s224_s14 = sshll.u32 %s6494_s13, 4  ;;  %s225_s14 = int_to_ptr.vmem [resolvable:$true] %s224_s14 }
  0x19   : > { %7924 = sst [smem:[#allocation20_spill]] %s7923_s8  ;;  %s6495_s19 = smov 64  }
  0x1a   : > { %p6611_p10 = pnand %p6101_p9, %p61_p1  ;;  %s7928_s3 = sld [smem:[#allocation30_spill]] }
  0x1b   : > { %s222_s11 = sshll.u32 %s7925_s2, 4  ;;  %s6496_s20 = smov 4   ;;  %s223_s11 = int_to_ptr.hbm [resolvable:$true] %s222_s11 }
  0x1c   : > { %6104 = dma.hbm_to_vmem [thread:$0]  (!%p6611_p10), %s223_s11, 9216, %s225_s14, [#allocation6], %s6495_s19, %s6495_s19, %s6496_s20  }
  0x1d   : > { %s6497_s30 = smov [#allocation8]   ;;  %s6498_s10 = smov 16  }
  0x1e   : > { %s238_s9 = sshll.u32 %s6497_s30, 4  ;;  %s6499_s13 = smov 1   ;;  %s239_s9 = int_to_ptr.vmem [resolvable:$true] %s238_s9 }
  0x1f   : > { %s7929_s4 = sld [smem:[#allocation31_spill]]  ;;  %s6500_s11 = smov [#allocation10]  }
  0x20   : > { %s236_s18 = sshll.u32 %s7928_s3, 4  ;;  %s252_s14 = sshll.u32 %s6500_s11, 4  ;;  %s237_s18 = int_to_ptr.hbm [resolvable:$true] %s236_s18  ;;  %s253_s14 = int_to_ptr.vmem [resolvable:$true] %s252_s14 }
  0x21   : > { %6107 = dma.hbm_to_vmem [thread:$0]  (!%p6611_p10), %s237_s18, 48, %s239_s9, [#allocation9], %s6498_s10, %s6498_s10, %s6499_s13  }
  0x22   : > { %s35_s30 = sadd.s32 1, %s6484_s26  ;;  %s38_s3 = sadd.s32 1, %s6488_s27 }
  0x23   : > { %p36_p11 = scmp.ge.s32.totalorder %s35_s30, 2  ;;  %s47_s8 = sadd.s32 1, %s6472_s23 }
  0x24   : > { %p54_p12 = scmp.ne.s32.totalorder %s6472_s23, %s6468_s22  ;;  %p55_p13 = scmp.eq.s32.totalorder %s6492_s28, 0 }
  0x25   : > { %s250_s2 = sshll.u32 %s7929_s4, 4  ;;  %s7963_s30 = smov (%p36_p11, %s35_s30), 0  ;;  %s251_s2 = int_to_ptr.hbm [resolvable:$true] %s250_s2 }
  0x26   : > { %6110 = dma.hbm_to_vmem [thread:$0]  (!%p6611_p10), %s251_s2, 9216, %s253_s14, [#allocation9], %s6495_s19, %s6495_s19, %s6496_s20  }
  0x27   : > { %7930 = sst [smem:[#allocation21_spill]] %s7963_s30  ;;  %s7965_s3 = smov (!%p36_p11, %s38_s3), %s6488_s27 }
  0x28   : > { %s42_s18 = ssub.s32 %s6484_s26, %s7963_s30  ;;  %p40_p0 = scmp.ge.s32.totalorder %s7965_s3, 2 }
  0x29   : > { %p6640_p3 = por %p198_p2, %p54_p12  ;;  %p6644_p5 = por %p55_p13, %p54_p12 }
  0x2a   : > { %p6125_p7 = scmp.lt.s32.totalorder %s6492_s28, 4  ;;  %s7967_s3 = smov (%p40_p0, %s7965_s3), 0 }
  0x2b   : > { %s7931_s15 = scalar_select %p6640_p3, 1, 0 }
  0x2c   : > { %7934 = sst [smem:[#allocation23_spill]] %s7967_s3  ;;  %s269_s19 = sand.u32 1, %s6472_s23  }
  0x2d   : > { %7932 = sst [smem:[#allocation22_spill]] %s7931_s15  ;;  %s5319_s20 = sshll.u32 %s6488_s27, 4 }
  0x2e   : > { %s43_s9 = ssub.s32 %s6488_s27, %s7967_s3  ;;  %s5318_s13 = sshll.u32 %s269_s19, 7 }
  0x2f   : > { %s44_s10 = sor.u32 %s43_s9, %s42_s18  ;;  %s5320_s16 = sshll.u32 %s6484_s26, 5 }
  0x30   : > { %p45_p9 = scmp.eq.s32.totalorder %s44_s10, 0  ;;  %s273_s17 = scalar_lea.vmem [#allocation2], %s5318_s13 }
  0x31   : > { %s283_s11 = sshll.u32 %s273_s17, 4  ;;  %s278_s4 = sadd.s32 %s5320_s16, %s5319_s20  ;;  %s284_s11 = int_to_ptr.vmem [resolvable:$true] %s283_s11 }
  0x32   : > { %s6657_s14 = scalar_select %p45_p9, %s6472_s23, %s47_s8  }
  0x33   : > { %s5321_s30 = sshll.u32 %s278_s4, 3  ;;  %p6663_p2 = pnand %p6125_p7, %p6644_p5 }
  0x34   : > { %7935 = sst [smem:[#allocation24_spill]] %s6657_s14  ;;  %s280_s10 = scalar_lea.hbm %s7898_s0, %s5321_s30 }
  0x35   : > { %s281_s13 = sshll.u32 %s280_s10, 4  ;;  %s270_s17 = scalar_lea.sflag [#allocation3], %s269_s19  ;;  %s282_s13 = int_to_ptr.hbm [resolvable:$true] %s281_s13 }
  0x36   : > { %s6501_s3 = smov 128   ;;  %s6502_s8 = smov 8  }
  0x37   : > { %6114 = dma.hbm_to_vmem [thread:$0]  (!%p6663_p2), %s282_s13, 2048, %s284_s11, %s270_s17, %s6501_s3, %s6501_s3, %s6502_s8  }
  0x38   : > { %s5322_s4 = sshll.u32 %s269_s19, 5  ;;  %s293_s2 = sand.u32 1, %s6492_s28  }
  0x39   : > { %s5323_s20 = sshll.u32 %s6488_s27, 2  ;;  %s5324_s16 = sshll.u32 %s6484_s26, 3 }
  0x3a   : > { %s302_s14 = sadd.s32 %s5324_s16, %s5323_s20  ;;  %s297_s23 = scalar_lea.vmem [#allocation5], %s5322_s4 }
  0x3b   : > { %s307_s15 = sshll.u32 %s297_s23, 4  ;;  %s5325_s6 = sshll.u32 %s302_s14, 3  ;;  %s308_s15 = int_to_ptr.vmem [resolvable:$true] %s307_s15 }
  0x3c   : > { %s304_s30 = scalar_lea.hbm %s7899_s1, %s5325_s6  ;;  %s294_s10 = scalar_lea.sflag [#allocation6], %s293_s2 }
  0x3d   : > { %s305_s9 = sshll.u32 %s304_s30, 4  ;;  %319 = sbr.rel (%p6603_p8) target bundleno = 1315 (0x523), region = 44  ;;  %s306_s9 = int_to_ptr.hbm [resolvable:$true] %s305_s9 }
  0x3e   : > { %6117 = dma.hbm_to_vmem [thread:$0]  (!%p6663_p2), %s306_s9, 512, %s308_s15, %s294_s10, %s6501_s3, %s6501_s3, %s6502_s8  }
  0x42   : > { %s6683_s19 = sand.u32 1, %s6468_s22  }
  0x43   : > { %s5327_s23 = sshll.u32 %s6683_s19, 7  ;;  %s322_s11 = scalar_lea.sflag [#allocation3], %s6683_s19 }
  0x44   : > { %s6689_s6 = scalar_lea.vmem [#allocation2], %s5327_s23 }
  0x45   : > { %6443 = dma.done.wait (%p6590_p4), %s322_s11, 2048  }
  0x46   : > { %6445 = vsyncadd (%p6590_p4), %s322_s11, 4294965248  ;;  %s331_s3 = sand.u32 1, %s6581_s29   ;;  %s5328_s21 = sshll.u32 %s6683_s19, 5 }
  0x47   : > { %s332_s24 = scalar_lea.sflag [#allocation6], %s331_s3  ;;  %s6697_s12 = scalar_lea.vmem [#allocation5], %s5328_s21 }
  0x48   : > { %6447 = dma.done.wait (%p6590_p4), %s332_s24, 512  }
  0x49   : > { %6449 = vsyncadd (%p6590_p4), %s332_s24, 4294966784 }
  0x4a   : > { %6451 = dma.done.wait (%p61_p1), [#allocation6], 9216  }
  0x4b   : > { %6453 = vsyncadd (%p61_p1), [#allocation6], 4294958080 }
  0x4c   : > { %6455 = dma.done.wait (%p61_p1), [#allocation9], 9264  }
  0x4d   : > { %6457 = vsyncadd (%p61_p1), [#allocation9], 4294958032  ;;  %v5930_v0 = vld [vmem:[#allocation7 + $0x38] sm:$0xff]  ;;  %v5929_v2 = vld [vmem:[#allocation7 + $0x30] sm:$0xff]  ;;  %vm548_vm6 = vsmask.f32 7424 }
  0x4e   : > { %v5938_v1 = vld [vmem:[#allocation7 + $0x78] sm:$0xff]  ;;  %6067 = vmatpush.bf16.msra.mxu2 %v5930_v0  ;;  %v5937_v3 = vld [vmem:[#allocation7 + $0x70] sm:$0xff]  ;;  %864 = vmatpush.bf16.msra.mxu0 %v5930_v0  ;;  %v5928_v4 = vld [vmem:[#allocation7 + $0x28] sm:$0xff]  ;;  %s6817_s29 = sshll.u32 %s6480_s25, 7  ;;  %s7803_s10 = scalar_lea.vmem [#allocation11], %s5327_s23 }
  0x4f   : > { %6075 = vmatpush.bf16.msra.mxu3 %v5938_v1  ;;  %923 = vmatpush.bf16.msra.mxu1 %v5938_v1  ;;  %v5936_v5 = vld [vmem:[#allocation7 + $0x68] sm:$0xff]  ;;  %v400_v6 = vld [vmem:[%s6689_s6 + $0x50] sm:$0xff]  ;;  %v401_v7 = vld [vmem:[%s6689_s6 + $0x58] sm:$0xff]  ;;  %s5430_s7 = sadd.s32 4294967281, %s6817_s29  ;;  %s5527_s15 = sadd.s32 4294967282, %s6817_s29 }
  0x50   : > { %vm420_vm0 = vcmp.ge.f32.partialorder %v400_v6, 0.0  ;;  %vm421_vm1 = vcmp.ge.f32.partialorder %v401_v7, 0.0  ;;  %v440_v8 = vmul.f32 0.1, %v400_v6  ;;  %v441_v9 = vmul.f32 0.1, %v401_v7 }
  0x51   : > { %v402_v10 = vld [vmem:[%s6689_s6 + $0x60] sm:$0xff]  ;;  %v403_v11 = vld [vmem:[%s6689_s6 + $0x68] sm:$0xff]  ;;  %v5926_v26 = vld [vmem:[#allocation7 + $0x18] sm:$0xff]  ;;  %s5624_s4 = sadd.s32 4294967285, %s6817_s29  ;;  %s5722_s2 = sadd.s32 4294967286, %s6817_s29 }
  0x52   : > { %6068 = vmatpush.bf16.msra.mxu2 %v5929_v2  ;;  %865 = vmatpush.bf16.msra.mxu0 %v5929_v2  ;;  %v460_v12 = vsel %vm420_vm0, %v400_v6, %v440_v8  ;;  %v461_v13 = vsel %vm421_vm1, %v401_v7, %v441_v9  ;;  %vm422_vm2 = vcmp.ge.f32.partialorder %v402_v10, 0.0  ;;  %vm423_vm3 = vcmp.ge.f32.partialorder %v403_v11, 0.0  ;;  %v5927_v18 = vld [vmem:[#allocation7 + $0x20] sm:$0xff]  ;;  %v5934_v27 = vld [vmem:[#allocation7 + $0x58] sm:$0xff]  ;;  %v404_v31 = vld [vmem:[%s6689_s6 + $0x70] sm:$0xff]  ;;  %s5819_s18 = sadd.s32 4294967291, %s6817_s29 }
  0x53   : > { %6076 = vmatpush.bf16.msra.mxu3 %v5937_v3  ;;  %924 = vmatpush.bf16.msra.mxu1 %v5937_v3  ;;  %v480_v14 = vpack.c.bf16 %v460_v12, %v460_v12  ;;  %v481_v15 = vpack.c.bf16 %v461_v13, %v461_v13  ;;  %v442_v16 = vmul.f32 0.1, %v402_v10  ;;  %v443_v17 = vmul.f32 0.1, %v403_v11  ;;  %v5935_v19 = vld [vmem:[#allocation7 + $0x60] sm:$0xff]  ;;  %v405_v32 = vld [vmem:[%s6689_s6 + $0x78] sm:$0xff] }
  0x54   : > { %v444_v33 = vmul.f32 0.1, %v404_v31  ;;  %v5925_v34 = vld [vmem:[#allocation7 + $0x10] sm:$0xff]  ;;  %vm424_vm4 = vcmp.ge.f32.partialorder %v404_v31, 0.0  ;;  %v445_v38 = vmul.f32 0.1, %v405_v32 }
  0x55   : > { %v520_v20 = vunpack.c.l.b16 %v480_v14  ;;  %v521_v21 = vunpack.c.l.b16 %v481_v15  ;;  %v462_v22 = vsel %vm422_vm2, %v402_v10, %v442_v16  ;;  %v463_v23 = vsel %vm423_vm3, %v403_v11, %v443_v17  ;;  %v5933_v35 = vld [vmem:[#allocation7 + $0x50] sm:$0xff]  ;;  %v5924_v40 = vld [vmem:[#allocation7 + $0x8] sm:$0xff]  ;;  %v5923_v48 = vld [vmem:[#allocation7] sm:$0xff]  ;;  %s7946_s23 = sld [smem:[#allocation19_spill]]  ;;  %s5918_s11 = sshll.u32 %s6480_s25, 4 }
  0x56   : > { %6069 = vmatpush.bf16.msra.mxu2 %v5928_v4  ;;  %866 = vmatpush.bf16.msra.mxu0 %v5928_v4  ;;  %v482_v24 = vpack.c.bf16 %v462_v22, %v462_v22  ;;  %v483_v25 = vpack.c.bf16 %v463_v23, %v463_v23  ;;  %vm425_vm5 = vcmp.ge.f32.partialorder %v405_v32, 0.0  ;;  %v464_v39 = vsel %vm424_vm4, %v404_v31, %v444_v33  ;;  %v5932_v41 = vld [vmem:[#allocation7 + $0x48] sm:$0xff]  ;;  %v5931_v49 = vld [vmem:[#allocation7 + $0x40] sm:$0xff]  ;;  %v5946_v52 = vld [vmem:[#allocation7 + $0xb8] sm:$0xff]  ;;  %s7947_s25 = sld [smem:[#allocation32_spill]]  ;;  %s5164_s14 = sshll.u32 %s7803_s10, 4  ;;  %s5165_s14 = int_to_ptr.vmem [resolvable:$true] %s5164_s14 }
  0x57   : > { %6077 = vmatpush.bf16.msra.mxu3 %v5936_v5  ;;  %925 = vmatpush.bf16.msra.mxu1 %v5936_v5  ;;  %v6715_v28 = vpack.c.b16 %v521_v21, %v520_v20  ;;  %v465_v45 = vsel %vm425_vm5, %v405_v32, %v445_v38  ;;  %v484_v46 = vpack.c.bf16 %v464_v39, %v464_v39  ;;  %v5945_v56 = vld [vmem:[#allocation7 + $0xb0] sm:$0xff]  ;;  %v407_v58 = vld [vmem:[%s6697_s12 + $0x18] sm:$0xff]  ;;  %v5944_v60 = vld [vmem:[#allocation7 + $0xa8] sm:$0xff]  ;;  %vm638_vm1 = vcmask 1046528   ;;  %s5150_s17 = scalar_lea.sflag [#allocation4], %s6683_s19 }
  0x58   : > { %v522_v29 = vunpack.c.l.b16 %v482_v24  ;;  %v523_v30 = vunpack.c.l.b16 %v483_v25  ;;  %v485_v47 = vpack.c.bf16 %v465_v45, %v465_v45  ;;  %v406_v57 = vld [vmem:[%s6697_s12 + $0x10] sm:$0xff]  ;;  %v447_v62 = vmul.f32 0.1, %v407_v58  ;;  %v5943_v1 = vld [vmem:[#allocation7 + $0xa0] sm:$0xff]  ;;  %v5942_v8 = vld [vmem:[#allocation7 + $0x98] sm:$0xff] }
  0x59   : > { %v597_v37 = vshll.u32 %v6715_v28, 16  ;;  %v601_v43 = vshrl.u32 %v6715_v28, 16  ;;  %v524_v53 = vunpack.c.l.b16 %v484_v46  ;;  %v446_v61 = vmul.f32 0.1, %v406_v57  ;;  %v388_v9 = vld [vmem:[%s6697_s12] sm:$0xff]  ;;  %v389_v10 = vld [vmem:[%s6697_s12 + $0x8] sm:$0xff] }
  0x5a   : > { %6070 = vmatpush.bf16.msra.mxu2 %v5927_v18  ;;  %867 = vmatpush.bf16.msra.mxu0 %v5927_v18  ;;  %v6719_v36 = vpack.c.b16 %v523_v30, %v522_v29  ;;  %v525_v54 = vunpack.c.l.b16 %v485_v47  ;;  %vm426_vm7 = vcmp.ge.f32.partialorder %v406_v57, 0.0  ;;  %vm427_vm8 = vcmp.ge.f32.partialorder %v407_v58, 0.0  ;;  %v390_v16 = vld [vmem:[%s6689_s6] sm:$0xff]  ;;  %v391_v17 = vld [vmem:[%s6689_s6 + $0x8] sm:$0xff]  ;;  %v5941_v18 = vld [vmem:[#allocation7 + $0x90] sm:$0xff] }
  0x5b   : > { %6078 = vmatpush.bf16.msra.mxu3 %v5935_v19  ;;  %926 = vmatpush.bf16.msra.mxu1 %v5935_v19  ;;  %v6722_v42 = vrot.slane %v597_v37, 1  ;;  %v466_v2 = vsel %vm426_vm7, %v406_v57, %v446_v61  ;;  %v467_v3 = vsel %vm427_vm8, %v407_v58, %v447_v62  ;;  %v428_v12 = vmul.f32 0.1, %v388_v9  ;;  %v5940_v31 = vld [vmem:[#allocation7 + $0x88] sm:$0xff] }
  0x5c   : > { %v605_v44 = vshll.u32 %v6719_v36, 16  ;;  %v6731_v59 = vpack.c.b16 %v525_v54, %v524_v53  ;;  %v609_v63 = vshrl.u32 %v6719_v36, 16  ;;  %v486_v6 = vpack.c.bf16 %v466_v2, %v466_v2  ;;  %v392_v53 = vld [vmem:[%s6689_s6 + $0x10] sm:$0xff]  ;;  %v393_v54 = vld [vmem:[%s6689_s6 + $0x18] sm:$0xff]  ;;  %s7948_s29 = smov %s7947_s25 }
  0x5d   : > { %v603_v50 = vor.u32 %v601_v43, %v6722_v42  ;;  %v487_v7 = vpack.c.bf16 %v467_v3, %v467_v3  ;;  %v429_v13 = vmul.f32 0.1, %v389_v10  ;;  %vm408_vm9 = vcmp.ge.f32.partialorder %v388_v9, 0.0  ;;  %v5939_v43 = vld [vmem:[#allocation7 + $0x80] sm:$0xff]  ;;  %s6402_s16 = scalar_lea.hbm %s7948_s29, 512 }
  0x5e   : > { %6071 = vmatpush.bf16.msra.mxu2 %v5926_v26  ;;  %868 = vmatpush.bf16.msra.mxu0 %v5926_v26  ;;  %v607_v51 = vrot.slane %v605_v44, 1  ;;  %v613_v0 = vshll.u32 %v6731_v59, 16  ;;  %v526_v14 = vunpack.c.l.b16 %v486_v6  ;;  %vm409_vm10 = vcmp.ge.f32.partialorder %v389_v10, 0.0 }
  0x5f   : > { %6079 = vmatpush.bf16.msra.mxu3 %v5934_v27  ;;  %927 = vmatpush.bf16.msra.mxu1 %v5934_v27  ;;  %v527_v15 = vunpack.c.l.b16 %v487_v7  ;;  %v448_v19 = vsel %vm408_vm9, %v388_v9, %v428_v12  ;;  %v449_v20 = vsel %vm409_vm10, %v389_v10, %v429_v13  ;;  %v430_v21 = vmul.f32 0.1, %v390_v16  ;;  %v395_v9 = vld [vmem:[%s6689_s6 + $0x28] sm:$0xff] }
  0x60   : > { %v608_v55 = vsel %vm548_vm6, %v603_v50, %v607_v51  ;;  %v611_v4 = vor.u32 %v609_v63, %v607_v51  ;;  %v615_v5 = vrot.slane %v613_v0, 1  ;;  %v468_v22 = vpack.c.bf16 %v448_v19, %v448_v19 }
  0x61   : > { %v469_v23 = vpack.c.bf16 %v449_v20, %v449_v20  ;;  %vm410_vm11 = vcmp.ge.f32.partialorder %v390_v16, 0.0  ;;  %vm411_vm12 = vcmp.ge.f32.partialorder %v391_v17, 0.0  ;;  %v431_v24 = vmul.f32 0.1, %v391_v17 }
  0x62   : > { %6072 = vmatpush.bf16.msra.mxu2 %v5925_v34  ;;  %869 = vmatpush.bf16.msra.mxu0 %v5925_v34  ;;  %v616_v11 = vsel %vm548_vm6, %v611_v4, %v615_v5  ;;  %v450_v25 = vsel %vm410_vm11, %v390_v16, %v430_v21  ;;  %v6741_v26 = vpack.c.b16 %v527_v15, %v526_v14  ;;  %v508_v27 = vunpack.c.l.b16 %v468_v22 }
  0x63   : > { %6080 = vmatpush.bf16.msra.mxu3 %v5933_v35  ;;  %928 = vmatpush.bf16.msra.mxu1 %v5933_v35  ;;  %v509_v29 = vunpack.c.l.b16 %v469_v23  ;;  %v470_v30 = vpack.c.bf16 %v450_v25, %v450_v25  ;;  %v451_v32 = vsel %vm411_vm12, %v391_v17, %v431_v24  ;;  %v617_v37 = vshrl.u32 %v6731_v59, 16 }
  0x64   : > { %v471_v34 = vpack.c.bf16 %v451_v32, %v451_v32  ;;  %v621_v38 = vshll.u32 %v6741_v26, 16  ;;  %vm412_vm13 = vcmp.ge.f32.partialorder %v392_v53, 0.0  ;;  %vm413_vm14 = vcmp.ge.f32.partialorder %v393_v54, 0.0 }
  0x65   : > { %v6743_v33 = vpack.c.b16 %v509_v29, %v508_v27  ;;  %v510_v35 = vunpack.c.l.b16 %v470_v30  ;;  %v619_v46 = vor.u32 %v617_v37, %v615_v5  ;;  %v625_v4 = vshrl.u32 %v6741_v26, 16  ;;  %v396_v29 = vld [vmem:[%s6689_s6 + $0x30] sm:$0xff]  ;;  %v397_v30 = vld [vmem:[%s6689_s6 + $0x38] sm:$0xff] }
  0x66   : > { %6073 = vmatpush.bf16.msra.mxu2 %v5924_v40  ;;  %870 = vmatpush.bf16.msra.mxu0 %v5924_v40  ;;  %v511_v39 = vunpack.c.l.b16 %v471_v34  ;;  %v623_v47 = vrot.slane %v621_v38, 1  ;;  %vm415_vm0 = vcmp.ge.f32.partialorder %v395_v9, 0.0  ;;  %v437_v32 = vmul.f32 0.1, %v397_v30 }
  0x67   : > { %6081 = vmatpush.bf16.msra.mxu3 %v5932_v41  ;;  %929 = vmatpush.bf16.msra.mxu1 %v5932_v41  ;;  %v550_v40 = vshrl.u32 %v6743_v33, 16  ;;  %v552_v41 = vshll.u32 %v6743_v33, 16  ;;  %v639_v22 = vrot.slane %v6743_v33, 1  ;;  %vm416_vm2 = vcmp.ge.f32.partialorder %v396_v29, 0.0 }
  0x68   : > { %v6750_v44 = vpack.c.b16 %v511_v39, %v510_v35  ;;  %v624_v51 = vsel %vm548_vm6, %v619_v46, %v623_v47  ;;  %v627_v7 = vor.u32 %v625_v4, %v623_v47  ;;  %vm417_vm3 = vcmp.ge.f32.partialorder %v397_v30, 0.0 }
  0x69   : > { %v554_v45 = vrot.slane %v552_v41, 1 }
  0x6a   : > { %6074 = vmatpush.bf16.msra.mxu2 %v5923_v48  ;;  %871 = vmatpush.bf16.msra.mxu0 %v5923_v48  ;;  %v561_v0 = vshrl.u32 %v6750_v44, 16  ;;  %v640_v23 = vrot.slane %v6750_v44, 1 }
  0x6b   : > { %6082 = vmatpush.bf16.msra.mxu3 %v5931_v49  ;;  %930 = vmatpush.bf16.msra.mxu1 %v5931_v49  ;;  %v555_v48 = vor.u32 %v554_v45, %v550_v40  ;;  %v557_v49 = vshll.u32 %v6750_v44, 16 }
  0x6c   : > { %v641_v27 = vsel %vm638_vm1, %v639_v22, %v640_v23  ;;  %v5959_v22 = vld [vmem:[#allocation10 + $0x60] sm:$0xff] }
  0x6d   : > { %902 = vmatmul.bf16.vlgmr.msra.gmra.mxu2 %v6715_v28  ;;  %872 = vmatmul.bf16.vlgmr.msra.gmra.mxu0 %v6743_v33  ;;  %v559_v50 = vrot.slane %v557_v49, 1  ;;  %v457_v33 = vsel %vm417_vm3, %v397_v30, %v437_v32  ;;  %v398_v49 = vld [vmem:[%s6689_s6 + $0x40] sm:$0xff] }
  0x6e   : > { %982 = vmatpush.bf16.msrb.mxu2 %v5946_v52  ;;  %961 = vmatmul.bf16.vlgmr.msra.gmra.mxu3 %v608_v55  ;;  %v432_v55 = vmul.f32 0.1, %v392_v53  ;;  %v477_v37 = vpack.c.bf16 %v457_v33, %v457_v33  ;;  %vm418_vm4 = vcmp.ge.f32.partialorder %v398_v49, 0.0  ;;  %v5951_v30 = vld [vmem:[#allocation10 + $0x20] sm:$0xff]  ;;  %v5966_v32 = vld [vmem:[#allocation10 + $0x98] sm:$0xff] }
  0x6f   : > { %v560_v52 = vsel %vm548_vm6, %v555_v48, %v559_v50  ;;  %v563_v2 = vor.u32 %v561_v0, %v559_v50  ;;  %v399_v50 = vld [vmem:[%s6689_s6 + $0x48] sm:$0xff] }
  0x70   : > { %931 = vmatmul.bf16.vlgmr.msra.gmra.mxu1 %v560_v52  ;;  %v452_v57 = vsel %vm412_vm13, %v392_v53, %v432_v55  ;;  %v517_v39 = vunpack.c.l.b16 %v477_v37  ;;  %v439_v52 = vmul.f32 0.1, %v399_v50  ;;  %vm419_vm5 = vcmp.ge.f32.partialorder %v399_v50, 0.0 }
  0x72   : > { %983 = vmatpush.bf16.msrb.mxu2 %v5945_v56  ;;  %v433_v56 = vmul.f32 0.1, %v393_v54 }
  0x74   : > { %v453_v58 = vsel %vm413_vm14, %v393_v54, %v433_v56  ;;  %v459_v54 = vsel %vm419_vm5, %v399_v50, %v439_v52  ;;  %v6814_v50 = vld [vmem:[#allocation8] ss:$0 sm:$0xff]  ;;  %v1102_v52 = vlaneseq }
  0x75   : > { %v473_v61 = vpack.c.bf16 %v453_v58, %v453_v58  ;;  %v479_v56 = vpack.c.bf16 %v459_v54, %v459_v54 }
  0x76   : > { %984 = vmatpush.bf16.msrb.mxu2 %v5944_v60  ;;  %v472_v60 = vpack.c.bf16 %v452_v57, %v452_v57 }
  0x77   : > { %v513_v63 = vunpack.c.l.b16 %v473_v61  ;;  %v519_v58 = vunpack.c.l.b16 %v479_v56  ;;  %v5964_v56 = vld [vmem:[#allocation10 + $0x88] sm:$0xff] }
  0x78   : > { %v512_v62 = vunpack.c.l.b16 %v472_v60 }
  0x7a   : > { %985 = vmatpush.bf16.msrb.mxu2 %v5943_v1  ;;  %v6760_v1 = vpack.c.b16 %v513_v63, %v512_v62 }
  0x7c   : > { %v565_v3 = vshll.u32 %v6760_v1, 16  ;;  %v642_v45 = vrot.slane %v6760_v1, 1 }
  0x7d   : > { %907 = vmatmul.bf16.gmra.mxu2 %v6719_v36  ;;  %877 = vmatmul.bf16.gmra.mxu0 %v6750_v44 }
  0x7e   : > { %986 = vmatpush.bf16.msrb.mxu2 %v5942_v8  ;;  %966 = vmatmul.bf16.gmra.mxu3 %v616_v11  ;;  %v567_v5 = vrot.slane %v565_v3, 1  ;;  %v394_v8 = vld [vmem:[%s6689_s6 + $0x20] sm:$0xff]  ;;  %v435_v11 = vmul.f32 0.1, %v395_v9  ;;  %v643_v48 = vsel %vm638_vm1, %v640_v23, %v642_v45 }
  0x7f   : > { %v434_v10 = vmul.f32 0.1, %v394_v8  ;;  %vm414_vm15 = vcmp.ge.f32.partialorder %v394_v8, 0.0 }
  0x80   : > { %v568_v6 = vsel %vm548_vm6, %v563_v2, %v567_v5  ;;  %v455_v13 = vsel %vm415_vm0, %v395_v9, %v435_v11  ;;  %v5962_v9 = vld [vmem:[#allocation10 + $0x78] sm:$0xff]  ;;  %v5961_v11 = vld [vmem:[#allocation10 + $0x70] sm:$0xff] }
  0x81   : > { %936 = vmatmul.bf16.gmra.mxu1 %v568_v6  ;;  %v454_v12 = vsel %vm414_vm15, %v394_v8, %v434_v10  ;;  %v475_v15 = vpack.c.bf16 %v455_v13, %v455_v13  ;;  %v5970_v10 = vld [vmem:[#allocation10 + $0xb8] sm:$0xff]  ;;  %1717 = vmatpush.bf16.msrb.mxu0 %v5962_v9  ;;  %v5969_v13 = vld [vmem:[#allocation10 + $0xb0] sm:$0xff] }
  0x82   : > { %987 = vmatpush.bf16.msrb.mxu2 %v5941_v18  ;;  %v474_v14 = vpack.c.bf16 %v454_v12, %v454_v12  ;;  %v569_v18 = vshrl.u32 %v6760_v1, 16  ;;  %1776 = vmatpush.bf16.msrb.mxu1 %v5970_v10 }
  0x83   : > { %v515_v17 = vunpack.c.l.b16 %v475_v15 }
  0x84   : > { %v514_v16 = vunpack.c.l.b16 %v474_v14  ;;  %v571_v20 = vor.u32 %v569_v18, %v567_v5  ;;  %v650_v18 = vrot.slane %v6715_v28, 1 }
  0x85   : > { %1718 = vmatpush.bf16.msrb.mxu0 %v5961_v11 }
  0x86   : > { %988 = vmatpush.bf16.msrb.mxu2 %v5940_v31  ;;  %v6770_v19 = vpack.c.b16 %v515_v17, %v514_v16  ;;  %v436_v31 = vmul.f32 0.1, %v396_v29  ;;  %1777 = vmatpush.bf16.msrb.mxu1 %v5969_v13  ;;  %v5954_v16 = vld [vmem:[#allocation10 + $0x38] sm:$0xff]  ;;  %v5968_v17 = vld [vmem:[#allocation10 + $0xa8] sm:$0xff] }
  0x87   : > { %1658 = vmatpush.bf16.msrb.mxu3 %v5954_v16 }
  0x88   : > { %v573_v21 = vshll.u32 %v6770_v19, 16  ;;  %v456_v34 = vsel %vm416_vm2, %v396_v29, %v436_v31  ;;  %v577_v40 = vshrl.u32 %v6770_v19, 16  ;;  %v644_v0 = vrot.slane %v6770_v19, 1  ;;  %v5958_v31 = vld [vmem:[#allocation10 + $0x58] sm:$0xff] }
  0x89   : > { %v476_v35 = vpack.c.bf16 %v456_v34, %v456_v34 }
  0x8a   : > { %989 = vmatpush.bf16.msrb.mxu2 %v5939_v43  ;;  %v575_v24 = vrot.slane %v573_v21, 1  ;;  %v645_v3 = vsel %vm638_vm1, %v642_v45, %v644_v0  ;;  %1778 = vmatpush.bf16.msrb.mxu1 %v5968_v17  ;;  %v5953_v21 = vld [vmem:[#allocation10 + $0x30] sm:$0xff] }
  0x8b   : > { %v516_v38 = vunpack.c.l.b16 %v476_v35  ;;  %1659 = vmatpush.bf16.msrb.mxu3 %v5953_v21  ;;  %v5950_v35 = vld [vmem:[#allocation10 + $0x18] sm:$0xff] }
  0x8c   : > { %v576_v25 = vsel %vm548_vm6, %v571_v20, %v575_v24  ;;  %v579_v43 = vor.u32 %v577_v40, %v575_v24  ;;  %v5967_v24 = vld [vmem:[#allocation10 + $0xa0] sm:$0xff]  ;;  %v5957_v40 = vld [vmem:[#allocation10 + $0x50] sm:$0xff] }
  0x8d   : > { %912 = vmatmul.bf16.gmra.mxu2 %v6731_v59  ;;  %882 = vmatmul.bf16.gmra.mxu0 %v6760_v1  ;;  %v532_v41 = vpack.c.b16 %v517_v39, %v516_v38  ;;  %v654_v38 = vrot.slane %v6731_v59, 1  ;;  %v5949_v39 = vld [vmem:[#allocation10 + $0x10] sm:$0xff] }
  0x8e   : > { %971 = vmatmul.bf16.gmra.mxu3 %v624_v51  ;;  %v438_v51 = vmul.f32 0.1, %v398_v49  ;;  %1779 = vmatpush.bf16.msrb.mxu1 %v5967_v24 }
  0x8f   : > { %v581_v44 = vshll.u32 %v532_v41, 16  ;;  %v585_v60 = vshrl.u32 %v532_v41, 16  ;;  %v646_v5 = vrot.slane %v532_v41, 1 }
  0x90   : > { %v458_v53 = vsel %vm418_vm4, %v398_v49, %v438_v51  ;;  %v656_v49 = vrot.slane %v6741_v26, 1 }
  0x91   : > { %941 = vmatmul.bf16.gmra.mxu1 %v576_v25  ;;  %v583_v46 = vrot.slane %v581_v44, 1  ;;  %v478_v55 = vpack.c.bf16 %v458_v53, %v458_v53  ;;  %v647_v8 = vsel %vm638_vm1, %v644_v0, %v646_v5  ;;  %v5952_v25 = vld [vmem:[#allocation10 + $0x28] sm:$0xff] }
  0x92   : > { %1660 = vmatpush.bf16.msrb.mxu3 %v5952_v25  ;;  %1780 = vmatpush.bf16.msrb.mxu1 %v5966_v32  ;;  %v5948_v44 = vld [vmem:[#allocation10 + $0x8] sm:$0xff] }
  0x93   : > { %v584_v47 = vsel %vm548_vm6, %v579_v43, %v583_v46  ;;  %v518_v57 = vunpack.c.l.b16 %v478_v55  ;;  %v587_v62 = vor.u32 %v585_v60, %v583_v46  ;;  %v5956_v55 = vld [vmem:[#allocation10 + $0x48] sm:$0xff]  ;;  %v6826_v60 = vstv %s5430_s7 }
  0x95   : > { %v533_v61 = vpack.c.b16 %v519_v58, %v518_v57  ;;  %v657_v57 = vsel %vm638_vm1, %v654_v38, %v656_v49  ;;  %v6824_v58 = vshrl.u32 %v1102_v52, 7 }
  0x96   : > { %1661 = vmatpush.bf16.msrb.mxu3 %v5951_v30 }
  0x97   : > { %v589_v63 = vshll.u32 %v533_v61, 16  ;;  %v593_v4 = vshrl.u32 %v533_v61, 16  ;;  %v648_v12 = vrot.slane %v533_v61, 1  ;;  %v6831_v0 = vadd.s32 8, %v6824_v58 }
  0x99   : > { %v591_v1 = vrot.slane %v589_v63, 1  ;;  %v649_v14 = vsel %vm638_vm1, %v646_v5, %v648_v12  ;;  %v651_v20 = vsel %vm638_vm1, %v648_v12, %v650_v18  ;;  %v1124_v63 = vadd.s32 %v6826_v60, %v6824_v58 }
  0x9a   : > { %1662 = vmatpush.bf16.msrb.mxu3 %v5950_v35 }
  0x9b   : > { %v592_v2 = vsel %vm548_vm6, %v587_v62, %v591_v1  ;;  %v595_v6 = vor.u32 %v593_v4, %v591_v1  ;;  %vm1144_vm8 = vcmp.ge.s32.totalorder %v1124_v63, 0  ;;  %vm1164_vm9 = vcmp.lt.s32.totalorder %v1124_v63, 250 }
  0x9c   : > { %vm1184_vm10 = vmand %vm1144_vm8, %vm1164_vm9 }
  0x9d   : > { %917 = vmatmul.bf16.gmra.mxu2 %v6741_v26  ;;  %887 = vmatmul.bf16.gmra.mxu0 %v6770_v19 }
  0x9e   : > { %976 = vmatmul.bf16.gmra.mxu3 %v627_v7  ;;  %v600_v7 = vsel %vm548_vm6, %v595_v6, %v6722_v42  ;;  %v5960_v42 = vld [vmem:[#allocation10 + $0x68] sm:$0xff]  ;;  %v5963_v6 = vld [vmem:[#allocation10 + $0x80] sm:$0xff] }
  0x9f   : > { %1719 = vmatpush.bf16.msrb.mxu0 %v5960_v42  ;;  %1663 = vmatpush.bf16.msrb.mxu3 %v5949_v39  ;;  %v6838_v42 = vadd.s32 16, %v6824_v58 }
  0xa1   : > { %946 = vmatmul.bf16.gmra.mxu1 %v584_v47  ;;  %v5947_v47 = vld [vmem:[#allocation10] sm:$0xff] }
  0xa3   : > { %1720 = vmatpush.bf16.msrb.mxu0 %v5959_v22  ;;  %1664 = vmatpush.bf16.msrb.mxu3 %v5948_v44 }
  0xa7   : > { %1721 = vmatpush.bf16.msrb.mxu0 %v5958_v31  ;;  %1665 = vmatpush.bf16.msrb.mxu3 %v5947_v47 }
  0xab   : > { %1722 = vmatpush.bf16.msrb.mxu0 %v5957_v40 }
  0xad   : > { %990 = vmatmul.bf16.vlgmr.msrb.gmra.mxu2 %v641_v27  ;;  %892 = vmatmul.bf16.gmra.mxu0 %v532_v41  ;;  %v652_v27 = vrot.slane %v6719_v36, 1 }
  0xaf   : > { %v653_v28 = vsel %vm638_vm1, %v650_v18, %v652_v27  ;;  %v655_v41 = vsel %vm638_vm1, %v652_v27, %v654_v38  ;;  %1723 = vmatpush.bf16.msrb.mxu0 %v5956_v55  ;;  %v1126_v27 = vadd.s32 %v6826_v60, %v6838_v42 }
  0xb1   : > { %951 = vmatmul.bf16.gmra.mxu1 %v592_v2  ;;  %v5955_v2 = vld [vmem:[#allocation10 + $0x40] sm:$0xff]  ;;  %vm1146_vm0 = vcmp.ge.s32.totalorder %v1126_v27, 0  ;;  %vm1166_vm2 = vcmp.lt.s32.totalorder %v1126_v27, 250 }
  0xb2   : > { %vm1186_vm3 = vmand %vm1146_vm0, %vm1166_vm2 }
  0xb3   : > { %1724 = vmatpush.bf16.msrb.mxu0 %v5955_v2  ;;  %v6855_v2 = vadd.s32 40, %v6824_v58 }
  0xbd   : > { %995 = vmatmul.bf16.gmra.mxu2 %v643_v48  ;;  %897 = vmatmul.bf16.gmra.mxu0 %v533_v61  ;;  %v5965_v48 = vld [vmem:[#allocation10 + $0x90] sm:$0xff] }
  0xbe   : > { %1781 = vmatpush.bf16.msrb.mxu1 %v5965_v48  ;;  %v5978_v48 = vld [vmem:[#allocation7 + $0xf8] sm:$0xff] }
  0xbf   : > { %2546 = vmatpush.bf16.msra.mxu2 %v5978_v48  ;;  %v6874_v48 = vadd.s32 56, %v6824_v58 }
  0xc1   : > { %956 = vmatmul.bf16.gmra.mxu1 %v600_v7  ;;  %v1125_v7 = vadd.s32 %v6826_v60, %v6831_v0 }
  0xc2   : > { %1782 = vmatpush.bf16.msrb.mxu1 %v5964_v56 }
  0xc3   : > { %vm1145_vm11 = vcmp.ge.s32.totalorder %v1125_v7, 0  ;;  %vm1165_vm12 = vcmp.lt.s32.totalorder %v1125_v7, 250  ;;  %v5994_v7 = vld [vmem:[#allocation7 + $0x178] sm:$0xff] }
  0xc4   : > { %vm1185_vm14 = vmand %vm1145_vm11, %vm1165_vm12  ;;  %2662 = vmatpush.bf16.msra.mxu0 %v5994_v7 }
  0xc6   : > { %1783 = vmatpush.bf16.msrb.mxu1 %v5963_v6 }
  0xcd   : > { %1000 = vmatmul.bf16.gmra.mxu2 %v645_v3 }
  0xdd   : > { %1005 = vmatmul.bf16.gmra.mxu2 %v647_v8 }
  0xea   : > { %v873_v33 = vpop.f32.mrf.mxu0 }
  0xeb   : > { %v874_v53 = vadd.f32 %v6814_v50, %v873_v33 }
  0xed   : > { %1010 = vmatmul.bf16.gmra.mxu2 %v649_v14  ;;  %v932_v37 = vpop.f32.mrf.mxu1 }
  0xee   : > { %v933_v26 = vadd.f32 %v932_v37, %v874_v53  ;;  %v6850_v53 = vadd.s32 32, %v6824_v58 }
  0xf0   : > { %v6793_v15 = vpop.f32.mrf.mxu2 }
  0xf2   : > { %v875_v43 = vpop.f32.mrf.mxu0 }
  0xf3   : > { %v876_v3 = vadd.f32 %v6814_v50, %v875_v43 }
  0xf5   : > { %v934_v45 = vpop.f32.mrf.mxu1 }
  0xf6   : > { %v935_v8 = vadd.f32 %v934_v45, %v876_v3 }
  0xf8   : > { %v6796_v19 = vpop.f32.mrf.mxu2 }
  0xfa   : > { %v878_v59 = vpop.f32.mrf.mxu0 }
  0xfb   : > { %v879_v11 = vadd.f32 %v6814_v50, %v878_v59  ;;  %v5986_v59 = vld [vmem:[#allocation7 + $0x138] sm:$0xff] }
  0xfc   : > { %2604 = vmatpush.bf16.msra.mxu3 %v5986_v59 }
  0xfd   : > { %1015 = vmatmul.bf16.gmra.mxu2 %v651_v20 }
  0xfe   : > { %v937_v54 = vpop.f32.mrf.mxu1 }
  0xff   : > { %v938_v18 = vadd.f32 %v937_v54, %v879_v11 }
 0x100   : > { %v6799_v23 = vpop.f32.mrf.mxu2 }
 0x102   : > { %v880_v61 = vpop.f32.mrf.mxu0 }
 0x103   : > { %v881_v33 = vadd.f32 %v6814_v50, %v880_v61 }
 0x106   : > { %v939_v5 = vpop.f32.mrf.mxu1 }
 0x107   : > { %v940_v40 = vadd.f32 %v939_v5, %v881_v33 }
 0x108   : > { %v6802_v29 = vpop.f32.mrf.mxu2 }
 0x10a   : > { %v883_v13 = vpop.f32.mrf.mxu0 }
 0x10b   : > { %v884_v45 = vadd.f32 %v6814_v50, %v883_v13 }
 0x10d   : > { %1020 = vmatmul.bf16.gmra.mxu2 %v653_v28  ;;  %v6843_v28 = vadd.s32 24, %v6824_v58 }
 0x10e   : > { %v942_v21 = vpop.f32.mrf.mxu1 }
 0x10f   : > { %v1127_v39 = vadd.s32 %v6826_v60, %v6843_v28  ;;  %v943_v55 = vadd.f32 %v942_v21, %v884_v45 }
 0x110   : > { %v6805_v34 = vpop.f32.mrf.mxu2 }
 0x111   : > { %vm1147_vm4 = vcmp.ge.s32.totalorder %v1127_v39, 0  ;;  %vm1167_vm5 = vcmp.lt.s32.totalorder %v1127_v39, 250 }
 0x112   : > { %v885_v38 = vpop.f32.mrf.mxu0  ;;  %vm1187_vm8 = vmand %vm1147_vm4, %vm1167_vm5 }
 0x116   : > { %v944_v43 = vpop.f32.mrf.mxu1 }
 0x118   : > { %v6808_v36 = vpop.f32.mrf.mxu2 }
 0x11d   : > { %1025 = vmatmul.bf16.gmra.mxu2 %v655_v41 }
 0x11e   : > { %v947_v6 = vpop.f32.mrf.mxu1 }
 0x120   : > { %v6811_v46 = vpop.f32.mrf.mxu2 }
 0x128   : > { %v6819_v51 = vpop.f32.mrf.mxu2 }
 0x12d   : > { %1030 = vmatmul.bf16.gmra.mxu2 %v657_v57  ;;  %v888_v57 = vpop.f32.mrf.mxu0 }
 0x130   : > { %v991_v62 = vpop.f32.mrf.mxu2 }
 0x131   : > { %v992_v1 = vadd.f32 %v991_v62, %v933_v26 }
 0x133   : > { %v1061_v4 = vmul.f32 0.1, %v992_v1  ;;  %vm1041_vm7 = vcmp.ge.f32.partialorder %v992_v1, 0.0 }
 0x135   : > { %v1081_v9 = vsel %vm1041_vm7, %v992_v1, %v1061_v4  ;;  %v1128_v1 = vadd.s32 %v6826_v60, %v6850_v53 }
 0x136   : > { %v1244_v14 = vsel %vm1184_vm10, %v1081_v9, 0.0 }
 0x137   : > { %v1264_v17 = vpack.c.bf16 %v1244_v14, %v1244_v14  ;;  %vm1148_vm10 = vcmp.ge.s32.totalorder %v1128_v1, 0  ;;  %vm1168_vm11 = vcmp.lt.s32.totalorder %v1128_v1, 250 }
 0x138   : > { %v993_v10 = vpop.f32.mrf.mxu2  ;;  %vm1188_vm12 = vmand %vm1148_vm10, %vm1168_vm11 }
 0x139   : > { %v994_v12 = vadd.f32 %v993_v10, %v935_v8  ;;  %v1304_v30 = vunpack.c.l.b16 %v1264_v17  ;;  %v886_v8 = vadd.f32 %v6814_v50, %v885_v38  ;;  %v6869_v38 = vadd.s32 48, %v6824_v58 }
 0x13b   : > { %vm1042_vm13 = vcmp.ge.f32.partialorder %v994_v12, 0.0  ;;  %v1062_v16 = vmul.f32 0.1, %v994_v12 }
 0x13d   : > { %v1082_v20 = vsel %vm1042_vm13, %v994_v12, %v1062_v16  ;;  %1035 = vmatmul.bf16.gmra.mxu2 %v656_v49  ;;  %v1129_v12 = vadd.s32 %v6826_v60, %v6855_v2 }
 0x13e   : > { %v1245_v22 = vsel %vm1185_vm14, %v1082_v20, 0.0 }
 0x13f   : > { %v1265_v24 = vpack.c.bf16 %v1245_v22, %v1245_v22  ;;  %vm1149_vm13 = vcmp.ge.s32.totalorder %v1129_v12, 0  ;;  %vm1169_vm14 = vcmp.lt.s32.totalorder %v1129_v12, 250 }
 0x140   : > { %v996_v25 = vpop.f32.mrf.mxu2  ;;  %vm1189_vm0 = vmand %vm1149_vm13, %vm1169_vm14 }
 0x141   : > { %v1305_v31 = vunpack.c.l.b16 %v1265_v24  ;;  %v997_v32 = vadd.f32 %v996_v25, %v938_v18  ;;  %v945_v18 = vadd.f32 %v944_v43, %v886_v8  ;;  %v890_v25 = vpop.f32.mrf.mxu0 }
 0x143   : > { %v1063_v35 = vmul.f32 0.1, %v997_v32  ;;  %v1324_v37 = vpack.c.b16 %v1305_v31, %v1304_v30  ;;  %vm1043_vm15 = vcmp.ge.f32.partialorder %v997_v32, 0.0  ;;  %v889_v30 = vadd.f32 %v6814_v50, %v888_v57 }
 0x144   : > { %v891_v57 = vadd.f32 %v6814_v50, %v890_v25 }
 0x145   : > { %1666 = vmatmul.bf16.vlgmr.msrb.gmra.mxu3 %v1324_v37  ;;  %v1083_v41 = vsel %vm1043_vm15, %v997_v32, %v1063_v35  ;;  %v1347_v62 = vshll.u32 %v1324_v37, 16  ;;  %v1433_v13 = vrot.slane %v1324_v37, 1  ;;  %v1345_v16 = vshrl.u32 %v1324_v37, 16  ;;  %v949_v37 = vpop.f32.mrf.mxu1 }
 0x146   : > { %v1246_v49 = vsel %vm1186_vm3, %v1083_v41, 0.0 }
 0x147   : > { %v1266_v54 = vpack.c.bf16 %v1246_v49, %v1246_v49  ;;  %v1349_v11 = vrot.slane %v1347_v62, 1  ;;  %v1131_v62 = vadd.s32 %v6826_v60, %v6874_v48 }
 0x148   : > { %v998_v44 = vpop.f32.mrf.mxu2 }
 0x149   : > { %v999_v47 = vadd.f32 %v998_v44, %v940_v40  ;;  %v1306_v3 = vunpack.c.l.b16 %v1266_v54  ;;  %v1350_v22 = vor.u32 %v1349_v11, %v1345_v16  ;;  %v948_v40 = vadd.f32 %v947_v6, %v889_v30  ;;  %v893_v54 = vpop.f32.mrf.mxu0 }
 0x14a   : > { %v894_v12 = vadd.f32 %v6814_v50, %v893_v54 }
 0x14b   : > { %vm1044_vm7 = vcmp.ge.f32.partialorder %v999_v47, 0.0  ;;  %v1064_v52 = vmul.f32 0.1, %v999_v47 }
 0x14d   : > { %v1084_v56 = vsel %vm1044_vm7, %v999_v47, %v1064_v52  ;;  %v1130_v47 = vadd.s32 %v6826_v60, %v6869_v38  ;;  %vm1151_vm7 = vcmp.ge.s32.totalorder %v1131_v62, 0 }
 0x14e   : > { %v1247_v26 = vsel %vm1187_vm8, %v1084_v56, 0.0  ;;  %v5985_v56 = vld [vmem:[#allocation7 + $0x130] sm:$0xff]  ;;  %vm1171_vm8 = vcmp.lt.s32.totalorder %v1131_v62, 250 }
 0x14f   : > { %v1267_v61 = vpack.c.bf16 %v1247_v26, %v1247_v26  ;;  %2605 = vmatpush.bf16.msra.mxu3 %v5985_v56  ;;  %vm1150_vm3 = vcmp.ge.s32.totalorder %v1130_v47, 0  ;;  %vm1170_vm4 = vcmp.lt.s32.totalorder %v1130_v47, 250  ;;  %vm1191_vm10 = vmand %vm1151_vm7, %vm1171_vm8 }
 0x150   : > { %v1001_v63 = vpop.f32.mrf.mxu2  ;;  %vm1190_vm5 = vmand %vm1150_vm3, %vm1170_vm4 }
 0x151   : > { %v1307_v4 = vunpack.c.l.b16 %v1267_v61  ;;  %v1002_v5 = vadd.f32 %v1001_v63, %v943_v55  ;;  %v5977_v55 = vld [vmem:[#allocation7 + $0xf0] sm:$0xff]  ;;  %v952_v63 = vpop.f32.mrf.mxu1 }
 0x152   : > { %2547 = vmatpush.bf16.msra.mxu2 %v5977_v55 }
 0x153   : > { %v1065_v9 = vmul.f32 0.1, %v1002_v5  ;;  %v6858_v10 = vpack.c.b16 %v1307_v4, %v1306_v3  ;;  %vm1045_vm9 = vcmp.ge.f32.partialorder %v1002_v5, 0.0 }
 0x155   : > { %1671 = vmatmul.bf16.gmra.mxu3 %v6858_v10  ;;  %v1434_v14 = vrot.slane %v6858_v10, 1  ;;  %v1352_v17 = vshll.u32 %v6858_v10, 16  ;;  %v1085_v20 = vsel %vm1045_vm9, %v1002_v5, %v1065_v9  ;;  %v1356_v3 = vshrl.u32 %v6858_v10, 16 }
 0x156   : > { %v1248_v33 = vsel %vm1188_vm12, %v1085_v20, 0.0  ;;  %v950_v5 = vadd.f32 %v949_v37, %v891_v57  ;;  %v895_v20 = vpop.f32.mrf.mxu0 }
 0x157   : > { %v1435_v21 = vsel %vm638_vm1, %v1433_v13, %v1434_v14  ;;  %v1354_v24 = vrot.slane %v1352_v17, 1  ;;  %v1268_v39 = vpack.c.bf16 %v1248_v33, %v1248_v33  ;;  %v5993_v17 = vld [vmem:[#allocation7 + $0x170] sm:$0xff]  ;;  %v6894_v33 = vadd.s32 72, %v6824_v58 }
 0x158   : > { %v1003_v27 = vpop.f32.mrf.mxu2  ;;  %1784 = vmatmul.bf16.vlgmr.msrb.gmra.mxu1 %v1435_v21  ;;  %2663 = vmatpush.bf16.msra.mxu0 %v5993_v17 }
 0x159   : > { %v1004_v31 = vadd.f32 %v1003_v27, %v945_v18  ;;  %v1355_v32 = vsel %vm548_vm6, %v1350_v22, %v1354_v24  ;;  %v1308_v59 = vunpack.c.l.b16 %v1268_v39  ;;  %v1358_v8 = vor.u32 %v1356_v3, %v1354_v24  ;;  %v954_v30 = vpop.f32.mrf.mxu1 }
 0x15a   : > { %1725 = vmatmul.bf16.vlgmr.msrb.gmra.mxu0 %v1355_v32  ;;  %v953_v22 = vadd.f32 %v952_v63, %v894_v12  ;;  %v1133_v47 = vadd.s32 %v6826_v60, %v6894_v33 }
 0x15b   : > { %vm1046_vm15 = vcmp.ge.f32.partialorder %v1004_v31, 0.0  ;;  %v1066_v35 = vmul.f32 0.1, %v1004_v31 }
 0x15d   : > { %v1086_v41 = vsel %vm1046_vm15, %v1004_v31, %v1066_v35  ;;  %vm1153_vm15 = vcmp.ge.s32.totalorder %v1133_v47, 0 }
 0x15e   : > { %v1249_v43 = vsel %vm1189_vm0, %v1086_v41, 0.0  ;;  %v5984_v41 = vld [vmem:[#allocation7 + $0x128] sm:$0xff]  ;;  %vm1173_vm0 = vcmp.lt.s32.totalorder %v1133_v47, 250 }
 0x15f   : > { %v1269_v44 = vpack.c.bf16 %v1249_v43, %v1249_v43  ;;  %v896_v43 = vadd.f32 %v6814_v50, %v895_v20  ;;  %2606 = vmatpush.bf16.msra.mxu3 %v5984_v41  ;;  %vm1193_vm3 = vmand %vm1153_vm15, %vm1173_vm0 }
 0x160   : > { %v1006_v45 = vpop.f32.mrf.mxu2 }
 0x161   : > { %v1309_v49 = vunpack.c.l.b16 %v1269_v44  ;;  %v1007_v52 = vadd.f32 %v1006_v45, %v948_v40  ;;  %v5976_v40 = vld [vmem:[#allocation7 + $0xe8] sm:$0xff]  ;;  %v955_v55 = vadd.f32 %v954_v30, %v896_v43 }
 0x162   : > { %2548 = vmatpush.bf16.msra.mxu2 %v5976_v40 }
 0x163   : > { %v1067_v26 = vmul.f32 0.1, %v1007_v52  ;;  %v6877_v61 = vpack.c.b16 %v1309_v49, %v1308_v59  ;;  %vm1047_vm2 = vcmp.ge.f32.partialorder %v1007_v52, 0.0  ;;  %v898_v59 = vpop.f32.mrf.mxu0 }
 0x164   : > { %v899_v3 = vadd.f32 %v6814_v50, %v898_v59 }
 0x165   : > { %1676 = vmatmul.bf16.gmra.mxu3 %v6877_v61  ;;  %v1436_v1 = vrot.slane %v6877_v61, 1  ;;  %v1360_v4 = vshll.u32 %v6877_v61, 16  ;;  %v1087_v6 = vsel %vm1047_vm2, %v1007_v52, %v1067_v26  ;;  %v1364_v52 = vshrl.u32 %v6877_v61, 16  ;;  %v5992_v61 = vld [vmem:[#allocation7 + $0x168] sm:$0xff] }
 0x166   : > { %v1250_v10 = vsel %vm1190_vm5, %v1087_v6, 0.0  ;;  %2664 = vmatpush.bf16.msra.mxu0 %v5992_v61 }
 0x167   : > { %v1437_v7 = vsel %vm638_vm1, %v1434_v14, %v1436_v1  ;;  %v1362_v9 = vrot.slane %v1360_v4, 1  ;;  %v6889_v14 = vadd.s32 64, %v6824_v58  ;;  %v1270_v21 = vpack.c.bf16 %v1250_v10, %v1250_v10  ;;  %v957_v4 = vpop.f32.mrf.mxu1 }
 0x168   : > { %v1008_v11 = vpop.f32.mrf.mxu2  ;;  %1789 = vmatmul.bf16.gmra.mxu1 %v1437_v7  ;;  %v962_v7 = vpop.f32.mrf.mxu3  ;;  %v958_v12 = vadd.f32 %v957_v4, %v899_v3 }
 0x169   : > { %v1009_v13 = vadd.f32 %v1008_v11, %v950_v5  ;;  %v1363_v16 = vsel %vm548_vm6, %v1358_v8, %v1362_v9  ;;  %v1132_v32 = vadd.s32 %v6826_v60, %v6889_v14  ;;  %v1310_v35 = vunpack.c.l.b16 %v1270_v21 }
 0x16a   : > { %1730 = vmatmul.bf16.gmra.mxu0 %v1363_v16  ;;  %v1366_v26 = vor.u32 %v1364_v52, %v1362_v9  ;;  %v6914_v21 = vadd.s32 88, %v6824_v58 }
 0x16b   : > { %vm1048_vm9 = vcmp.ge.f32.partialorder %v1009_v13, 0.0  ;;  %v1068_v18 = vmul.f32 0.1, %v1009_v13  ;;  %vm1152_vm12 = vcmp.ge.s32.totalorder %v1132_v32, 0  ;;  %vm1172_vm13 = vcmp.lt.s32.totalorder %v1132_v32, 250  ;;  %v900_v10 = vpop.f32.mrf.mxu0 }
 0x16c   : > { %vm1192_vm14 = vmand %vm1152_vm12, %vm1172_vm13 }
 0x16d   : > { %v1088_v24 = vsel %vm1048_vm9, %v1009_v13, %v1068_v18 }
 0x16e   : > { %v1251_v25 = vsel %vm1191_vm10, %v1088_v24, 0.0 }
 0x16f   : > { %v1271_v27 = vpack.c.bf16 %v1251_v25, %v1251_v25  ;;  %v959_v30 = vpop.f32.mrf.mxu1 }
 0x170   : > { %v1011_v31 = vpop.f32.mrf.mxu2 }
 0x171   : > { %v1311_v37 = vunpack.c.l.b16 %v1271_v27  ;;  %v1012_v39 = vadd.f32 %v1011_v31, %v953_v22  ;;  %v901_v27 = vadd.f32 %v6814_v50, %v900_v10  ;;  %v906_v10 = vadd.f32 %v6814_v50, %v6796_v19 }
 0x173   : > { %v1069_v44 = vmul.f32 0.1, %v1012_v39  ;;  %v6897_v45 = vpack.c.b16 %v1311_v37, %v1310_v35  ;;  %vm1049_vm11 = vcmp.ge.f32.partialorder %v1012_v39, 0.0  ;;  %v964_v35 = vpop.f32.mrf.mxu3  ;;  %v1135_v37 = vadd.s32 %v6826_v60, %v6914_v21 }
 0x174   : > { %v960_v43 = vadd.f32 %v959_v30, %v901_v27  ;;  %v965_v27 = vadd.f32 %v964_v35, %v906_v10  ;;  %v909_v35 = vadd.f32 %v6814_v50, %v6799_v23 }
 0x175   : > { %1681 = vmatmul.bf16.gmra.mxu3 %v6897_v45  ;;  %v1438_v49 = vrot.slane %v6897_v45, 1  ;;  %v1368_v54 = vshll.u32 %v6897_v45, 16  ;;  %v1089_v56 = vsel %vm1049_vm11, %v1012_v39, %v1069_v44  ;;  %v1372_v40 = vshrl.u32 %v6897_v45, 16 }
 0x176   : > { %v1252_v8 = vsel %vm1192_vm14, %v1089_v56, 0.0  ;;  %vm1155_vm9 = vcmp.ge.s32.totalorder %v1135_v37, 0  ;;  %vm1175_vm10 = vcmp.lt.s32.totalorder %v1135_v37, 250  ;;  %v904_v45 = vadd.f32 %v6814_v50, %v6793_v15 }
 0x177   : > { %v1439_v57 = vsel %vm638_vm1, %v1436_v1, %v1438_v49  ;;  %v1370_v62 = vrot.slane %v1368_v54, 1  ;;  %v6909_v1 = vadd.s32 80, %v6824_v58  ;;  %v1272_v9 = vpack.c.bf16 %v1252_v8, %v1252_v8  ;;  %vm1195_vm12 = vmand %vm1155_vm9, %vm1175_vm10 }
 0x178   : > { %v1013_v63 = vpop.f32.mrf.mxu2  ;;  %1794 = vmatmul.bf16.gmra.mxu1 %v1439_v57  ;;  %v5975_v57 = vld [vmem:[#allocation7 + $0xe0] sm:$0xff]  ;;  %v963_v61 = vadd.f32 %v962_v7, %v904_v45  ;;  %v6935_v15 = vadd.s32 104, %v6824_v58 }
 0x179   : > { %v1014_v5 = vadd.f32 %v1013_v63, %v955_v55  ;;  %v1371_v6 = vsel %vm548_vm6, %v1366_v26, %v1370_v62  ;;  %v1134_v20 = vadd.s32 %v6826_v60, %v6909_v1  ;;  %v1312_v22 = vunpack.c.l.b16 %v1272_v9  ;;  %v5983_v26 = vld [vmem:[#allocation7 + $0x120] sm:$0xff]  ;;  %2549 = vmatpush.bf16.msra.mxu2 %v5975_v57 }
 0x17a   : > { %1735 = vmatmul.bf16.gmra.mxu0 %v1371_v6  ;;  %v1374_v59 = vor.u32 %v1372_v40, %v1370_v62  ;;  %2607 = vmatpush.bf16.msra.mxu3 %v5983_v26  ;;  %v1137_v7 = vadd.s32 %v6826_v60, %v6935_v15 }
 0x17b   : > { %vm1050_vm2 = vcmp.ge.f32.partialorder %v1014_v5, 0.0  ;;  %v1070_v11 = vmul.f32 0.1, %v1014_v5  ;;  %vm1154_vm5 = vcmp.ge.s32.totalorder %v1134_v20, 0  ;;  %vm1174_vm7 = vcmp.lt.s32.totalorder %v1134_v20, 250 }
 0x17c   : > { %vm1194_vm8 = vmand %vm1154_vm5, %vm1174_vm7 }
 0x17d   : > { %v1090_v13 = vsel %vm1050_vm2, %v1014_v5, %v1070_v11  ;;  %v967_v5 = vpop.f32.mrf.mxu3  ;;  %vm1157_vm2 = vcmp.ge.s32.totalorder %v1137_v7, 0 }
 0x17e   : > { %v1253_v16 = vsel %vm1193_vm3, %v1090_v13, 0.0  ;;  %vm1177_vm3 = vcmp.lt.s32.totalorder %v1137_v7, 250  ;;  %v968_v57 = vadd.f32 %v967_v5, %v909_v35 }
 0x17f   : > { %v1273_v17 = vpack.c.bf16 %v1253_v16, %v1253_v16  ;;  %vm1197_vm5 = vmand %vm1157_vm2, %vm1177_vm3 }
 0x180   : > { %v1016_v18 = vpop.f32.mrf.mxu2 }
 0x181   : > { %v1313_v24 = vunpack.c.l.b16 %v1273_v17  ;;  %v1017_v25 = vadd.f32 %v1016_v18, %v958_v12  ;;  %v5991_v17 = vld [vmem:[#allocation7 + $0x160] sm:$0xff] }
 0x182   : > { %2665 = vmatpush.bf16.msra.mxu0 %v5991_v17 }
 0x183   : > { %v1071_v31 = vmul.f32 0.1, %v1017_v25  ;;  %v6917_v32 = vpack.c.b16 %v1313_v24, %v1312_v22  ;;  %vm1051_vm4 = vcmp.ge.f32.partialorder %v1017_v25, 0.0 }
 0x185   : > { %1686 = vmatmul.bf16.gmra.mxu3 %v6917_v32  ;;  %v1440_v39 = vrot.slane %v6917_v32, 1  ;;  %v1376_v41 = vshll.u32 %v6917_v32, 16  ;;  %v1091_v44 = vsel %vm1051_vm4, %v1017_v25, %v1071_v31  ;;  %v1380_v24 = vshrl.u32 %v6917_v32, 16  ;;  %v969_v40 = vpop.f32.mrf.mxu3 }
 0x186   : > { %v1254_v63 = vsel %vm1194_vm8, %v1091_v44, 0.0 }
 0x187   : > { %v1441_v47 = vsel %vm638_vm1, %v1438_v49, %v1440_v39  ;;  %v1378_v52 = vrot.slane %v1376_v41, 1  ;;  %v6930_v49 = vadd.s32 96, %v6824_v58  ;;  %v1274_v62 = vpack.c.bf16 %v1254_v63, %v1254_v63 }
 0x188   : > { %v1018_v54 = vpop.f32.mrf.mxu2  ;;  %1799 = vmatmul.bf16.gmra.mxu1 %v1441_v47  ;;  %v5974_v47 = vld [vmem:[#allocation7 + $0xd8] sm:$0xff] }
 0x189   : > { %v1019_v55 = vadd.f32 %v1018_v54, %v960_v43  ;;  %v1379_v56 = vsel %vm548_vm6, %v1374_v59, %v1378_v52  ;;  %v1136_v9 = vadd.s32 %v6826_v60, %v6930_v49  ;;  %v1314_v12 = vunpack.c.l.b16 %v1274_v62  ;;  %v5982_v59 = vld [vmem:[#allocation7 + $0x118] sm:$0xff]  ;;  %2550 = vmatpush.bf16.msra.mxu2 %v5974_v47 }
 0x18a   : > { %1740 = vmatmul.bf16.gmra.mxu0 %v1379_v56  ;;  %v1382_v31 = vor.u32 %v1380_v24, %v1378_v52  ;;  %2608 = vmatpush.bf16.msra.mxu3 %v5982_v59 }
 0x18b   : > { %vm1052_vm11 = vcmp.ge.f32.partialorder %v1019_v55, 0.0  ;;  %v1072_v3 = vmul.f32 0.1, %v1019_v55  ;;  %vm1156_vm14 = vcmp.ge.s32.totalorder %v1136_v9, 0  ;;  %vm1176_vm15 = vcmp.lt.s32.totalorder %v1136_v9, 250 }
 0x18c   : > { %vm1196_vm0 = vmand %vm1156_vm14, %vm1176_vm15 }
 0x18d   : > { %v1092_v4 = vsel %vm1052_vm11, %v1019_v55, %v1072_v3  ;;  %v6957_v3 = vadd.s32 120, %v6824_v58 }
 0x18e   : > { %v1255_v6 = vsel %vm1195_vm12, %v1092_v4, 0.0 }
 0x18f   : > { %v1275_v8 = vpack.c.bf16 %v1255_v6, %v1255_v6  ;;  %v5990_v6 = vld [vmem:[#allocation7 + $0x158] sm:$0xff]  ;;  %v1139_v5 = vadd.s32 %v6826_v60, %v6957_v3 }
 0x190   : > { %v1021_v11 = vpop.f32.mrf.mxu2  ;;  %2666 = vmatpush.bf16.msra.mxu0 %v5990_v6 }
 0x191   : > { %v1315_v13 = vunpack.c.l.b16 %v1275_v8  ;;  %v1022_v16 = vadd.f32 %v1021_v11, %v963_v61  ;;  %v911_v61 = vadd.f32 %v6814_v50, %v6802_v29  ;;  %v972_v8 = vpop.f32.mrf.mxu3  ;;  %vm1159_vm11 = vcmp.ge.s32.totalorder %v1139_v5, 0 }
 0x192   : > { %vm1179_vm12 = vcmp.lt.s32.totalorder %v1139_v5, 250 }
 0x193   : > { %v1073_v18 = vmul.f32 0.1, %v1022_v16  ;;  %v6939_v20 = vpack.c.b16 %v1315_v13, %v1314_v12  ;;  %vm1053_vm13 = vcmp.ge.f32.partialorder %v1022_v16, 0.0  ;;  %v970_v29 = vadd.f32 %v969_v40, %v911_v61  ;;  %vm1199_vm14 = vmand %vm1159_vm11, %vm1179_vm12 }
 0x195   : > { %1691 = vmatmul.bf16.gmra.mxu3 %v6939_v20  ;;  %v1442_v22 = vrot.slane %v6939_v20, 1  ;;  %v1384_v25 = vshll.u32 %v6939_v20, 16  ;;  %v1093_v19 = vsel %vm1053_vm13, %v1022_v16, %v1073_v18  ;;  %v1388_v13 = vshrl.u32 %v6939_v20, 16 }
 0x196   : > { %v1256_v32 = vsel %vm1196_vm0, %v1093_v19, 0.0  ;;  %v914_v20 = vadd.f32 %v6814_v50, %v6805_v34 }
 0x197   : > { %v1443_v30 = vsel %vm638_vm1, %v1440_v39, %v1442_v22  ;;  %v1386_v37 = vrot.slane %v1384_v25, 1  ;;  %v6952_v39 = vadd.s32 112, %v6824_v58  ;;  %v1276_v52 = vpack.c.bf16 %v1256_v32, %v1256_v32 }
 0x198   : > { %v1023_v41 = vpop.f32.mrf.mxu2  ;;  %1804 = vmatmul.bf16.gmra.mxu1 %v1443_v30  ;;  %v6979_v32 = vadd.s32 136, %v6824_v58 }
 0x199   : > { %v1024_v43 = vadd.f32 %v1023_v41, %v965_v27  ;;  %v1387_v44 = vsel %vm548_vm6, %v1382_v31, %v1386_v37  ;;  %v1138_v45 = vadd.s32 %v6826_v60, %v6952_v39  ;;  %v1316_v23 = vunpack.c.l.b16 %v1276_v52  ;;  %v974_v31 = vpop.f32.mrf.mxu3  ;;  %v5973_v52 = vld [vmem:[#allocation7 + $0xd0] sm:$0xff] }
 0x19a   : > { %1745 = vmatmul.bf16.gmra.mxu0 %v1387_v44  ;;  %v1390_v18 = vor.u32 %v1388_v13, %v1386_v37  ;;  %2551 = vmatpush.bf16.msra.mxu2 %v5973_v52 }
 0x19b   : > { %vm1054_vm4 = vcmp.ge.f32.partialorder %v1024_v43, 0.0  ;;  %v1074_v54 = vmul.f32 0.1, %v1024_v43  ;;  %vm1158_vm8 = vcmp.ge.s32.totalorder %v1138_v45, 0  ;;  %vm1178_vm9 = vcmp.lt.s32.totalorder %v1138_v45, 250 }
 0x19c   : > { %vm1198_vm10 = vmand %vm1158_vm8, %vm1178_vm9  ;;  %v1141_v45 = vadd.s32 %v6826_v60, %v6979_v32 }
 0x19d   : > { %v1094_v55 = vsel %vm1054_vm4, %v1024_v43, %v1074_v54  ;;  %v973_v43 = vadd.f32 %v972_v8, %v914_v20 }
 0x19e   : > { %v1257_v56 = vsel %vm1197_vm5, %v1094_v55, 0.0  ;;  %v5981_v55 = vld [vmem:[#allocation7 + $0x110] sm:$0xff]  ;;  %vm1161_vm4 = vcmp.ge.s32.totalorder %v1141_v45, 0  ;;  %vm1181_vm5 = vcmp.lt.s32.totalorder %v1141_v45, 250 }
 0x19f   : > { %v1277_v26 = vpack.c.bf16 %v1257_v56, %v1257_v56  ;;  %v5989_v56 = vld [vmem:[#allocation7 + $0x150] sm:$0xff]  ;;  %2609 = vmatpush.bf16.msra.mxu3 %v5981_v55  ;;  %vm1201_vm8 = vmand %vm1161_vm4, %vm1181_vm5 }
 0x1a0   : > { %v1026_v63 = vpop.f32.mrf.mxu2  ;;  %2667 = vmatpush.bf16.msra.mxu0 %v5989_v56 }
 0x1a1   : > { %v1317_v62 = vunpack.c.l.b16 %v1277_v26  ;;  %v1027_v4 = vadd.f32 %v1026_v63, %v968_v57  ;;  %v916_v57 = vadd.f32 %v6814_v50, %v6808_v36  ;;  %v977_v61 = vpop.f32.mrf.mxu3 }
 0x1a3   : > { %v1075_v11 = vmul.f32 0.1, %v1027_v4  ;;  %v6961_v9 = vpack.c.b16 %v1317_v62, %v1316_v23  ;;  %vm1055_vm7 = vcmp.ge.f32.partialorder %v1027_v4, 0.0  ;;  %v975_v6 = vadd.f32 %v974_v31, %v916_v57 }
 0x1a4   : > { %v6996_v31 = vadd.s32 152, %v6824_v58 }
 0x1a5   : > { %1696 = vmatmul.bf16.gmra.mxu3 %v6961_v9  ;;  %v1444_v12 = vrot.slane %v6961_v9, 1  ;;  %v1392_v16 = vshll.u32 %v6961_v9, 16  ;;  %v1095_v17 = vsel %vm1055_vm7, %v1027_v4, %v1075_v11  ;;  %v1396_v62 = vshrl.u32 %v6961_v9, 16 }
 0x1a6   : > { %v1258_v19 = vsel %vm1198_vm10, %v1095_v17, 0.0  ;;  %v919_v9 = vadd.f32 %v6814_v50, %v6811_v46 }
 0x1a7   : > { %v1445_v10 = vsel %vm638_vm1, %v1442_v22, %v1444_v12  ;;  %v1394_v7 = vrot.slane %v1392_v16, 1  ;;  %v6974_v22 = vadd.s32 128, %v6824_v58  ;;  %v1278_v37 = vpack.c.bf16 %v1258_v19, %v1258_v19 }
 0x1a8   : > { %v1028_v24 = vpop.f32.mrf.mxu2  ;;  %1809 = vmatmul.bf16.gmra.mxu1 %v1445_v10 }
 0x1a9   : > { %v1029_v25 = vadd.f32 %v1028_v24, %v970_v29  ;;  %v1395_v27 = vsel %vm548_vm6, %v1390_v18, %v1394_v7  ;;  %v1140_v59 = vadd.s32 %v6826_v60, %v6974_v22  ;;  %v1318_v34 = vunpack.c.l.b16 %v1278_v37  ;;  %v979_v19 = vpop.f32.mrf.mxu3 }
 0x1aa   : > { %1750 = vmatmul.bf16.gmra.mxu0 %v1395_v27  ;;  %v1398_v11 = vor.u32 %v1396_v62, %v1394_v7  ;;  %v6991_v18 = vadd.s32 144, %v6824_v58 }
 0x1ab   : > { %vm1056_vm13 = vcmp.ge.f32.partialorder %v1029_v25, 0.0  ;;  %v1076_v30 = vmul.f32 0.1, %v1029_v25  ;;  %vm1160_vm0 = vcmp.ge.s32.totalorder %v1140_v59, 0  ;;  %vm1180_vm2 = vcmp.lt.s32.totalorder %v1140_v59, 250  ;;  %v5972_v59 = vld [vmem:[#allocation7 + $0xc8] sm:$0xff] }
 0x1ac   : > { %vm1200_vm3 = vmand %vm1160_vm0, %vm1180_vm2  ;;  %2552 = vmatpush.bf16.msra.mxu2 %v5972_v59  ;;  %vm1855_vm2 = vcmask 1045504  }
 0x1ad   : > { %v1096_v40 = vsel %vm1056_vm13, %v1029_v25, %v1076_v30  ;;  %v978_v25 = vadd.f32 %v977_v61, %v919_v9  ;;  %v1142_v30 = vadd.s32 %v6826_v60, %v6991_v18 }
 0x1ae   : > { %v1259_v41 = vsel %vm1199_vm14, %v1096_v40, 0.0 }
 0x1af   : > { %v1279_v44 = vpack.c.bf16 %v1259_v41, %v1259_v41  ;;  %v921_v41 = vadd.f32 %v6814_v50, %v6819_v51  ;;  %vm1162_vm10 = vcmp.ge.s32.totalorder %v1142_v30, 0  ;;  %vm1182_vm11 = vcmp.lt.s32.totalorder %v1142_v30, 250 }
 0x1b0   : > { %v1031_v47 = vpop.f32.mrf.mxu2  ;;  %vm1202_vm12 = vmand %vm1162_vm10, %vm1182_vm11  ;;  %vm3498_vm11 = vcmask 1043456  }
 0x1b1   : > { %v1319_v35 = vunpack.c.l.b16 %v1279_v44  ;;  %v1032_v54 = vadd.f32 %v1031_v47, %v973_v43  ;;  %v1143_v47 = vadd.s32 %v6826_v60, %v6996_v31  ;;  %v980_v52 = vadd.f32 %v979_v19, %v921_v41 }
 0x1b3   : > { %v1077_v26 = vmul.f32 0.1, %v1032_v54  ;;  %v1331_v63 = vpack.c.b16 %v1319_v35, %v1318_v34  ;;  %vm1057_vm15 = vcmp.ge.f32.partialorder %v1032_v54, 0.0  ;;  %vm1163_vm13 = vcmp.ge.s32.totalorder %v1143_v47, 0 }
 0x1b4   : > { %vm1183_vm14 = vcmp.lt.s32.totalorder %v1143_v47, 250  ;;  %v5979_v47 = vld [vmem:[#allocation7 + $0x100] sm:$0xff] }
 0x1b5   : > { %1701 = vmatmul.bf16.gmra.mxu3 %v1331_v63  ;;  %v1446_v23 = vrot.slane %v1331_v63, 1  ;;  %v1400_v4 = vshll.u32 %v1331_v63, 16  ;;  %v1097_v8 = vsel %vm1057_vm15, %v1032_v54, %v1077_v26  ;;  %v1404_v35 = vshrl.u32 %v1331_v63, 16  ;;  %vm1203_vm0 = vmand %vm1163_vm13, %vm1183_vm14 }
 0x1b6   : > { %v1260_v17 = vsel %vm1200_vm3, %v1097_v8, 0.0 }
 0x1b7   : > { %v1447_v36 = vsel %vm638_vm1, %v1444_v12, %v1446_v23  ;;  %v1402_v5 = vrot.slane %v1400_v4, 1  ;;  %v1280_v12 = vpack.c.bf16 %v1260_v17, %v1260_v17  ;;  %v5980_v4 = vld [vmem:[#allocation7 + $0x108] sm:$0xff]  ;;  %v7010_v17 = vld [vmem:[%s7903_s5] ss:$0 sm:$0xff] }
 0x1b8   : > { %v1033_v13 = vpop.f32.mrf.mxu2  ;;  %1814 = vmatmul.bf16.gmra.mxu1 %v1447_v36  ;;  %2610 = vmatpush.bf16.msra.mxu3 %v5980_v4 }
 0x1b9   : > { %v1034_v16 = vadd.f32 %v1033_v13, %v975_v6  ;;  %v1403_v29 = vsel %vm548_vm6, %v1398_v11, %v1402_v5  ;;  %v1320_v46 = vunpack.c.l.b16 %v1280_v12  ;;  %v1406_v50 = vor.u32 %v1404_v35, %v1402_v5  ;;  %v5971_v6 = vld [vmem:[#allocation7 + $0xc0] sm:$0xff]  ;;  %v5988_v11 = vld [vmem:[#allocation7 + $0x148] sm:$0xff] }
 0x1ba   : > { %1755 = vmatmul.bf16.gmra.mxu0 %v1403_v29  ;;  %2553 = vmatpush.bf16.msra.mxu2 %v5971_v6  ;;  %v7005_v29 = vstv %s5527_s15 }
 0x1bb   : > { %vm1058_vm7 = vcmp.ge.f32.partialorder %v1034_v16, 0.0  ;;  %v1078_v10 = vmul.f32 0.1, %v1034_v16  ;;  %2668 = vmatpush.bf16.msra.mxu0 %v5988_v11 }
 0x1bc   : > { %2611 = vmatpush.bf16.msra.mxu3 %v5979_v47 }
 0x1bd   : > { %v1098_v7 = vsel %vm1058_vm7, %v1034_v16, %v1078_v10  ;;  %v6211_v10 = vld [vmem:[%s6697_s12] sm:$0xff] }
 0x1be   : > { %v1261_v24 = vsel %vm1201_vm8, %v1098_v7, 0.0  ;;  %v1856_v12 = vrot.slane %v6211_v10, 2  ;;  %v1937_v7 = vadd.s32 %v7005_v29, %v6824_v58 }
 0x1bf   : > { %v1281_v27 = vpack.c.bf16 %v1261_v24, %v1261_v24 }
 0x1c0   : > { %v1036_v20 = vpop.f32.mrf.mxu2  ;;  %vm1957_vm3 = vcmp.ge.s32.totalorder %v1937_v7, 0  ;;  %vm1977_vm4 = vcmp.lt.s32.totalorder %v1937_v7, 250 }
 0x1c1   : > { %v1321_v37 = vunpack.c.l.b16 %v1281_v27  ;;  %v1037_v40 = vadd.f32 %v1036_v20, %v978_v25  ;;  %v6212_v25 = vld [vmem:[%s6697_s12 + $0x8] sm:$0xff]  ;;  %vm1997_vm5 = vmand %vm1957_vm3, %vm1977_vm4 }
 0x1c2   : > { %v1857_v27 = vrot.slane %v6212_v25, 2 }
 0x1c3   : > { %v1079_v43 = vmul.f32 0.1, %v1037_v40  ;;  %v1332_v44 = vpack.c.b16 %v1321_v37, %v1320_v46  ;;  %vm1059_vm9 = vcmp.ge.f32.partialorder %v1037_v40, 0.0 }
 0x1c5   : > { %1706 = vmatmul.bf16.gmra.mxu3 %v1332_v44  ;;  %v1448_v34 = vrot.slane %v1332_v44, 1  ;;  %v1408_v54 = vshll.u32 %v1332_v44, 16  ;;  %v1099_v55 = vsel %vm1059_vm9, %v1037_v40, %v1079_v43  ;;  %v1412_v20 = vshrl.u32 %v1332_v44, 16 }
 0x1c6   : > { %v1262_v62 = vsel %vm1202_vm12, %v1099_v55, 0.0 }
 0x1c7   : > { %v1449_v56 = vsel %vm638_vm1, %v1446_v23, %v1448_v34  ;;  %v1410_v51 = vrot.slane %v1408_v54, 1  ;;  %v1282_v23 = vpack.c.bf16 %v1262_v62, %v1262_v62  ;;  %v1858_v54 = vsel %vm1855_vm2, %v1856_v12, %v1857_v27 }
 0x1c8   : > { %v1038_v57 = vpop.f32.mrf.mxu2  ;;  %v1667_v26 = vpop.f32.mrf.mxu3  ;;  %1819 = vmatmul.bf16.gmra.mxu1 %v1449_v56 }
 0x1c9   : > { %v1039_v60 = vadd.f32 %v1038_v57, %v980_v52  ;;  %v1411_v45 = vsel %vm548_vm6, %v1406_v50, %v1410_v51  ;;  %v1322_v13 = vunpack.c.l.b16 %v1282_v23  ;;  %v1668_v46 = vadd.f32 %v7010_v17, %v1667_v26  ;;  %v6213_v50 = vld [vmem:[%s6689_s6] sm:$0xff] }
 0x1ca   : > { %1760 = vmatmul.bf16.gmra.mxu0 %v1411_v45  ;;  %v1414_v41 = vor.u32 %v1412_v20, %v1410_v51  ;;  %v1859_v51 = vrot.slane %v6213_v50, 2  ;;  %v5987_v45 = vld [vmem:[#allocation7 + $0x140] sm:$0xff] }
 0x1cb   : > { %vm1060_vm15 = vcmp.ge.f32.partialorder %v1039_v60, 0.0  ;;  %v1080_v63 = vmul.f32 0.1, %v1039_v60  ;;  %2669 = vmatpush.bf16.msra.mxu0 %v5987_v45 }
 0x1cc   : > { %v1860_v6 = vsel %vm1855_vm2, %v1857_v27, %v1859_v51 }
 0x1cd   : > { %v1100_v61 = vsel %vm1060_vm15, %v1039_v60, %v1080_v63 }
 0x1ce   : > { %v1263_v8 = vsel %vm1203_vm0, %v1100_v61, 0.0  ;;  %v1939_v61 = vadd.s32 %v7005_v29, %v6838_v42 }
 0x1cf   : > { %v1283_v36 = vpack.c.bf16 %v1263_v8, %v1263_v8 }
 0x1d0   : > { %v1669_v5 = vpop.f32.mrf.mxu3  ;;  %vm1959_vm12 = vcmp.ge.s32.totalorder %v1939_v61, 0  ;;  %vm1979_vm14 = vcmp.lt.s32.totalorder %v1939_v61, 250 }
 0x1d1   : > { %v1323_v16 = vunpack.c.l.b16 %v1283_v36  ;;  %v1670_v57 = vadd.f32 %v7010_v17, %v1669_v5  ;;  %v6214_v5 = vld [vmem:[%s6689_s6 + $0x8] sm:$0xff]  ;;  %vm1999_vm15 = vmand %vm1959_vm12, %vm1979_vm14 }
 0x1d3   : > { %v7012_v9 = vpack.c.b16 %v1323_v16, %v1322_v13  ;;  %v1861_v13 = vrot.slane %v6214_v5, 2 }
 0x1d5   : > { %1711 = vmatmul.bf16.gmra.mxu3 %v7012_v9  ;;  %v1785_v24 = vpop.f32.mrf.mxu1  ;;  %v1450_v19 = vrot.slane %v7012_v9, 1  ;;  %v1416_v30 = vshll.u32 %v7012_v9, 16  ;;  %v1420_v12 = vshrl.u32 %v7012_v9, 16 }
 0x1d7   : > { %v1726_v37 = vpop.f32.mrf.mxu0  ;;  %v1451_v40 = vsel %vm638_vm1, %v1448_v34, %v1450_v19  ;;  %v1418_v43 = vrot.slane %v1416_v30, 1  ;;  %v1938_v34 = vadd.s32 %v7005_v29, %v6831_v0 }
 0x1d8   : > { %v1727_v59 = vadd.f32 %v1726_v37, %v1668_v46  ;;  %v1672_v35 = vpop.f32.mrf.mxu3  ;;  %1824 = vmatmul.bf16.gmra.mxu1 %v1451_v40 }
 0x1d9   : > { %v1419_v44 = vsel %vm548_vm6, %v1414_v41, %v1418_v43  ;;  %vm1958_vm7 = vcmp.ge.s32.totalorder %v1938_v34, 0  ;;  %vm1978_vm8 = vcmp.lt.s32.totalorder %v1938_v34, 250  ;;  %v1673_v16 = vadd.f32 %v7010_v17, %v1672_v35 }
 0x1da   : > { %v1786_v52 = vadd.f32 %v1785_v24, %v1727_v59  ;;  %1765 = vmatmul.bf16.gmra.mxu0 %v1419_v44  ;;  %vm1998_vm10 = vmand %vm1958_vm7, %vm1978_vm8  ;;  %v1422_v37 = vor.u32 %v1420_v12, %v1418_v43  ;;  %v1862_v41 = vsel %vm1855_vm2, %v1859_v51, %v1861_v13  ;;  %v6010_v12 = vld [vmem:[#allocation10 + $0x138] sm:$0xff] }
 0x1db   : > { %3363 = vmatpush.bf16.msrb.mxu2 %v6010_v12 }
 0x1dc   : > { %v1915_v55 = vadd.f32 %v1858_v54, %v1786_v52  ;;  %v1940_v52 = vadd.s32 %v7005_v29, %v6843_v28 }
 0x1dd   : > { %v1787_v56 = vpop.f32.mrf.mxu1 }
 0x1de   : > { %v2057_v26 = vsel %vm1997_vm5, %v1915_v55, 0.0  ;;  %vm1960_vm0 = vcmp.ge.s32.totalorder %v1940_v52, 0  ;;  %vm1980_vm3 = vcmp.lt.s32.totalorder %v1940_v52, 250 }
 0x1df   : > { %v1728_v60 = vpop.f32.mrf.mxu0  ;;  %v2097_v4 = vmul.f32 0.1, %v2057_v26  ;;  %vm2077_vm9 = vcmp.ge.f32.partialorder %v2057_v26, 0.0  ;;  %v3499_v25 = vrot.slane %v2057_v26, 4  ;;  %vm2000_vm5 = vmand %vm1960_vm0, %vm1980_vm3  ;;  %vm2218_vm3 = vsmask.f32 6400 }
 0x1e0   : > { %v1729_v62 = vadd.f32 %v1728_v60, %v1670_v57  ;;  %v1674_v63 = vpop.f32.mrf.mxu3 }
 0x1e1   : > { %v2117_v36 = vsel %vm2077_vm9, %v2057_v26, %v2097_v4  ;;  %v1675_v34 = vadd.f32 %v7010_v17, %v1674_v63 }
 0x1e2   : > { %v1788_v23 = vadd.f32 %v1787_v56, %v1729_v62  ;;  %v2137_v20 = vpack.c.bf16 %v2117_v36, %v2117_v36 }
 0x1e4   : > { %v1916_v8 = vadd.f32 %v1860_v6, %v1788_v23  ;;  %v2176_v35 = vunpack.c.l.b16 %v2137_v20  ;;  %v1941_v23 = vadd.s32 %v7005_v29, %v6850_v53 }
 0x1e5   : > { %v1790_v11 = vpop.f32.mrf.mxu1 }
 0x1e6   : > { %v2058_v10 = vsel %vm1998_vm10, %v1916_v8, 0.0  ;;  %v6216_v8 = vld [vmem:[%s6689_s6 + $0x18] sm:$0xff]  ;;  %vm1961_vm8 = vcmp.ge.s32.totalorder %v1941_v23, 0  ;;  %vm1981_vm9 = vcmp.lt.s32.totalorder %v1941_v23, 250 }
 0x1e7   : > { %vm2078_vm13 = vcmp.ge.f32.partialorder %v2058_v10, 0.0  ;;  %v2098_v7 = vmul.f32 0.1, %v2058_v10  ;;  %v1731_v24 = vpop.f32.mrf.mxu0  ;;  %v3500_v27 = vrot.slane %v2058_v10, 4  ;;  %v1865_v36 = vrot.slane %v6216_v8, 2  ;;  %vm2001_vm10 = vmand %vm1961_vm8, %vm1981_vm9 }
 0x1e8   : > { %v1732_v30 = vadd.f32 %v1731_v24, %v1673_v16  ;;  %v1677_v46 = vpop.f32.mrf.mxu3  ;;  %1829 = vmatmul.bf16.gmra.mxu1 %v1450_v19  ;;  %v6215_v19 = vld [vmem:[%s6689_s6 + $0x10] sm:$0xff] }
 0x1e9   : > { %v2118_v40 = vsel %vm2078_vm13, %v2058_v10, %v2098_v7  ;;  %v7037_v47 = vsel %vm3498_vm11, %v3499_v25, %v3500_v27  ;;  %v1863_v43 = vrot.slane %v6215_v19, 2  ;;  %v1678_v5 = vadd.f32 %v7010_v17, %v1677_v46 }
 0x1ea   : > { %v2138_v59 = vpack.c.bf16 %v2118_v40, %v2118_v40  ;;  %v1791_v9 = vadd.f32 %v1790_v11, %v1732_v30  ;;  %1770 = vmatmul.bf16.gmra.mxu0 %v1422_v37  ;;  %v1942_v30 = vadd.s32 %v7005_v29, %v6855_v2  ;;  %vm2318_vm13 = vcmask 1044480  }
 0x1eb   : > { %v1864_v62 = vsel %vm1855_vm2, %v1861_v13, %v1863_v43  ;;  %v1866_v20 = vsel %vm1855_vm2, %v1863_v43, %v1865_v36 }
 0x1ec   : > { %v2177_v54 = vunpack.c.l.b16 %v2138_v59  ;;  %v1917_v44 = vadd.f32 %v1862_v41, %v1791_v9  ;;  %vm1962_vm12 = vcmp.ge.s32.totalorder %v1942_v30, 0  ;;  %vm1982_vm14 = vcmp.lt.s32.totalorder %v1942_v30, 250 }
 0x1ed   : > { %v1792_v55 = vpop.f32.mrf.mxu1  ;;  %vm2002_vm0 = vmand %vm1962_vm12, %vm1982_vm14 }
 0x1ee   : > { %v2059_v56 = vsel %vm1999_vm15, %v1917_v44, 0.0  ;;  %v7044_v50 = vpack.c.b16 %v2177_v54, %v2176_v35 }
 0x1ef   : > { %v3502_v51 = vrot.slane %v2059_v56, 4  ;;  %v1733_v57 = vpop.f32.mrf.mxu0  ;;  %v2099_v45 = vmul.f32 0.1, %v2059_v56  ;;  %vm2079_vm4 = vcmp.ge.f32.partialorder %v2059_v56, 0.0 }
 0x1f0   : > { %v1734_v26 = vadd.f32 %v1733_v57, %v1675_v34  ;;  %v1679_v60 = vpop.f32.mrf.mxu3  ;;  %2554 = vmatmul.bf16.vlgmr.msra.gmra.mxu2 %v7044_v50  ;;  %v2220_v59 = vshrl.u32 %v7044_v50, 16  ;;  %v2223_v9 = vshll.u32 %v7044_v50, 16 }
 0x1f1   : > { %v7049_v4 = vsel %vm3498_vm11, %v3500_v27, %v3502_v51  ;;  %v2119_v11 = vsel %vm2079_vm4, %v2059_v56, %v2099_v45  ;;  %v1680_v43 = vadd.f32 %v7010_v17, %v1679_v60 }
 0x1f2   : > { %v1793_v63 = vadd.f32 %v1792_v55, %v1734_v26  ;;  %v2139_v27 = vpack.c.bf16 %v2119_v11, %v2119_v11  ;;  %v6217_v55 = vld [vmem:[%s6689_s6 + $0x20] sm:$0xff]  ;;  %v2319_v26 = vrot.slane %v7044_v50, 3  ;;  %v2222_v45 = vrot.slane %v2220_v59, 1 }
 0x1f3   : > { %v1867_v19 = vrot.slane %v6217_v55, 2 }
 0x1f4   : > { %v1918_v6 = vadd.f32 %v1864_v62, %v1793_v63  ;;  %v2178_v54 = vunpack.c.l.b16 %v2139_v27  ;;  %v2225_v62 = vrot.slane %v2223_v9, 2  ;;  %v6018_v63 = vld [vmem:[#allocation10 + $0x178] sm:$0xff] }
 0x1f5   : > { %v1795_v61 = vpop.f32.mrf.mxu1  ;;  %3421 = vmatpush.bf16.msrb.mxu3 %v6018_v63  ;;  %v1944_v63 = vadd.s32 %v7005_v29, %v6874_v48 }
 0x1f6   : > { %v2060_v16 = vsel %vm2000_vm5, %v1918_v6, 0.0  ;;  %v6002_v6 = vld [vmem:[#allocation10 + $0xf8] sm:$0xff] }
 0x1f7   : > { %vm2080_vm7 = vcmp.ge.f32.partialorder %v2060_v16, 0.0  ;;  %v2100_v10 = vmul.f32 0.1, %v2060_v16  ;;  %v1736_v13 = vpop.f32.mrf.mxu0  ;;  %v3504_v7 = vrot.slane %v2060_v16, 4  ;;  %3305 = vmatpush.bf16.msra.mxu1 %v6002_v6  ;;  %vm1964_vm9 = vcmp.ge.s32.totalorder %v1944_v63, 0 }
 0x1f8   : > { %v1737_v24 = vadd.f32 %v1736_v13, %v1678_v5  ;;  %v1682_v25 = vpop.f32.mrf.mxu3 }
 0x1f9   : > { %v2120_v37 = vsel %vm2080_vm7, %v2060_v16, %v2100_v10  ;;  %v7059_v46 = vsel %vm3498_vm11, %v3502_v51, %v3504_v7  ;;  %v1868_v16 = vsel %vm1855_vm2, %v1865_v36, %v1867_v19  ;;  %v1943_v36 = vadd.s32 %v7005_v29, %v6869_v38 }
 0x1fa   : > { %v1796_v40 = vadd.f32 %v1795_v61, %v1737_v24  ;;  %v2140_v41 = vpack.c.bf16 %v2120_v37, %v2120_v37  ;;  %v1683_v9 = vadd.f32 %v7010_v17, %v1682_v25 }
 0x1fb   : > { %vm1963_vm5 = vcmp.ge.s32.totalorder %v1943_v36, 0  ;;  %vm1983_vm7 = vcmp.lt.s32.totalorder %v1943_v36, 250 }
 0x1fc   : > { %v1919_v35 = vadd.f32 %v1866_v20, %v1796_v40  ;;  %v2179_v44 = vunpack.c.l.b16 %v2140_v41  ;;  %v2226_v20 = vor.u32 %v2225_v62, %v2222_v45  ;;  %v6218_v40 = vld [vmem:[%s6689_s6 + $0x28] sm:$0xff]  ;;  %vm2003_vm8 = vmand %vm1963_vm5, %vm1983_vm7 }
 0x1fd   : > { %v1797_v52 = vpop.f32.mrf.mxu1  ;;  %v1869_v41 = vrot.slane %v6218_v40, 2 }
 0x1fe   : > { %v2061_v34 = vsel %vm2001_vm10, %v1919_v35, 0.0  ;;  %v7065_v56 = vpack.c.b16 %v2179_v44, %v2178_v54  ;;  %vm1984_vm10 = vcmp.lt.s32.totalorder %v1944_v63, 250 }
 0x1ff   : > { %v3506_v51 = vrot.slane %v2061_v34, 4  ;;  %v1738_v57 = vpop.f32.mrf.mxu0  ;;  %vm2081_vm15 = vcmp.ge.f32.partialorder %v2061_v34, 0.0  ;;  %v2101_v5 = vmul.f32 0.1, %v2061_v34  ;;  %vm2004_vm14 = vmand %vm1964_vm9, %vm1984_vm10 }
 0x200   : > { %v1739_v23 = vadd.f32 %v1738_v57, %v1680_v43  ;;  %v1684_v61 = vpop.f32.mrf.mxu3  ;;  %2559 = vmatmul.bf16.gmra.mxu2 %v7065_v56  ;;  %v2320_v8 = vrot.slane %v7065_v56, 3  ;;  %v2228_v60 = vshrl.u32 %v7065_v56, 16  ;;  %v2231_v11 = vshll.u32 %v7065_v56, 16 }
 0x201   : > { %v7074_v50 = vsel %vm3498_vm11, %v3504_v7, %v3506_v51  ;;  %v2121_v59 = vsel %vm2081_vm15, %v2061_v34, %v2101_v5  ;;  %v6219_v5 = vld [vmem:[%s6689_s6 + $0x30] sm:$0xff] }
 0x202   : > { %v1798_v10 = vadd.f32 %v1797_v52, %v1739_v23  ;;  %v2321_v13 = vsel %vm2318_vm13, %v2319_v26, %v2320_v8  ;;  %v2230_v12 = vrot.slane %v2228_v60, 1  ;;  %v2233_v24 = vrot.slane %v2231_v11, 2 }
 0x203   : > { %2670 = vmatmul.bf16.vlgmr.msra.gmra.mxu0 %v2321_v13  ;;  %v2141_v57 = vpack.c.bf16 %v2121_v59, %v2121_v59  ;;  %v1870_v26 = vsel %vm1855_vm2, %v1867_v19, %v1869_v41 }
 0x204   : > { %v1920_v27 = vadd.f32 %v1868_v16, %v1798_v10  ;;  %v7083_v37 = vor.u32 %v2233_v24, %v2230_v12  ;;  %v1871_v16 = vrot.slane %v6219_v5, 2  ;;  %v1685_v10 = vadd.f32 %v7010_v17, %v1684_v61  ;;  %v6009_v24 = vld [vmem:[#allocation10 + $0x130] sm:$0xff] }
 0x205   : > { %v1800_v7 = vpop.f32.mrf.mxu1  ;;  %v2180_v23 = vunpack.c.l.b16 %v2141_v57  ;;  %v6001_v61 = vld [vmem:[#allocation10 + $0xf0] sm:$0xff]  ;;  %3364 = vmatpush.bf16.msrb.mxu2 %v6009_v24 }
 0x206   : > { %v2062_v35 = vsel %vm2002_vm0, %v1920_v27, 0.0  ;;  %v2235_v30 = vsel %vm2218_vm3, %v2226_v20, %v7083_v37  ;;  %v6017_v27 = vld [vmem:[#allocation10 + $0x170] sm:$0xff]  ;;  %3306 = vmatpush.bf16.msra.mxu1 %v6001_v61 }
 0x207   : > { %vm2082_vm4 = vcmp.ge.f32.partialorder %v2062_v35, 0.0  ;;  %v2102_v54 = vmul.f32 0.1, %v2062_v35  ;;  %v1741_v44 = vpop.f32.mrf.mxu0  ;;  %2612 = vmatmul.bf16.vlgmr.msra.gmra.mxu3 %v2235_v30  ;;  %v3508_v52 = vrot.slane %v2062_v35, 4 }
 0x208   : > { %v1742_v55 = vadd.f32 %v1741_v44, %v1683_v9  ;;  %v1687_v43 = vpop.f32.mrf.mxu3  ;;  %3422 = vmatpush.bf16.msrb.mxu3 %v6017_v27 }
 0x209   : > { %v2122_v34 = vsel %vm2082_vm4, %v2062_v35, %v2102_v54  ;;  %v7092_v25 = vsel %vm3498_vm11, %v3506_v51, %v3508_v52  ;;  %v1872_v35 = vsel %vm1855_vm2, %v1869_v41, %v1871_v16 }
 0x20a   : > { %v1801_v45 = vadd.f32 %v1800_v7, %v1742_v55  ;;  %v2142_v62 = vpack.c.bf16 %v2122_v34, %v2122_v34 }
 0x20c   : > { %v1921_v6 = vadd.f32 %v1870_v26, %v1801_v45  ;;  %v2181_v60 = vunpack.c.l.b16 %v2142_v62  ;;  %v1945_v26 = vadd.s32 %v7005_v29, %v6889_v14  ;;  %v6220_v45 = vld [vmem:[%s6689_s6 + $0x38] sm:$0xff] }
 0x20d   : > { %v1802_v11 = vpop.f32.mrf.mxu1  ;;  %v1873_v62 = vrot.slane %v6220_v45, 2 }
 0x20e   : > { %v2063_v13 = vsel %vm2003_vm8, %v1921_v6, 0.0  ;;  %v7098_v19 = vpack.c.b16 %v2181_v60, %v2180_v23  ;;  %vm1965_vm0 = vcmp.ge.s32.totalorder %v1945_v26, 0  ;;  %vm1985_vm4 = vcmp.lt.s32.totalorder %v1945_v26, 250 }
 0x20f   : > { %v3510_v12 = vrot.slane %v2063_v13, 4  ;;  %v1743_v51 = vpop.f32.mrf.mxu0  ;;  %vm2083_vm12 = vcmp.ge.f32.partialorder %v2063_v13, 0.0  ;;  %v2103_v9 = vmul.f32 0.1, %v2063_v13  ;;  %vm2005_vm5 = vmand %vm1965_vm0, %vm1985_vm4 }
 0x210   : > { %v1744_v36 = vadd.f32 %v1743_v51, %v1685_v10  ;;  %v1689_v20 = vpop.f32.mrf.mxu3  ;;  %2564 = vmatmul.bf16.gmra.mxu2 %v7098_v19  ;;  %v2322_v7 = vrot.slane %v7098_v19, 3  ;;  %v2237_v40 = vshrl.u32 %v7098_v19, 16  ;;  %v2240_v59 = vshll.u32 %v7098_v19, 16 }
 0x211   : > { %v7106_v30 = vsel %vm3498_vm11, %v3508_v52, %v3510_v12  ;;  %v2123_v56 = vsel %vm2083_vm12, %v2063_v13, %v2103_v9  ;;  %v1874_v13 = vsel %vm1855_vm2, %v1871_v16, %v1873_v62 }
 0x212   : > { %v1803_v54 = vadd.f32 %v1802_v11, %v1744_v36  ;;  %v2323_v44 = vsel %vm2318_vm13, %v2320_v8, %v2322_v7  ;;  %v2239_v55 = vrot.slane %v2237_v40, 1  ;;  %v2242_v57 = vrot.slane %v2240_v59, 2 }
 0x213   : > { %2675 = vmatmul.bf16.gmra.mxu0 %v2323_v44  ;;  %v1688_v8 = vadd.f32 %v7010_v17, %v1687_v43  ;;  %v2143_v51 = vpack.c.bf16 %v2123_v56, %v2123_v56  ;;  %v1690_v44 = vadd.f32 %v7010_v17, %v1689_v20 }
 0x214   : > { %v1922_v41 = vadd.f32 %v1872_v35, %v1803_v54  ;;  %v7117_v52 = vor.u32 %v2242_v57, %v2239_v55  ;;  %v6221_v35 = vld [vmem:[%s6689_s6 + $0x40] sm:$0xff] }
 0x215   : > { %v1805_v34 = vpop.f32.mrf.mxu1  ;;  %v2182_v59 = vunpack.c.l.b16 %v2143_v51  ;;  %v1875_v54 = vrot.slane %v6221_v35, 2  ;;  %v6000_v35 = vld [vmem:[#allocation10 + $0xe8] sm:$0xff] }
 0x216   : > { %v2064_v6 = vsel %vm2004_vm14, %v1922_v41, 0.0  ;;  %v2244_v63 = vsel %vm2218_vm3, %v7083_v37, %v7117_v52  ;;  %v1946_v37 = vadd.s32 %v7005_v29, %v6894_v33  ;;  %v6008_v41 = vld [vmem:[#allocation10 + $0x128] sm:$0xff]  ;;  %3307 = vmatpush.bf16.msra.mxu1 %v6000_v35 }
 0x217   : > { %vm2084_vm15 = vcmp.ge.f32.partialorder %v2064_v6, 0.0  ;;  %v2104_v23 = vmul.f32 0.1, %v2064_v6  ;;  %v1746_v60 = vpop.f32.mrf.mxu0  ;;  %2617 = vmatmul.bf16.gmra.mxu3 %v2244_v63  ;;  %v3512_v11 = vrot.slane %v2064_v6, 4  ;;  %3365 = vmatpush.bf16.msrb.mxu2 %v6008_v41 }
 0x218   : > { %v1747_v5 = vadd.f32 %v1746_v60, %v1688_v8  ;;  %v1692_v10 = vpop.f32.mrf.mxu3  ;;  %vm1966_vm7 = vcmp.ge.s32.totalorder %v1946_v37, 0  ;;  %vm1986_vm8 = vcmp.lt.s32.totalorder %v1946_v37, 250 }
 0x219   : > { %v2124_v24 = vsel %vm2084_vm15, %v2064_v6, %v2104_v23  ;;  %v7127_v43 = vsel %vm3498_vm11, %v3510_v12, %v3512_v11  ;;  %v1876_v6 = vsel %vm1855_vm2, %v1873_v62, %v1875_v54  ;;  %vm2006_vm10 = vmand %vm1966_vm7, %vm1986_vm8  ;;  %v1947_v62 = vadd.s32 %v7005_v29, %v6909_v1 }
 0x21a   : > { %v1806_v27 = vadd.f32 %v1805_v34, %v1747_v5  ;;  %v2144_v36 = vpack.c.bf16 %v2124_v24, %v2124_v24  ;;  %v1693_v19 = vadd.f32 %v7010_v17, %v1692_v10 }
 0x21b   : > { %vm1967_vm14 = vcmp.ge.s32.totalorder %v1947_v62, 0  ;;  %vm1987_vm15 = vcmp.lt.s32.totalorder %v1947_v62, 250 }
 0x21c   : > { %v1923_v40 = vadd.f32 %v1874_v13, %v1806_v27  ;;  %v2183_v61 = vunpack.c.l.b16 %v2144_v36  ;;  %v6222_v27 = vld [vmem:[%s6689_s6 + $0x48] sm:$0xff]  ;;  %vm2007_vm0 = vmand %vm1967_vm14, %vm1987_vm15 }
 0x21d   : > { %v1807_v9 = vpop.f32.mrf.mxu1  ;;  %v1877_v36 = vrot.slane %v6222_v27, 2 }
 0x21e   : > { %v2065_v55 = vsel %vm2005_vm5, %v1923_v40, 0.0  ;;  %v7133_v16 = vpack.c.b16 %v2183_v61, %v2182_v59 }
 0x21f   : > { %v3514_v57 = vrot.slane %v2065_v55, 4  ;;  %v1748_v12 = vpop.f32.mrf.mxu0  ;;  %vm2085_vm9 = vcmp.ge.f32.partialorder %v2065_v55, 0.0  ;;  %v2105_v20 = vmul.f32 0.1, %v2065_v55  ;;  %v1878_v10 = vsel %vm1855_vm2, %v1875_v54, %v1877_v36 }
 0x220   : > { %v1749_v26 = vadd.f32 %v1748_v12, %v1690_v44  ;;  %v1694_v34 = vpop.f32.mrf.mxu3  ;;  %2569 = vmatmul.bf16.gmra.mxu2 %v7133_v16  ;;  %v2324_v45 = vrot.slane %v7133_v16, 3  ;;  %v2246_v56 = vshrl.u32 %v7133_v16, 16  ;;  %v2249_v8 = vshll.u32 %v7133_v16, 16 }
 0x221   : > { %v7141_v63 = vsel %vm3498_vm11, %v3512_v11, %v3514_v57  ;;  %v2125_v40 = vsel %vm2085_vm9, %v2065_v55, %v2105_v20  ;;  %v6223_v20 = vld [vmem:[%s6689_s6 + $0x50] sm:$0xff]  ;;  %v1695_v54 = vadd.f32 %v7010_v17, %v1694_v34 }
 0x222   : > { %v1808_v23 = vadd.f32 %v1807_v9, %v1749_v26  ;;  %v2325_v60 = vsel %vm2318_vm13, %v2322_v7, %v2324_v45  ;;  %v2248_v5 = vrot.slane %v2246_v56, 1  ;;  %v2251_v51 = vrot.slane %v2249_v8, 2  ;;  %v6016_v9 = vld [vmem:[#allocation10 + $0x168] sm:$0xff] }
 0x223   : > { %2680 = vmatmul.bf16.gmra.mxu0 %v2325_v60  ;;  %v2145_v55 = vpack.c.bf16 %v2125_v40, %v2125_v40  ;;  %3423 = vmatpush.bf16.msrb.mxu3 %v6016_v9  ;;  %v1949_v9 = vadd.s32 %v7005_v29, %v6930_v49 }
 0x224   : > { %v1924_v13 = vadd.f32 %v1876_v6, %v1808_v23  ;;  %v7152_v24 = vor.u32 %v2251_v51, %v2248_v5  ;;  %v1879_v6 = vrot.slane %v6223_v20, 2  ;;  %v1948_v23 = vadd.s32 %v7005_v29, %v6914_v21  ;;  %v6224_v20 = vld [vmem:[%s6689_s6 + $0x58] sm:$0xff] }
 0x225   : > { %v1810_v11 = vpop.f32.mrf.mxu1  ;;  %v2184_v5 = vunpack.c.l.b16 %v2145_v55  ;;  %vm1969_vm9 = vcmp.ge.s32.totalorder %v1949_v9, 0 }
 0x226   : > { %v2066_v7 = vsel %vm2006_vm10, %v1924_v13, 0.0  ;;  %v2253_v37 = vsel %vm2218_vm3, %v7117_v52, %v7152_v24  ;;  %vm1968_vm4 = vcmp.ge.s32.totalorder %v1948_v23, 0  ;;  %vm1988_vm5 = vcmp.lt.s32.totalorder %v1948_v23, 250 }
 0x227   : > { %vm2086_vm12 = vcmp.ge.f32.partialorder %v2066_v7, 0.0  ;;  %v2106_v59 = vmul.f32 0.1, %v2066_v7  ;;  %v1751_v61 = vpop.f32.mrf.mxu0  ;;  %2622 = vmatmul.bf16.gmra.mxu3 %v2253_v37  ;;  %v3516_v44 = vrot.slane %v2066_v7, 4  ;;  %vm2008_vm8 = vmand %vm1968_vm4, %vm1988_vm5 }
 0x228   : > { %v1752_v12 = vadd.f32 %v1751_v61, %v1693_v19  ;;  %v1697_v41 = vpop.f32.mrf.mxu3 }
 0x229   : > { %v2126_v26 = vsel %vm2086_vm12, %v2066_v7, %v2106_v59  ;;  %v7162_v52 = vsel %vm3498_vm11, %v3514_v57, %v3516_v44  ;;  %vm1989_vm12 = vcmp.lt.s32.totalorder %v1949_v9, 250 }
 0x22a   : > { %v1811_v56 = vadd.f32 %v1810_v11, %v1752_v12  ;;  %v2146_v8 = vpack.c.bf16 %v2126_v26, %v2126_v26  ;;  %v1880_v11 = vsel %vm1855_vm2, %v1877_v36, %v1879_v6  ;;  %vm2009_vm14 = vmand %vm1969_vm9, %vm1989_vm12 }
 0x22c   : > { %v1925_v60 = vadd.f32 %v1878_v10, %v1811_v56  ;;  %v2185_v51 = vunpack.c.l.b16 %v2146_v8 }
 0x22d   : > { %v1812_v13 = vpop.f32.mrf.mxu1 }
 0x22e   : > { %v2067_v62 = vsel %vm2007_vm0, %v1925_v60, 0.0  ;;  %v7168_v27 = vpack.c.b16 %v2185_v51, %v2184_v5  ;;  %v1698_v5 = vadd.f32 %v7010_v17, %v1697_v41 }
 0x22f   : > { %v3518_v40 = vrot.slane %v2067_v62, 4  ;;  %v1753_v57 = vpop.f32.mrf.mxu0  ;;  %vm2087_vm7 = vcmp.ge.f32.partialorder %v2067_v62, 0.0  ;;  %v2107_v61 = vmul.f32 0.1, %v2067_v62 }
 0x230   : > { %v1754_v19 = vadd.f32 %v1753_v57, %v1695_v54  ;;  %v1699_v7 = vpop.f32.mrf.mxu3  ;;  %2574 = vmatmul.bf16.gmra.mxu2 %v7168_v27  ;;  %v2326_v37 = vrot.slane %v7168_v27, 3  ;;  %v2255_v59 = vshrl.u32 %v7168_v27, 16  ;;  %v2258_v34 = vshll.u32 %v7168_v27, 16  ;;  %v6015_v54 = vld [vmem:[#allocation10 + $0x160] sm:$0xff] }
 0x231   : > { %v7178_v36 = vsel %vm3498_vm11, %v3516_v44, %v3518_v40  ;;  %v1881_v44 = vrot.slane %v6224_v20, 2  ;;  %v2127_v60 = vsel %vm2087_vm7, %v2067_v62, %v2107_v61  ;;  %v5999_v57 = vld [vmem:[#allocation10 + $0xe0] sm:$0xff]  ;;  %3424 = vmatpush.bf16.msrb.mxu3 %v6015_v54 }
 0x232   : > { %v1813_v35 = vadd.f32 %v1812_v13, %v1754_v19  ;;  %v2327_v12 = vsel %vm2318_vm13, %v2324_v45, %v2326_v37  ;;  %v2257_v55 = vrot.slane %v2255_v59, 1  ;;  %v2260_v10 = vrot.slane %v2258_v34, 2  ;;  %v6007_v13 = vld [vmem:[#allocation10 + $0x120] sm:$0xff]  ;;  %3308 = vmatpush.bf16.msra.mxu1 %v5999_v57 }
 0x233   : > { %2685 = vmatmul.bf16.gmra.mxu0 %v2327_v12  ;;  %v2147_v19 = vpack.c.bf16 %v2127_v60, %v2127_v60  ;;  %v1882_v41 = vsel %vm1855_vm2, %v1879_v6, %v1881_v44  ;;  %3366 = vmatpush.bf16.msrb.mxu2 %v6007_v13  ;;  %v1950_v12 = vadd.s32 %v7005_v29, %v6935_v15  ;;  %v6225_v6 = vld [vmem:[%s6689_s6 + $0x60] sm:$0xff] }
 0x234   : > { %v1926_v26 = vadd.f32 %v1880_v11, %v1813_v35  ;;  %v7187_v56 = vor.u32 %v2260_v10, %v2257_v55  ;;  %v1883_v60 = vrot.slane %v6225_v6, 2 }
 0x235   : > { %v1815_v8 = vpop.f32.mrf.mxu1  ;;  %v2186_v10 = vunpack.c.l.b16 %v2147_v19  ;;  %vm1970_vm15 = vcmp.ge.s32.totalorder %v1950_v12, 0  ;;  %vm1990_vm0 = vcmp.lt.s32.totalorder %v1950_v12, 250 }
 0x236   : > { %v2068_v51 = vsel %vm2008_vm8, %v1926_v26, 0.0  ;;  %v2262_v16 = vsel %vm2218_vm3, %v7152_v24, %v7187_v56  ;;  %vm2010_vm5 = vmand %vm1970_vm15, %vm1990_vm0 }
 0x237   : > { %vm2088_vm10 = vcmp.ge.f32.partialorder %v2068_v51, 0.0  ;;  %v2108_v45 = vmul.f32 0.1, %v2068_v51  ;;  %v1756_v23 = vpop.f32.mrf.mxu0  ;;  %2627 = vmatmul.bf16.gmra.mxu3 %v2262_v16  ;;  %v3520_v59 = vrot.slane %v2068_v51, 4 }
 0x238   : > { %v1757_v11 = vadd.f32 %v1756_v23, %v1698_v5  ;;  %v1702_v62 = vpop.f32.mrf.mxu3  ;;  %v1700_v5 = vadd.f32 %v7010_v17, %v1699_v7  ;;  %v1884_v7 = vsel %vm1855_vm2, %v1881_v44, %v1883_v60  ;;  %v1951_v44 = vadd.s32 %v7005_v29, %v6952_v39 }
 0x239   : > { %v2128_v34 = vsel %vm2088_vm10, %v2068_v51, %v2108_v45  ;;  %v7196_v35 = vsel %vm3498_vm11, %v3518_v40, %v3520_v59  ;;  %v1703_v27 = vadd.f32 %v7010_v17, %v1702_v62 }
 0x23a   : > { %v1816_v61 = vadd.f32 %v1815_v8, %v1757_v11  ;;  %v2148_v24 = vpack.c.bf16 %v2128_v34, %v2128_v34  ;;  %vm1971_vm8 = vcmp.ge.s32.totalorder %v1951_v44, 0  ;;  %vm1991_vm9 = vcmp.lt.s32.totalorder %v1951_v44, 250  ;;  %v6227_v44 = vld [vmem:[%s6689_s6 + $0x70] sm:$0xff] }
 0x23b   : > { %vm2011_vm10 = vmand %vm1971_vm8, %vm1991_vm9 }
 0x23c   : > { %v1927_v55 = vadd.f32 %v1882_v41, %v1816_v61  ;;  %v2187_v26 = vunpack.c.l.b16 %v2148_v24 }
 0x23d   : > { %v1817_v20 = vpop.f32.mrf.mxu1 }
 0x23e   : > { %v2069_v51 = vsel %vm2009_vm14, %v1927_v55, 0.0  ;;  %v7203_v8 = vpack.c.b16 %v2187_v26, %v2186_v10  ;;  %v6226_v10 = vld [vmem:[%s6689_s6 + $0x68] sm:$0xff] }
 0x23f   : > { %v3522_v16 = vrot.slane %v2069_v51, 4  ;;  %v1758_v45 = vpop.f32.mrf.mxu0  ;;  %vm2089_vm4 = vcmp.ge.f32.partialorder %v2069_v51, 0.0  ;;  %v2109_v54 = vmul.f32 0.1, %v2069_v51  ;;  %v1885_v26 = vrot.slane %v6226_v10, 2 }
 0x240   : > { %v1759_v40 = vadd.f32 %v1758_v45, %v1700_v5  ;;  %2579 = vmatmul.bf16.gmra.mxu2 %v7203_v8  ;;  %v2328_v9 = vrot.slane %v7203_v8, 3  ;;  %v2264_v23 = vshrl.u32 %v7203_v8, 16  ;;  %v2267_v13 = vshll.u32 %v7203_v8, 16  ;;  %v1704_v61 = vpop.f32.mrf.mxu3  ;;  %v6006_v45 = vld [vmem:[#allocation10 + $0x118] sm:$0xff] }
 0x241   : > { %v7211_v57 = vsel %vm3498_vm11, %v3520_v59, %v3522_v16  ;;  %3367 = vmatpush.bf16.msrb.mxu2 %v6006_v45 }
 0x242   : > { %v1818_v11 = vadd.f32 %v1817_v20, %v1759_v40  ;;  %v2329_v19 = vsel %vm2318_vm13, %v2326_v37, %v2328_v9  ;;  %v2266_v41 = vrot.slane %v2264_v23, 1  ;;  %v2269_v34 = vrot.slane %v2267_v13, 2 }
 0x243   : > { %2690 = vmatmul.bf16.gmra.mxu0 %v2329_v19  ;;  %v2129_v20 = vsel %vm2089_vm4, %v2069_v51, %v2109_v54  ;;  %v1886_v51 = vsel %vm1855_vm2, %v1883_v60, %v1885_v26  ;;  %v1705_v60 = vadd.f32 %v7010_v17, %v1704_v61 }
 0x244   : > { %v1928_v24 = vadd.f32 %v1884_v7, %v1818_v11  ;;  %v7221_v55 = vor.u32 %v2269_v34, %v2266_v41  ;;  %v2149_v13 = vpack.c.bf16 %v2129_v20, %v2129_v20  ;;  %v1952_v11 = vadd.s32 %v7005_v29, %v6957_v3 }
 0x245   : > { %v1820_v59 = vpop.f32.mrf.mxu1  ;;  %v1887_v20 = vrot.slane %v6227_v44, 2 }
 0x246   : > { %v2070_v37 = vsel %vm2010_vm5, %v1928_v24, 0.0  ;;  %v2271_v12 = vsel %vm2218_vm3, %v7187_v56, %v7221_v55  ;;  %v2188_v41 = vunpack.c.l.b16 %v2149_v13  ;;  %vm1972_vm12 = vcmp.ge.s32.totalorder %v1952_v11, 0 }
 0x247   : > { %vm2090_vm7 = vcmp.ge.f32.partialorder %v2070_v37, 0.0  ;;  %v2110_v6 = vmul.f32 0.1, %v2070_v37  ;;  %v1761_v5 = vpop.f32.mrf.mxu0  ;;  %2632 = vmatmul.bf16.gmra.mxu3 %v2271_v12  ;;  %v3524_v40 = vrot.slane %v2070_v37, 4  ;;  %vm1992_vm14 = vcmp.lt.s32.totalorder %v1952_v11, 250 }
 0x248   : > { %v1762_v23 = vadd.f32 %v1761_v5, %v1703_v27  ;;  %v1707_v24 = vpop.f32.mrf.mxu3  ;;  %vm2012_vm0 = vmand %vm1972_vm12, %vm1992_vm14 }
 0x249   : > { %v2130_v54 = vsel %vm2090_vm7, %v2070_v37, %v2110_v6  ;;  %v7231_v62 = vsel %vm3498_vm11, %v3522_v16, %v3524_v40  ;;  %v5998_v6 = vld [vmem:[#allocation10 + $0xd8] sm:$0xff]  ;;  %v1708_v8 = vadd.f32 %v7010_v17, %v1707_v24 }
 0x24a   : > { %v1821_v7 = vadd.f32 %v1820_v59, %v1762_v23  ;;  %v2150_v56 = vpack.c.bf16 %v2130_v54, %v2130_v54  ;;  %v6014_v59 = vld [vmem:[#allocation10 + $0x158] sm:$0xff]  ;;  %3309 = vmatpush.bf16.msra.mxu1 %v5998_v6 }
 0x24b   : > { %3425 = vmatpush.bf16.msrb.mxu3 %v6014_v59 }
 0x24c   : > { %v1929_v19 = vadd.f32 %v1886_v51, %v1821_v7  ;;  %v2189_v34 = vunpack.c.l.b16 %v2150_v56  ;;  %v1888_v51 = vsel %vm1855_vm2, %v1885_v26, %v1887_v20  ;;  %v1953_v26 = vadd.s32 %v7005_v29, %v6974_v22 }
 0x24d   : > { %v1822_v10 = vpop.f32.mrf.mxu1 }
 0x24e   : > { %v2071_v27 = vsel %vm2011_vm10, %v1929_v19, 0.0  ;;  %v7237_v37 = vpack.c.b16 %v2189_v34, %v2188_v41  ;;  %vm1973_vm5 = vcmp.ge.s32.totalorder %v1953_v26, 0  ;;  %vm1993_vm7 = vcmp.lt.s32.totalorder %v1953_v26, 250  ;;  %v6013_v26 = vld [vmem:[#allocation10 + $0x150] sm:$0xff] }
 0x24f   : > { %v3526_v16 = vrot.slane %v2071_v27, 4  ;;  %v1763_v12 = vpop.f32.mrf.mxu0  ;;  %vm2091_vm15 = vcmp.ge.f32.partialorder %v2071_v27, 0.0  ;;  %v2111_v61 = vmul.f32 0.1, %v2071_v27  ;;  %vm2013_vm8 = vmand %vm1973_vm5, %vm1993_vm7  ;;  %3426 = vmatpush.bf16.msrb.mxu3 %v6013_v26 }
 0x250   : > { %v1764_v5 = vadd.f32 %v1763_v12, %v1705_v60  ;;  %2584 = vmatmul.bf16.gmra.mxu2 %v7237_v37  ;;  %v2330_v45 = vrot.slane %v7237_v37, 3  ;;  %v2273_v23 = vshrl.u32 %v7237_v37, 16  ;;  %v2276_v13 = vshll.u32 %v7237_v37, 16  ;;  %v1709_v6 = vpop.f32.mrf.mxu3  ;;  %v6231_v37 = vld [vmem:[%s7903_s5] ss:$0 sm:$0xff] }
 0x251   : > { %v7245_v54 = vsel %vm3498_vm11, %v3524_v40, %v3526_v16  ;;  %v2131_v12 = vsel %vm2091_vm15, %v2071_v27, %v2111_v61 }
 0x252   : > { %v1823_v7 = vadd.f32 %v1822_v10, %v1764_v5  ;;  %v2331_v56 = vsel %vm2318_vm13, %v2328_v9, %v2330_v45  ;;  %v2275_v19 = vrot.slane %v2273_v23, 1  ;;  %v2278_v41 = vrot.slane %v2276_v13, 2  ;;  %v6228_v10 = vld [vmem:[%s6689_s6 + $0x78] sm:$0xff]  ;;  %s5919_s6 = sshll.u32 %s7946_s23, 5 }
 0x253   : > { %2695 = vmatmul.bf16.gmra.mxu0 %v2331_v56  ;;  %v1889_v60 = vrot.slane %v6228_v10, 2  ;;  %s5161_s3 = sadd.s32 %s5919_s6, %s5918_s11 }
 0x254   : > { %v1930_v34 = vadd.f32 %v1888_v51, %v1823_v7  ;;  %v7256_v44 = vor.u32 %v2278_v41, %v2275_v19  ;;  %v2151_v51 = vpack.c.bf16 %v2131_v12, %v2131_v12  ;;  %v1954_v19 = vadd.s32 %v7005_v29, %v6979_v32  ;;  %v5997_v12 = vld [vmem:[#allocation10 + $0xd0] sm:$0xff]  ;;  %s5920_s21 = sshll.u32 %s5161_s3, 3 }
 0x255   : > { %v1825_v40 = vpop.f32.mrf.mxu1  ;;  %v1890_v27 = vsel %vm1855_vm2, %v1887_v20, %v1889_v60  ;;  %3310 = vmatpush.bf16.msra.mxu1 %v5997_v12  ;;  %s5163_s7 = scalar_lea.hbm %s7947_s25, %s5920_s21 }
 0x256   : > { %v2072_v9 = vsel %vm2012_vm0, %v1930_v34, 0.0  ;;  %v2280_v11 = vsel %vm2218_vm3, %v7221_v55, %v7256_v44  ;;  %v6005_v55 = vld [vmem:[#allocation10 + $0x110] sm:$0xff]  ;;  %v2190_v34 = vunpack.c.l.b16 %v2151_v51  ;;  %vm1974_vm9 = vcmp.ge.s32.totalorder %v1954_v19, 0  ;;  %s5166_s13 = sshll.u32 %s5163_s7, 4  ;;  %s5167_s13 = int_to_ptr.hbm [resolvable:$true] %s5166_s13 }
 0x257   : > { %vm2092_vm4 = vcmp.ge.f32.partialorder %v2072_v9, 0.0  ;;  %v2112_v59 = vmul.f32 0.1, %v2072_v9  ;;  %v1766_v5 = vpop.f32.mrf.mxu0  ;;  %2637 = vmatmul.bf16.gmra.mxu3 %v2280_v11  ;;  %v3528_v23 = vrot.slane %v2072_v9, 4  ;;  %3368 = vmatpush.bf16.msrb.mxu2 %v6005_v55  ;;  %v6229_v11 = vld [vmem:[%s6697_s12 + $0x10] sm:$0xff]  ;;  %vm1994_vm10 = vcmp.lt.s32.totalorder %v1954_v19, 250 }
 0x258   : > { %v1767_v13 = vadd.f32 %v1766_v5, %v1708_v8  ;;  %v1891_v20 = vrot.slane %v6229_v11, 2  ;;  %vm2014_vm14 = vmand %vm1974_vm9, %vm1994_vm10  ;;  %s6396_s8 = sshra.s32 %s5167_s13, 4  ;;  %s6397_s8 = int_to_ptr.hbm [resolvable:$true] %s6396_s8 }
 0x259   : > { %v2132_v61 = vsel %vm2092_vm4, %v2072_v9, %v2112_v59  ;;  %v7266_v24 = vsel %vm3498_vm11, %v3526_v16, %v3528_v23  ;;  %v1710_v9 = vadd.f32 %v7010_v17, %v1709_v6  ;;  %v1712_v6 = vpop.f32.mrf.mxu3  ;;  %p6403_p10 = scmp.lt.s32.totalorder %s6397_s8, %s7948_s29 }
 0x25a   : > { %v1826_v7 = vadd.f32 %v1825_v40, %v1767_v13  ;;  %v2152_v56 = vpack.c.bf16 %v2132_v61, %v2132_v61 }
 0x25c   : > { %v1931_v41 = vadd.f32 %v1890_v27, %v1826_v7  ;;  %v2191_v10 = vunpack.c.l.b16 %v2152_v56  ;;  %v1892_v7 = vsel %vm1855_vm2, %v1889_v60, %v1891_v20  ;;  %v1955_v60 = vadd.s32 %v7005_v29, %v6991_v18 }
 0x25d   : > { %v1827_v8 = vpop.f32.mrf.mxu1 }
 0x25e   : > { %v2073_v16 = vsel %vm2013_vm8, %v1931_v41, 0.0  ;;  %v7272_v59 = vpack.c.b16 %v2191_v10, %v2190_v34  ;;  %vm1975_vm0 = vcmp.ge.s32.totalorder %v1955_v60, 0  ;;  %vm1995_vm4 = vcmp.lt.s32.totalorder %v1955_v60, 250 }
 0x25f   : > { %v1768_v40 = vpop.f32.mrf.mxu0  ;;  %v3530_v5 = vrot.slane %v2073_v16, 4  ;;  %vm2093_vm12 = vcmp.ge.f32.partialorder %v2073_v16, 0.0  ;;  %v2113_v17 = vmul.f32 0.1, %v2073_v16  ;;  %vm2015_vm5 = vmand %vm1975_vm0, %vm1995_vm4 }
 0x260   : > { %v1769_v13 = vadd.f32 %v1768_v40, %v1710_v9  ;;  %2589 = vmatmul.bf16.gmra.mxu2 %v7272_v59  ;;  %v2332_v51 = vrot.slane %v7272_v59, 3  ;;  %v2282_v27 = vshrl.u32 %v7272_v59, 16  ;;  %v2285_v61 = vshll.u32 %v7272_v59, 16 }
 0x261   : > { %v7280_v56 = vsel %vm3498_vm11, %v3528_v23, %v3530_v5  ;;  %v6230_v23 = vld [vmem:[%s6697_s12 + $0x18] sm:$0xff] }
 0x262   : > { %7937 = vst [vmem:[#allocation25_spill] sm:$0xff] %v7280_v56  ;;  %v1828_v55 = vadd.f32 %v1827_v8, %v1769_v13  ;;  %v2333_v41 = vsel %vm2318_vm13, %v2330_v45, %v2332_v51  ;;  %v2284_v34 = vrot.slane %v2282_v27, 1  ;;  %v2287_v10 = vrot.slane %v2285_v61, 2 }
 0x263   : > { %2700 = vmatmul.bf16.gmra.mxu0 %v2333_v41  ;;  %v1893_v11 = vrot.slane %v6230_v23, 2  ;;  %v2133_v8 = vsel %vm2093_vm12, %v2073_v16, %v2113_v17  ;;  %v1713_v45 = vadd.f32 %v6231_v37, %v1712_v6 }
 0x264   : > { %v1932_v26 = vadd.f32 %v1892_v7, %v1828_v55  ;;  %v2288_v12 = vor.u32 %v2287_v10, %v2284_v34  ;;  %v2153_v55 = vpack.c.bf16 %v2133_v8, %v2133_v8  ;;  %v1714_v10 = vpop.f32.mrf.mxu3 }
 0x265   : > { %v1830_v13 = vpop.f32.mrf.mxu1  ;;  %v1894_v16 = vsel %vm1855_vm2, %v1891_v20, %v1893_v11 }
 0x266   : > { %v2074_v9 = vsel %vm2014_vm14, %v1932_v26, 0.0  ;;  %v2289_v19 = vsel %vm2218_vm3, %v7256_v44, %v2288_v12  ;;  %v1956_v44 = vadd.s32 %v7005_v29, %v6996_v31  ;;  %v2192_v23 = vunpack.c.l.b16 %v2153_v55 }
 0x267   : > { %vm2094_vm15 = vcmp.ge.f32.partialorder %v2074_v9, 0.0  ;;  %v2114_v40 = vmul.f32 0.1, %v2074_v9  ;;  %v1771_v27 = vpop.f32.mrf.mxu0  ;;  %2642 = vmatmul.bf16.gmra.mxu3 %v2289_v19  ;;  %v3532_v61 = vrot.slane %v2074_v9, 4 }
 0x268   : > { %v1772_v7 = vadd.f32 %v1771_v27, %v1713_v45  ;;  %v1715_v45 = vadd.f32 %v6231_v37, %v1714_v10  ;;  %vm1976_vm7 = vcmp.ge.s32.totalorder %v1956_v44, 0  ;;  %vm1996_vm2 = vcmp.lt.s32.totalorder %v1956_v44, 250 }
 0x269   : > { %v2134_v17 = vsel %vm2094_vm15, %v2074_v9, %v2114_v40  ;;  %v7300_v41 = vsel %vm3498_vm11, %v3530_v5, %v3532_v61  ;;  %vm2016_vm9 = vmand %vm1976_vm7, %vm1996_vm2 }
 0x26a   : > { %7938 = vst [vmem:[#allocation26_spill] sm:$0xff] %v7300_v41  ;;  %v1831_v6 = vadd.f32 %v1830_v13, %v1772_v7  ;;  %v2154_v34 = vpack.c.bf16 %v2134_v17, %v2134_v17  ;;  %v6034_v41 = vld [vmem:[#allocation7 + $0x1f8] sm:$0xff] }
 0x26c   : > { %v1933_v26 = vadd.f32 %v1894_v16, %v1831_v6  ;;  %v2193_v19 = vunpack.c.l.b16 %v2154_v34 }
 0x26d   : > { %v1832_v13 = vpop.f32.mrf.mxu1 }
 0x26e   : > { %v7304_v27 = vsel %vm2015_vm5, %v1933_v26, 0.0  ;;  %v2203_v60 = vpack.c.b16 %v2193_v19, %v2192_v23  ;;  %v6004_v23 = vld [vmem:[#allocation10 + $0x108] sm:$0xff] }
 0x26f   : > { %7939 = vst [vmem:[#allocation27_spill] sm:$0xff] %v7304_v27  ;;  %v2115_v20 = vmul.f32 0.1, %v7304_v27  ;;  %v1773_v8 = vpop.f32.mrf.mxu0  ;;  %vm2095_vm8 = vcmp.ge.f32.partialorder %v7304_v27, 0.0  ;;  %v7913_v5 = vrot.slane %v7304_v27, 4  ;;  %3369 = vmatpush.bf16.msrb.mxu2 %v6004_v23 }
 0x270   : > { %v1774_v31 = vadd.f32 %v1773_v8, %v1715_v45  ;;  %2594 = vmatmul.bf16.gmra.mxu2 %v2203_v60  ;;  %v2334_v29 = vrot.slane %v2203_v60, 3  ;;  %v2291_v9 = vshrl.u32 %v2203_v60, 16  ;;  %v2294_v40 = vshll.u32 %v2203_v60, 16  ;;  %v5996_v60 = vld [vmem:[#allocation10 + $0xc8] sm:$0xff] }
 0x271   : > { %v7312_v37 = vsel %vm3498_vm11, %v3532_v61, %v7913_v5  ;;  %v2135_v34 = vsel %vm2095_vm8, %v7304_v27, %v2115_v20  ;;  %v6012_v61 = vld [vmem:[#allocation10 + $0x148] sm:$0xff]  ;;  %3311 = vmatpush.bf16.msra.mxu1 %v5996_v60 }
 0x272   : > { %7940 = vst [vmem:[#allocation28_spill] sm:$0xff] %v7312_v37  ;;  %v1833_v7 = vadd.f32 %v1832_v13, %v1774_v31  ;;  %v2335_v55 = vsel %vm2318_vm13, %v2332_v51, %v2334_v29  ;;  %v2293_v16 = vrot.slane %v2291_v9, 1  ;;  %v2296_v17 = vrot.slane %v2294_v40, 2  ;;  %3427 = vmatpush.bf16.msrb.mxu3 %v6012_v61  ;;  %v6026_v37 = vld [vmem:[#allocation7 + $0x1b8] sm:$0xff] }
 0x273   : > { %v2555_v6 = vpop.f32.mrf.mxu2  ;;  %2705 = vmatmul.bf16.gmra.mxu0 %v2335_v55  ;;  %v2155_v59 = vpack.c.bf16 %v2135_v34, %v2135_v34 }
 0x274   : > { %v1934_v10 = vadd.f32 %v1893_v11, %v1833_v7  ;;  %v2297_v26 = vor.u32 %v2296_v17, %v2293_v16  ;;  %v5995_v11 = vld [vmem:[#allocation10 + $0xc0] sm:$0xff]  ;;  %4164 = vmatpush.bf16.msrb.mxu0 %v6026_v37 }
 0x275   : > { %v2194_v31 = vunpack.c.l.b16 %v2155_v59  ;;  %3312 = vmatpush.bf16.msra.mxu1 %v5995_v11 }
 0x276   : > { %v2076_v19 = vsel %vm2016_vm9, %v1934_v10, 0.0  ;;  %v2298_v45 = vsel %vm2218_vm3, %v2288_v12, %v2297_v26 }
 0x277   : > { %vm2096_vm11 = vcmp.ge.f32.partialorder %v2076_v19, 0.0  ;;  %v2116_v51 = vmul.f32 0.1, %v2076_v19  ;;  %2647 = vmatmul.bf16.gmra.mxu3 %v2298_v45  ;;  %v2204_v40 = vpack.c.b16 %v2194_v31, %v2194_v31 }
 0x279   : > { %v2136_v44 = vsel %vm2096_vm11, %v2076_v19, %v2116_v51  ;;  %v7323_v19 = vld [vmem:[#allocation8 + $0x1] ss:$0 sm:$0xff]  ;;  %4218 = vmatpush.bf16.msrb.mxu1 %v6034_v41 }
 0x27a   : > { %v2156_v8 = vpack.c.bf16 %v2136_v44, %v2136_v44  ;;  %v2556_v51 = vadd.f32 %v7323_v19, %v2555_v6  ;;  %v7328_v44 = vstv %s5624_s4  ;;  %s6398_s4 = scalar_lea.hbm %s6397_s8, 128 }
 0x27b   : > { %v2557_v9 = vpop.f32.mrf.mxu2  ;;  %v2779_v11 = vadd.s32 %v7328_v44, %v6824_v58  ;;  %v2780_v6 = vadd.s32 %v7328_v44, %v6831_v0  ;;  %p6399_p1 = scmp.ne.s32.totalorder %s6397_s8, %s6398_s4  ;;  %p6404_p11 = scmp.lt.s32.totalorder %s6402_s16, %s6398_s4 }
 0x27c   : > { %v2216_v20 = vunpack.c.l.b16 %v2156_v8 }
 0x27d   : > { %vm2817_vm10 = vcmp.lt.s32.totalorder %v2779_v11, 250  ;;  %vm2799_vm14 = vcmp.ge.s32.totalorder %v2780_v6, 0  ;;  %vm2818_vm15 = vcmp.lt.s32.totalorder %v2780_v6, 250  ;;  %p6400_p4 = pnand %p6399_p1, %p6640_p3  ;;  %p6405_p12 = por %p6404_p11, %p6403_p10 }
 0x27e   : > { %v2217_v13 = vpack.c.b16 %v2216_v20, %v2194_v31  ;;  %v6011_v20 = vld [vmem:[#allocation10 + $0x140] sm:$0xff]  ;;  %vm2837_vm4 = vmand %vm2799_vm14, %vm2818_vm15 }
 0x27f   : > { %3428 = vmatpush.bf16.msrb.mxu3 %v6011_v20  ;;  %p6401_p8 = pneg %p6400_p4 }
 0x280   : > { %2599 = vmatmul.bf16.gmra.mxu2 %v2204_v40  ;;  %v2671_v12 = vpop.f32.mrf.mxu0  ;;  %v2336_v7 = vrot.slane %v2217_v13, 3  ;;  %v2300_v55 = vshrl.u32 %v2217_v13, 16  ;;  %v2303_v16 = vshll.u32 %v2217_v13, 16 }
 0x281   : > { %p6406_p13 = pnand %p6405_p12, %p6401_p8 }
 0x282   : > { %v2337_v17 = vsel %vm2318_vm13, %v2334_v29, %v2336_v7  ;;  %v2302_v34 = vrot.slane %v2300_v55, 1  ;;  %v2305_v10 = vrot.slane %v2303_v16, 2  ;;  %v6003_v29 = vld [vmem:[#allocation10 + $0x100] sm:$0xff]  ;;  %v2558_v55 = vadd.f32 %v7323_v19, %v2557_v9 }
 0x283   : > { %v2560_v23 = vpop.f32.mrf.mxu2  ;;  %2710 = vmatmul.bf16.gmra.mxu0 %v2337_v17  ;;  %3370 = vmatpush.bf16.msrb.mxu2 %v6003_v29 }
 0x284   : > { %v2306_v61 = vor.u32 %v2305_v10, %v2302_v34 }
 0x286   : > { %v2307_v45 = vsel %vm2218_vm3, %v2297_v26, %v2306_v61  ;;  %vm2798_vm3 = vcmp.ge.s32.totalorder %v2779_v11, 0 }
 0x287   : > { %2652 = vmatmul.bf16.gmra.mxu3 %v2307_v45  ;;  %vm2836_vm12 = vmand %vm2798_vm3, %vm2817_vm10 }
 0x288   : > { %v2673_v59 = vpop.f32.mrf.mxu0 }
 0x28a   : > { %v2613_v60 = vpop.f32.mrf.mxu3 }
 0x28b   : > { %v2614_v8 = vadd.f32 %v2613_v60, %v2556_v51  ;;  %v2562_v31 = vpop.f32.mrf.mxu2 }
 0x28d   : > { %v2672_v40 = vadd.f32 %v2671_v12, %v2614_v8  ;;  %v2561_v8 = vadd.f32 %v7323_v19, %v2560_v23  ;;  %v2782_v23 = vadd.s32 %v7328_v44, %v6843_v28 }
 0x28f   : > { %v2739_v13 = vmul.f32 0.1, %v2672_v40  ;;  %vm2720_vm13 = vcmp.ge.f32.partialorder %v2672_v40, 0.0  ;;  %vm2801_vm9 = vcmp.ge.s32.totalorder %v2782_v23, 0  ;;  %vm2820_vm11 = vcmp.lt.s32.totalorder %v2782_v23, 250 }
 0x290   : > { %v2676_v26 = vpop.f32.mrf.mxu0  ;;  %vm2839_vm3 = vmand %vm2801_vm9, %vm2820_vm11 }
 0x291   : > { %v2758_v17 = vsel %vm2720_vm13, %v2672_v40, %v2739_v13 }
 0x292   : > { %v2615_v16 = vpop.f32.mrf.mxu3  ;;  %v2893_v45 = vsel %vm2836_vm12, %v2758_v17, 0.0 }
 0x293   : > { %v2616_v34 = vadd.f32 %v2615_v16, %v2558_v55  ;;  %v2565_v10 = vpop.f32.mrf.mxu2  ;;  %2715 = vmatmul.bf16.gmra.mxu0 %v2336_v7  ;;  %v2912_v29 = vpack.c.bf16 %v2893_v45, %v2893_v45  ;;  %v2781_v7 = vadd.s32 %v7328_v44, %v6838_v42 }
 0x295   : > { %v2674_v12 = vadd.f32 %v2673_v59, %v2616_v34  ;;  %v2950_v6 = vunpack.c.l.b16 %v2912_v29  ;;  %vm2800_vm7 = vcmp.ge.s32.totalorder %v2781_v7, 0  ;;  %vm2819_vm2 = vcmp.lt.s32.totalorder %v2781_v7, 250 }
 0x296   : > { %vm2838_vm8 = vmand %vm2800_vm7, %vm2819_vm2 }
 0x297   : > { %vm2721_vm0 = vcmp.ge.f32.partialorder %v2674_v12, 0.0  ;;  %v2740_v51 = vmul.f32 0.1, %v2674_v12  ;;  %2657 = vmatmul.bf16.gmra.mxu3 %v2306_v61 }
 0x298   : > { %v2678_v60 = vpop.f32.mrf.mxu0 }
 0x299   : > { %v2759_v20 = vsel %vm2721_vm0, %v2674_v12, %v2740_v51  ;;  %v2563_v12 = vadd.f32 %v7323_v19, %v2562_v31 }
 0x29a   : > { %v2894_v9 = vsel %vm2837_vm4, %v2759_v20, 0.0  ;;  %v2618_v11 = vpop.f32.mrf.mxu3 }
 0x29b   : > { %v2913_v40 = vpack.c.bf16 %v2894_v9, %v2894_v9  ;;  %v2619_v13 = vadd.f32 %v2618_v11, %v2561_v8  ;;  %v2567_v55 = vpop.f32.mrf.mxu2 }
 0x29d   : > { %v2951_v59 = vunpack.c.l.b16 %v2913_v40  ;;  %v2677_v16 = vadd.f32 %v2676_v26, %v2619_v13  ;;  %v2566_v40 = vadd.f32 %v7323_v19, %v2565_v10 }
 0x29f   : > { %v2741_v17 = vmul.f32 0.1, %v2677_v16  ;;  %v2969_v34 = vpack.c.b16 %v2951_v59, %v2950_v6  ;;  %vm2722_vm5 = vcmp.ge.f32.partialorder %v2677_v16, 0.0 }
 0x2a0   : > { %v2681_v61 = vpop.f32.mrf.mxu0 }
 0x2a1   : > { %3313 = vmatmul.bf16.vlgmr.msra.gmra.mxu1 %v2969_v34  ;;  %v2760_v51 = vsel %vm2722_vm5, %v2677_v16, %v2741_v17  ;;  %v2992_v59 = vshll.u32 %v2969_v34, 16  ;;  %v2783_v17 = vadd.s32 %v7328_v44, %v6850_v53 }
 0x2a2   : > { %v2620_v45 = vpop.f32.mrf.mxu3  ;;  %v2895_v29 = vsel %vm2838_vm8, %v2760_v51, 0.0 }
 0x2a3   : > { %v2621_v8 = vadd.f32 %v2620_v45, %v2563_v12  ;;  %v2570_v20 = vpop.f32.mrf.mxu2  ;;  %v2914_v13 = vpack.c.bf16 %v2895_v29, %v2895_v29  ;;  %v2994_v51 = vrot.slane %v2992_v59, 1  ;;  %vm2802_vm10 = vcmp.ge.s32.totalorder %v2783_v17, 0 }
 0x2a4   : > { %vm2821_vm14 = vcmp.lt.s32.totalorder %v2783_v17, 250  ;;  %v2990_v29 = vshrl.u32 %v2969_v34, 16 }
 0x2a5   : > { %v2679_v26 = vadd.f32 %v2678_v60, %v2621_v8  ;;  %v2952_v60 = vunpack.c.l.b16 %v2914_v13  ;;  %vm2840_vm15 = vmand %vm2802_vm10, %vm2821_vm14 }
 0x2a7   : > { %vm2723_vm13 = vcmp.ge.f32.partialorder %v2679_v26, 0.0  ;;  %v2742_v9 = vmul.f32 0.1, %v2679_v26 }
 0x2a8   : > { %v2683_v11 = vpop.f32.mrf.mxu0 }
 0x2a9   : > { %v2761_v7 = vsel %vm2723_vm13, %v2679_v26, %v2742_v9  ;;  %v2784_v26 = vadd.s32 %v7328_v44, %v6855_v2  ;;  %v2568_v9 = vadd.f32 %v7323_v19, %v2567_v55 }
 0x2aa   : > { %v2896_v6 = vsel %vm2839_vm3, %v2761_v7, 0.0  ;;  %v2623_v31 = vpop.f32.mrf.mxu3  ;;  %v2995_v7 = vor.u32 %v2994_v51, %v2990_v29  ;;  %v2571_v51 = vadd.f32 %v7323_v19, %v2570_v20 }
 0x2ab   : > { %v2915_v5 = vpack.c.bf16 %v2896_v6, %v2896_v6  ;;  %v2624_v16 = vadd.f32 %v2623_v31, %v2566_v40  ;;  %v7344_v12 = vpop.f32.mrf.mxu2  ;;  %v3078_v40 = vrot.slane %v2969_v34, 1  ;;  %vm2803_vm0 = vcmp.ge.s32.totalorder %v2784_v26, 0 }
 0x2ac   : > { %vm2822_vm4 = vcmp.lt.s32.totalorder %v2784_v26, 250 }
 0x2ad   : > { %v2682_v23 = vadd.f32 %v2681_v61, %v2624_v16  ;;  %v2953_v45 = vunpack.c.l.b16 %v2915_v5  ;;  %vm2841_vm7 = vmand %vm2803_vm0, %vm2822_vm4 }
 0x2af   : > { %v2743_v8 = vmul.f32 0.1, %v2682_v23  ;;  %v7346_v27 = vpack.c.b16 %v2953_v45, %v2952_v60  ;;  %vm2724_vm12 = vcmp.ge.f32.partialorder %v2682_v23, 0.0  ;;  %v6042_v45 = vld [vmem:[#allocation7 + $0x238] sm:$0xff] }
 0x2b0   : > { %v2686_v10 = vpop.f32.mrf.mxu0  ;;  %4272 = vmatpush.bf16.msra.mxu2 %v6042_v45 }
 0x2b1   : > { %3318 = vmatmul.bf16.gmra.mxu1 %v7346_v27  ;;  %v3079_v61 = vrot.slane %v7346_v27, 1  ;;  %v2997_v5 = vshll.u32 %v7346_v27, 16  ;;  %v2762_v6 = vsel %vm2724_vm12, %v2682_v23, %v2743_v8  ;;  %v3001_v20 = vshrl.u32 %v7346_v27, 16 }
 0x2b2   : > { %v2625_v13 = vpop.f32.mrf.mxu3  ;;  %v2897_v56 = vsel %vm2840_vm15, %v2762_v6, 0.0 }
 0x2b3   : > { %v2626_v31 = vadd.f32 %v2625_v13, %v2568_v9  ;;  %v7355_v59 = vpop.f32.mrf.mxu2  ;;  %v3080_v16 = vsel %vm638_vm1, %v3078_v40, %v3079_v61  ;;  %v2999_v60 = vrot.slane %v2997_v5, 1  ;;  %v2916_v8 = vpack.c.bf16 %v2897_v56, %v2897_v56 }
 0x2b4   : > { %3429 = vmatmul.bf16.vlgmr.msrb.gmra.mxu3 %v3080_v16  ;;  %v2785_v5 = vadd.s32 %v7328_v44, %v6869_v38  ;;  %v2786_v56 = vadd.s32 %v7328_v44, %v6874_v48 }
 0x2b5   : > { %v2684_v55 = vadd.f32 %v2683_v11, %v2626_v31  ;;  %v3000_v34 = vsel %vm548_vm6, %v2995_v7, %v2999_v60  ;;  %v2954_v7 = vunpack.c.l.b16 %v2916_v8 }
 0x2b6   : > { %3371 = vmatmul.bf16.vlgmr.msrb.gmra.mxu2 %v3000_v34  ;;  %vm2804_vm2 = vcmp.ge.s32.totalorder %v2785_v5, 0  ;;  %vm2823_vm9 = vcmp.lt.s32.totalorder %v2785_v5, 250  ;;  %vm2805_vm13 = vcmp.ge.s32.totalorder %v2786_v56, 0  ;;  %vm2824_vm3 = vcmp.lt.s32.totalorder %v2786_v56, 250 }
 0x2b7   : > { %vm2725_vm5 = vcmp.ge.f32.partialorder %v2684_v55, 0.0  ;;  %v2744_v17 = vmul.f32 0.1, %v2684_v55  ;;  %vm2842_vm11 = vmand %vm2804_vm2, %vm2823_vm9 }
 0x2b8   : > { %v2688_v23 = vpop.f32.mrf.mxu0  ;;  %vm2843_vm12 = vmand %vm2805_vm13, %vm2824_vm3 }
 0x2b9   : > { %v2763_v26 = vsel %vm2725_vm5, %v2684_v55, %v2744_v17  ;;  %v2573_v55 = vadd.f32 %v7323_v19, %v7344_v12  ;;  %v3003_v17 = vor.u32 %v3001_v20, %v2999_v60 }
 0x2ba   : > { %v2898_v29 = vsel %vm2841_vm7, %v2763_v26, 0.0  ;;  %v2628_v11 = vpop.f32.mrf.mxu3 }
 0x2bb   : > { %v2917_v9 = vpack.c.bf16 %v2898_v29, %v2898_v29  ;;  %v2629_v40 = vadd.f32 %v2628_v11, %v2571_v51  ;;  %v2577_v13 = vpop.f32.mrf.mxu2 }
 0x2bd   : > { %v2687_v6 = vadd.f32 %v2686_v10, %v2629_v40  ;;  %v2955_v31 = vunpack.c.l.b16 %v2917_v9  ;;  %v6041_v9 = vld [vmem:[#allocation7 + $0x230] sm:$0xff] }
 0x2be   : > { %4273 = vmatpush.bf16.msra.mxu2 %v6041_v9 }
 0x2bf   : > { %v2745_v16 = vmul.f32 0.1, %v2687_v6  ;;  %v7362_v37 = vpack.c.b16 %v2955_v31, %v2954_v7  ;;  %vm2726_vm8 = vcmp.ge.f32.partialorder %v2687_v6, 0.0  ;;  %v2576_v7 = vadd.f32 %v7323_v19, %v7355_v59 }
 0x2c0   : > { %v2691_v41 = vpop.f32.mrf.mxu0 }
 0x2c1   : > { %3323 = vmatmul.bf16.gmra.mxu1 %v7362_v37  ;;  %v3081_v10 = vrot.slane %v7362_v37, 1  ;;  %v3005_v34 = vshll.u32 %v7362_v37, 16  ;;  %v2764_v51 = vsel %vm2726_vm8, %v2687_v6, %v2745_v16  ;;  %v3009_v9 = vshrl.u32 %v7362_v37, 16 }
 0x2c2   : > { %v2630_v45 = vpop.f32.mrf.mxu3  ;;  %v2899_v40 = vsel %vm2842_vm11, %v2764_v51, 0.0 }
 0x2c3   : > { %v2631_v8 = vadd.f32 %v2630_v45, %v2573_v55  ;;  %v7372_v26 = vpop.f32.mrf.mxu2  ;;  %v3082_v29 = vsel %vm638_vm1, %v3079_v61, %v3081_v10  ;;  %v3007_v11 = vrot.slane %v3005_v34, 1  ;;  %v2918_v6 = vpack.c.bf16 %v2899_v40, %v2899_v40  ;;  %v6025_v34 = vld [vmem:[#allocation7 + $0x1b0] sm:$0xff] }
 0x2c4   : > { %3434 = vmatmul.bf16.gmra.mxu3 %v3082_v29  ;;  %v6033_v45 = vld [vmem:[#allocation7 + $0x1f0] sm:$0xff]  ;;  %4165 = vmatpush.bf16.msrb.mxu0 %v6025_v34  ;;  %v2578_v40 = vadd.f32 %v7323_v19, %v2577_v13 }
 0x2c5   : > { %v2689_v27 = vadd.f32 %v2688_v23, %v2631_v8  ;;  %v3008_v12 = vsel %vm548_vm6, %v3003_v17, %v3007_v11  ;;  %v2787_v23 = vadd.s32 %v7328_v44, %v6889_v14  ;;  %v2956_v17 = vunpack.c.l.b16 %v2918_v6  ;;  %4219 = vmatpush.bf16.msrb.mxu1 %v6033_v45 }
 0x2c6   : > { %3376 = vmatmul.bf16.gmra.mxu2 %v3008_v12  ;;  %v2788_v12 = vadd.s32 %v7328_v44, %v6894_v33  ;;  %v3011_v6 = vor.u32 %v3009_v9, %v3007_v11  ;;  %v2581_v45 = vadd.f32 %v7323_v19, %v7372_v26 }
 0x2c7   : > { %vm2727_vm10 = vcmp.ge.f32.partialorder %v2689_v27, 0.0  ;;  %v2746_v5 = vmul.f32 0.1, %v2689_v27  ;;  %vm2806_vm14 = vcmp.ge.s32.totalorder %v2787_v23, 0  ;;  %vm2825_vm0 = vcmp.lt.s32.totalorder %v2787_v23, 250 }
 0x2c8   : > { %v2693_v60 = vpop.f32.mrf.mxu0  ;;  %vm2844_vm4 = vmand %vm2806_vm14, %vm2825_vm0  ;;  %vm2807_vm5 = vcmp.ge.s32.totalorder %v2788_v12, 0  ;;  %vm2826_vm7 = vcmp.lt.s32.totalorder %v2788_v12, 250 }
 0x2c9   : > { %v2765_v61 = vsel %vm2727_vm10, %v2689_v27, %v2746_v5  ;;  %vm2845_vm8 = vmand %vm2807_vm5, %vm2826_vm7 }
 0x2ca   : > { %v2900_v31 = vsel %vm2843_vm12, %v2765_v61, 0.0  ;;  %v2633_v16 = vpop.f32.mrf.mxu3 }
 0x2cb   : > { %v2919_v56 = vpack.c.bf16 %v2900_v31, %v2900_v31  ;;  %v2634_v20 = vadd.f32 %v2633_v16, %v2576_v7  ;;  %v7380_v55 = vpop.f32.mrf.mxu2 }
 0x2cd   : > { %v2692_v51 = vadd.f32 %v2691_v41, %v2634_v20  ;;  %v2957_v8 = vunpack.c.l.b16 %v2919_v56 }
 0x2cf   : > { %v2747_v29 = vmul.f32 0.1, %v2692_v51  ;;  %v7382_v59 = vpack.c.b16 %v2957_v8, %v2956_v17  ;;  %vm2728_vm15 = vcmp.ge.f32.partialorder %v2692_v51, 0.0 }
 0x2d0   : > { %v2696_v27 = vpop.f32.mrf.mxu0 }
 0x2d1   : > { %3328 = vmatmul.bf16.gmra.mxu1 %v7382_v59  ;;  %v3083_v41 = vrot.slane %v7382_v59, 1  ;;  %v3013_v5 = vshll.u32 %v7382_v59, 16  ;;  %v2766_v61 = vsel %vm2728_vm15, %v2692_v51, %v2747_v29 }
 0x2d2   : > { %v2635_v7 = vpop.f32.mrf.mxu3  ;;  %v2901_v23 = vsel %vm2844_vm4, %v2766_v61, 0.0 }
 0x2d3   : > { %v2636_v31 = vadd.f32 %v2635_v7, %v2578_v40  ;;  %v7391_v16 = vpop.f32.mrf.mxu2  ;;  %v3084_v56 = vsel %vm638_vm1, %v3081_v10, %v3083_v41  ;;  %v3015_v20 = vrot.slane %v3013_v5, 1  ;;  %v2920_v17 = vpack.c.bf16 %v2901_v23, %v2901_v23  ;;  %v6040_v40 = vld [vmem:[#allocation7 + $0x228] sm:$0xff] }
 0x2d4   : > { %3439 = vmatmul.bf16.gmra.mxu3 %v3084_v56  ;;  %v6024_v5 = vld [vmem:[#allocation7 + $0x1a8] sm:$0xff]  ;;  %4274 = vmatpush.bf16.msra.mxu2 %v6040_v40  ;;  %v3017_v23 = vshrl.u32 %v7382_v59, 16 }
 0x2d5   : > { %v2694_v13 = vadd.f32 %v2693_v60, %v2636_v31  ;;  %v3016_v37 = vsel %vm548_vm6, %v3011_v6, %v3015_v20  ;;  %v2789_v60 = vadd.s32 %v7328_v44, %v6909_v1  ;;  %v6032_v7 = vld [vmem:[#allocation7 + $0x1e8] sm:$0xff]  ;;  %v2958_v6 = vunpack.c.l.b16 %v2920_v17  ;;  %4166 = vmatpush.bf16.msrb.mxu0 %v6024_v5 }
 0x2d6   : > { %3381 = vmatmul.bf16.gmra.mxu2 %v3016_v37  ;;  %4220 = vmatpush.bf16.msrb.mxu1 %v6032_v7  ;;  %v2790_v37 = vadd.s32 %v7328_v44, %v6914_v21  ;;  %v2586_v7 = vadd.f32 %v7323_v19, %v7391_v16 }
 0x2d7   : > { %vm2729_vm2 = vcmp.ge.f32.partialorder %v2694_v13, 0.0  ;;  %v2748_v34 = vmul.f32 0.1, %v2694_v13  ;;  %vm2808_vm9 = vcmp.ge.s32.totalorder %v2789_v60, 0  ;;  %vm2827_vm13 = vcmp.lt.s32.totalorder %v2789_v60, 250 }
 0x2d8   : > { %v2698_v11 = vpop.f32.mrf.mxu0  ;;  %vm2846_vm3 = vmand %vm2808_vm9, %vm2827_vm13  ;;  %vm2809_vm10 = vcmp.ge.s32.totalorder %v2790_v37, 0  ;;  %vm2828_vm12 = vcmp.lt.s32.totalorder %v2790_v37, 250 }
 0x2d9   : > { %v2767_v51 = vsel %vm2729_vm2, %v2694_v13, %v2748_v34  ;;  %v2583_v34 = vadd.f32 %v7323_v19, %v7380_v55  ;;  %vm2847_vm15 = vmand %vm2809_vm10, %vm2828_vm12 }
 0x2da   : > { %v2902_v8 = vsel %vm2845_vm8, %v2767_v51, 0.0  ;;  %v2638_v10 = vpop.f32.mrf.mxu3  ;;  %v3019_v51 = vor.u32 %v3017_v23, %v3015_v20 }
 0x2db   : > { %v2921_v29 = vpack.c.bf16 %v2902_v8, %v2902_v8  ;;  %v2639_v9 = vadd.f32 %v2638_v10, %v2581_v45  ;;  %v7399_v12 = vpop.f32.mrf.mxu2 }
 0x2dd   : > { %v2697_v61 = vadd.f32 %v2696_v27, %v2639_v9  ;;  %v2959_v31 = vunpack.c.l.b16 %v2921_v29 }
 0x2df   : > { %v2749_v26 = vmul.f32 0.1, %v2697_v61  ;;  %v7401_v56 = vpack.c.b16 %v2959_v31, %v2958_v6  ;;  %vm2730_vm11 = vcmp.ge.f32.partialorder %v2697_v61, 0.0 }
 0x2e0   : > { %v2701_v13 = vpop.f32.mrf.mxu0 }
 0x2e1   : > { %3333 = vmatmul.bf16.gmra.mxu1 %v7401_v56  ;;  %v3085_v27 = vrot.slane %v7401_v56, 1  ;;  %v3021_v45 = vshll.u32 %v7401_v56, 16  ;;  %v2768_v8 = vsel %vm2730_vm11, %v2697_v61, %v2749_v26 }
 0x2e2   : > { %v2640_v17 = vpop.f32.mrf.mxu3  ;;  %v2903_v40 = vsel %vm2846_vm3, %v2768_v8, 0.0 }
 0x2e3   : > { %v2641_v10 = vadd.f32 %v2640_v17, %v2583_v34  ;;  %v7411_v29 = vpop.f32.mrf.mxu2  ;;  %v3086_v9 = vsel %vm638_vm1, %v3083_v41, %v3085_v27  ;;  %v3023_v60 = vrot.slane %v3021_v45, 1  ;;  %v2922_v6 = vpack.c.bf16 %v2903_v40, %v2903_v40  ;;  %v6039_v34 = vld [vmem:[#allocation7 + $0x220] sm:$0xff] }
 0x2e4   : > { %3444 = vmatmul.bf16.gmra.mxu3 %v3086_v9  ;;  %4275 = vmatpush.bf16.msra.mxu2 %v6039_v34  ;;  %v2792_v9 = vadd.s32 %v7328_v44, %v6935_v15 }
 0x2e5   : > { %v2699_v55 = vadd.f32 %v2698_v11, %v2641_v10  ;;  %v3024_v59 = vsel %vm548_vm6, %v3019_v51, %v3023_v60  ;;  %v2791_v11 = vadd.s32 %v7328_v44, %v6930_v49  ;;  %v2960_v45 = vunpack.c.l.b16 %v2922_v6 }
 0x2e6   : > { %3386 = vmatmul.bf16.gmra.mxu2 %v3024_v59  ;;  %v2588_v59 = vadd.f32 %v7323_v19, %v7399_v12  ;;  %vm2811_vm2 = vcmp.ge.s32.totalorder %v2792_v9, 0  ;;  %vm2830_vm8 = vcmp.lt.s32.totalorder %v2792_v9, 250 }
 0x2e7   : > { %vm2731_vm14 = vcmp.ge.f32.partialorder %v2699_v55, 0.0  ;;  %v2750_v5 = vmul.f32 0.1, %v2699_v55  ;;  %vm2810_vm0 = vcmp.ge.s32.totalorder %v2791_v11, 0  ;;  %vm2829_vm5 = vcmp.lt.s32.totalorder %v2791_v11, 250  ;;  %v6031_v11 = vld [vmem:[#allocation7 + $0x1e0] sm:$0xff]  ;;  %vm2849_vm11 = vmand %vm2811_vm2, %vm2830_vm8 }
 0x2e8   : > { %v2703_v20 = vpop.f32.mrf.mxu0  ;;  %vm2848_vm7 = vmand %vm2810_vm0, %vm2829_vm5  ;;  %4221 = vmatpush.bf16.msrb.mxu1 %v6031_v11 }
 0x2e9   : > { %v2769_v61 = vsel %vm2731_vm14, %v2699_v55, %v2750_v5  ;;  %v3025_v55 = vshrl.u32 %v7401_v56, 16 }
 0x2ea   : > { %v2904_v31 = vsel %vm2847_vm15, %v2769_v61, 0.0  ;;  %v2643_v41 = vpop.f32.mrf.mxu3 }
 0x2eb   : > { %v2923_v26 = vpack.c.bf16 %v2904_v31, %v2904_v31  ;;  %v2644_v23 = vadd.f32 %v2643_v41, %v2586_v7  ;;  %v2592_v37 = vpop.f32.mrf.mxu2  ;;  %v3027_v7 = vor.u32 %v3025_v55, %v3023_v60 }
 0x2ed   : > { %v2702_v17 = vadd.f32 %v2701_v13, %v2644_v23  ;;  %v2961_v51 = vunpack.c.l.b16 %v2923_v26  ;;  %v6023_v23 = vld [vmem:[#allocation7 + $0x1a0] sm:$0xff] }
 0x2ee   : > { %4167 = vmatpush.bf16.msrb.mxu0 %v6023_v23  ;;  %v2593_v23 = vadd.f32 %v7323_v19, %v2592_v37  ;;  %v6030_v37 = vld [vmem:[#allocation7 + $0x1d8] sm:$0xff] }
 0x2ef   : > { %v2751_v8 = vmul.f32 0.1, %v2702_v17  ;;  %v7419_v10 = vpack.c.b16 %v2961_v51, %v2960_v45  ;;  %vm2732_vm4 = vcmp.ge.f32.partialorder %v2702_v17, 0.0  ;;  %4222 = vmatpush.bf16.msrb.mxu1 %v6030_v37 }
 0x2f0   : > { %v2706_v16 = vpop.f32.mrf.mxu0 }
 0x2f1   : > { %3338 = vmatmul.bf16.gmra.mxu1 %v7419_v10  ;;  %v3087_v13 = vrot.slane %v7419_v10, 1  ;;  %v3029_v40 = vshll.u32 %v7419_v10, 16  ;;  %v2770_v6 = vsel %vm2732_vm4, %v2702_v17, %v2751_v8 }
 0x2f2   : > { %v2645_v5 = vpop.f32.mrf.mxu3  ;;  %v2905_v34 = vsel %vm2848_vm7, %v2770_v6, 0.0 }
 0x2f3   : > { %v2646_v61 = vadd.f32 %v2645_v5, %v2588_v59  ;;  %v7429_v31 = vpop.f32.mrf.mxu2  ;;  %v3088_v41 = vsel %vm638_vm1, %v3085_v27, %v3087_v13  ;;  %v3031_v26 = vrot.slane %v3029_v40, 1  ;;  %v2591_v27 = vadd.f32 %v7323_v19, %v7411_v29 }
 0x2f4   : > { %3449 = vmatmul.bf16.gmra.mxu3 %v3088_v41  ;;  %v2924_v17 = vpack.c.bf16 %v2905_v34, %v2905_v34  ;;  %v2793_v59 = vadd.s32 %v7328_v44, %v6952_v39 }
 0x2f5   : > { %v2704_v12 = vadd.f32 %v2703_v20, %v2646_v61  ;;  %v3032_v56 = vsel %vm548_vm6, %v3027_v7, %v3031_v26 }
 0x2f6   : > { %3391 = vmatmul.bf16.gmra.mxu2 %v3032_v56  ;;  %v2962_v5 = vunpack.c.l.b16 %v2924_v17  ;;  %vm2812_vm13 = vcmp.ge.s32.totalorder %v2793_v59, 0  ;;  %vm2831_vm10 = vcmp.lt.s32.totalorder %v2793_v59, 250  ;;  %v3033_v56 = vshrl.u32 %v7419_v10, 16  ;;  %v6022_v10 = vld [vmem:[#allocation7 + $0x198] sm:$0xff] }
 0x2f7   : > { %vm2733_vm9 = vcmp.ge.f32.partialorder %v2704_v12, 0.0  ;;  %v2752_v60 = vmul.f32 0.1, %v2704_v12  ;;  %vm2850_vm12 = vmand %vm2812_vm13, %vm2831_vm10  ;;  %4168 = vmatpush.bf16.msrb.mxu0 %v6022_v10 }
 0x2f8   : > { %v2708_v45 = vpop.f32.mrf.mxu0 }
 0x2f9   : > { %v2771_v51 = vsel %vm2733_vm9, %v2704_v12, %v2752_v60  ;;  %v2794_v12 = vadd.s32 %v7328_v44, %v6957_v3  ;;  %v3035_v60 = vor.u32 %v3033_v56, %v3031_v26 }
 0x2fa   : > { %v2906_v8 = vsel %vm2849_vm11, %v2771_v51, 0.0  ;;  %v2648_v9 = vpop.f32.mrf.mxu3 }
 0x2fb   : > { %v2925_v20 = vpack.c.bf16 %v2906_v8, %v2906_v8  ;;  %v2649_v55 = vadd.f32 %v2648_v9, %v2591_v27  ;;  %v2597_v40 = vpop.f32.mrf.mxu2  ;;  %vm2813_vm14 = vcmp.ge.s32.totalorder %v2794_v12, 0  ;;  %vm2832_vm15 = vcmp.lt.s32.totalorder %v2794_v12, 250 }
 0x2fc   : > { %vm2851_vm4 = vmand %vm2813_vm14, %vm2832_vm15 }
 0x2fd   : > { %v2707_v7 = vadd.f32 %v2706_v16, %v2649_v55  ;;  %v2963_v6 = vunpack.c.l.b16 %v2925_v20  ;;  %v6038_v20 = vld [vmem:[#allocation7 + $0x218] sm:$0xff] }
 0x2fe   : > { %4276 = vmatpush.bf16.msra.mxu2 %v6038_v20 }
 0x2ff   : > { %v2753_v61 = vmul.f32 0.1, %v2707_v7  ;;  %v7437_v41 = vpack.c.b16 %v2963_v6, %v2962_v5  ;;  %vm2734_vm3 = vcmp.ge.f32.partialorder %v2707_v7, 0.0 }
 0x300   : > { %v2711_v29 = vpop.f32.mrf.mxu0 }
 0x301   : > { %3343 = vmatmul.bf16.gmra.mxu1 %v7437_v41  ;;  %v3089_v11 = vrot.slane %v7437_v41, 1  ;;  %v3037_v16 = vshll.u32 %v7437_v41, 16  ;;  %v2772_v27 = vsel %vm2734_vm3, %v2707_v7, %v2753_v61  ;;  %v3041_v37 = vshrl.u32 %v7437_v41, 16 }
 0x302   : > { %v2650_v34 = vpop.f32.mrf.mxu3  ;;  %v2907_v26 = vsel %vm2850_vm12, %v2772_v27, 0.0 }
 0x303   : > { %v2651_v17 = vadd.f32 %v2650_v34, %v2593_v23  ;;  %v7446_v51 = vpop.f32.mrf.mxu2  ;;  %v3090_v8 = vsel %vm638_vm1, %v3087_v13, %v3089_v11  ;;  %v3039_v9 = vrot.slane %v3037_v16, 1  ;;  %v2596_v13 = vadd.f32 %v7323_v19, %v7429_v31 }
 0x304   : > { %3454 = vmatmul.bf16.gmra.mxu3 %v3090_v8  ;;  %v2926_v6 = vpack.c.bf16 %v2907_v26, %v2907_v26  ;;  %v2795_v16 = vadd.s32 %v7328_v44, %v6974_v22  ;;  %v2796_v31 = vadd.s32 %v7328_v44, %v6979_v32 }
 0x305   : > { %v2709_v55 = vadd.f32 %v2708_v45, %v2651_v17  ;;  %v3040_v59 = vsel %vm548_vm6, %v3035_v60, %v3039_v9 }
 0x306   : > { %3396 = vmatmul.bf16.gmra.mxu2 %v3040_v59  ;;  %v2964_v60 = vunpack.c.l.b16 %v2926_v6  ;;  %vm2814_vm5 = vcmp.ge.s32.totalorder %v2795_v16, 0  ;;  %vm2833_vm2 = vcmp.lt.s32.totalorder %v2795_v16, 250  ;;  %v3043_v6 = vor.u32 %v3041_v37, %v3039_v9 }
 0x307   : > { %vm2735_vm0 = vcmp.ge.f32.partialorder %v2709_v55, 0.0  ;;  %v2754_v5 = vmul.f32 0.1, %v2709_v55  ;;  %vm2852_vm8 = vmand %vm2814_vm5, %vm2833_vm2  ;;  %vm2815_vm9 = vcmp.ge.s32.totalorder %v2796_v31, 0  ;;  %vm2834_vm11 = vcmp.lt.s32.totalorder %v2796_v31, 250 }
 0x308   : > { %v2713_v7 = vpop.f32.mrf.mxu0  ;;  %vm2853_vm3 = vmand %vm2815_vm9, %vm2834_vm11  ;;  %vm5062_vm11 = vcmask 1041408  }
 0x309   : > { %v2773_v61 = vsel %vm2735_vm0, %v2709_v55, %v2754_v5  ;;  %v2598_v55 = vadd.f32 %v7323_v19, %v2597_v40  ;;  %v6037_v5 = vld [vmem:[#allocation7 + $0x210] sm:$0xff] }
 0x30a   : > { %v2908_v12 = vsel %vm2851_vm4, %v2773_v61, 0.0  ;;  %v2653_v56 = vpop.f32.mrf.mxu3  ;;  %4277 = vmatpush.bf16.msra.mxu2 %v6037_v5  ;;  %v6029_v40 = vld [vmem:[#allocation7 + $0x1d0] sm:$0xff] }
 0x30b   : > { %v2927_v23 = vpack.c.bf16 %v2908_v12, %v2908_v12  ;;  %v2654_v45 = vadd.f32 %v2653_v56, %v2596_v13  ;;  %v2602_v34 = vpop.f32.mrf.mxu2  ;;  %v6021_v13 = vld [vmem:[#allocation7 + $0x190] sm:$0xff]  ;;  %4223 = vmatpush.bf16.msrb.mxu1 %v6029_v40 }
 0x30c   : > { %4169 = vmatpush.bf16.msrb.mxu0 %v6021_v13 }
 0x30d   : > { %v2712_v27 = vadd.f32 %v2711_v29, %v2654_v45  ;;  %v2965_v17 = vunpack.c.l.b16 %v2927_v23 }
 0x30f   : > { %v2755_v8 = vmul.f32 0.1, %v2712_v27  ;;  %v2976_v20 = vpack.c.b16 %v2965_v17, %v2964_v60  ;;  %vm2736_vm7 = vcmp.ge.f32.partialorder %v2712_v27, 0.0  ;;  %v2601_v60 = vadd.f32 %v7323_v19, %v7446_v51 }
 0x310   : > { %v2716_v10 = vpop.f32.mrf.mxu0 }
 0x311   : > { %3348 = vmatmul.bf16.gmra.mxu1 %v2976_v20  ;;  %v3091_v59 = vrot.slane %v2976_v20, 1  ;;  %v3045_v26 = vshll.u32 %v2976_v20, 16  ;;  %v2774_v61 = vsel %vm2736_vm7, %v2712_v27, %v2755_v8  ;;  %v3049_v19 = vshrl.u32 %v2976_v20, 16 }
 0x312   : > { %v2655_v29 = vpop.f32.mrf.mxu3  ;;  %v2909_v34 = vsel %vm2852_vm8, %v2774_v61, 0.0 }
 0x313   : > { %v2656_v12 = vadd.f32 %v2655_v29, %v2598_v55  ;;  %v3092_v56 = vsel %vm638_vm1, %v3089_v11, %v3091_v59  ;;  %v3047_v23 = vrot.slane %v3045_v26, 1  ;;  %v2797_v11 = vadd.s32 %v7328_v44, %v6991_v18 }
 0x314   : > { %3459 = vmatmul.bf16.gmra.mxu3 %v3092_v56  ;;  %v2928_v27 = vpack.c.bf16 %v2909_v34, %v2909_v34 }
 0x315   : > { %v2714_v41 = vadd.f32 %v2713_v7, %v2656_v12  ;;  %v3048_v45 = vsel %vm548_vm6, %v3043_v6, %v3047_v23  ;;  %vm2816_vm10 = vcmp.ge.s32.totalorder %v2797_v11, 0  ;;  %vm2835_vm12 = vcmp.lt.s32.totalorder %v2797_v11, 250 }
 0x316   : > { %3401 = vmatmul.bf16.gmra.mxu2 %v3048_v45  ;;  %v2966_v55 = vunpack.c.l.b16 %v2928_v27  ;;  %vm2854_vm15 = vmand %vm2816_vm10, %vm2835_vm12  ;;  %v3051_v45 = vor.u32 %v3049_v19, %v3047_v23 }
 0x317   : > { %vm2737_vm13 = vcmp.ge.f32.partialorder %v2714_v41, 0.0  ;;  %v2756_v9 = vmul.f32 0.1, %v2714_v41 }
 0x318   : > { %v2718_v16 = vpop.f32.mrf.mxu0 }
 0x319   : > { %v2775_v17 = vsel %vm2737_vm13, %v2714_v41, %v2756_v9 }
 0x31a   : > { %v2910_v8 = vsel %vm2853_vm3, %v2775_v17, 0.0  ;;  %v2658_v31 = vpop.f32.mrf.mxu3  ;;  %v6036_v17 = vld [vmem:[#allocation7 + $0x208] sm:$0xff] }
 0x31b   : > { %v2929_v7 = vpack.c.bf16 %v2910_v8, %v2910_v8  ;;  %v2659_v37 = vadd.f32 %v2658_v31, %v2601_v60  ;;  %v6020_v60 = vld [vmem:[#allocation7 + $0x188] sm:$0xff]  ;;  %v6019_v8 = vld [vmem:[#allocation7 + $0x180] sm:$0xff]  ;;  %4278 = vmatpush.bf16.msra.mxu2 %v6036_v17 }
 0x31c   : > { %4170 = vmatpush.bf16.msrb.mxu0 %v6020_v60 }
 0x31d   : > { %v2717_v26 = vadd.f32 %v2716_v10, %v2659_v37  ;;  %v2967_v5 = vunpack.c.l.b16 %v2929_v7  ;;  %v6028_v7 = vld [vmem:[#allocation7 + $0x1c8] sm:$0xff] }
 0x31e   : > { %v3314_v13 = vpop.f32.mrf.mxu1  ;;  %4224 = vmatpush.bf16.msrb.mxu1 %v6028_v7 }
 0x31f   : > { %vm2738_vm14 = vcmp.ge.f32.partialorder %v2717_v26, 0.0  ;;  %v2757_v29 = vmul.f32 0.1, %v2717_v26  ;;  %v2977_v6 = vpack.c.b16 %v2967_v5, %v2966_v55  ;;  %v7474_v5 = vld [vmem:[%s7903_s5 + $0x1] ss:$0 sm:$0xff] }
 0x320   : > { %4171 = vmatpush.bf16.msrb.mxu0 %v6019_v8  ;;  %v6035_v8 = vld [vmem:[#allocation7 + $0x200] sm:$0xff] }
 0x321   : > { %v2776_v44 = vsel %vm2738_vm14, %v2717_v26, %v2757_v29  ;;  %3353 = vmatmul.bf16.gmra.mxu1 %v2977_v6  ;;  %v3093_v61 = vrot.slane %v2977_v6, 1  ;;  %v3053_v51 = vshll.u32 %v2977_v6, 16  ;;  %v7469_v26 = vstv %s5722_s2  ;;  %4279 = vmatpush.bf16.msra.mxu2 %v6035_v8 }
 0x322   : > { %v2911_v12 = vsel %vm2854_vm15, %v2776_v44, 0.0  ;;  %v2660_v56 = vpop.f32.mrf.mxu3 }
 0x323   : > { %v2930_v40 = vpack.c.bf16 %v2911_v12, %v2911_v12  ;;  %v3094_v41 = vsel %vm638_vm1, %v3091_v59, %v3093_v61  ;;  %v3055_v34 = vrot.slane %v3053_v51, 1  ;;  %v3057_v59 = vshrl.u32 %v2977_v6, 16 }
 0x324   : > { %3464 = vmatmul.bf16.gmra.mxu3 %v3094_v41  ;;  %v3576_v6 = vadd.s32 %v7469_v26, %v6824_v58 }
 0x325   : > { %v3056_v10 = vsel %vm548_vm6, %v3051_v45, %v3055_v34  ;;  %v2968_v9 = vunpack.c.l.b16 %v2930_v40  ;;  %v3059_v55 = vor.u32 %v3057_v59, %v3055_v34  ;;  %v3577_v45 = vadd.s32 %v7469_v26, %v6831_v0  ;;  %v6027_v59 = vld [vmem:[#allocation7 + $0x1c0] sm:$0xff] }
 0x326   : > { %v3316_v16 = vpop.f32.mrf.mxu1  ;;  %3406 = vmatmul.bf16.gmra.mxu2 %v3056_v10  ;;  %vm3595_vm0 = vcmp.ge.s32.totalorder %v3576_v6, 0  ;;  %vm3614_vm4 = vcmp.lt.s32.totalorder %v3576_v6, 250  ;;  %4225 = vmatpush.bf16.msrb.mxu1 %v6027_v59 }
 0x327   : > { %v2978_v11 = vpack.c.b16 %v2968_v9, %v2968_v9  ;;  %vm3633_vm5 = vmand %vm3595_vm0, %vm3614_vm4  ;;  %v3317_v10 = vadd.f32 %v7474_v5, %v3316_v16  ;;  %vm3596_vm7 = vcmp.ge.s32.totalorder %v3577_v45, 0  ;;  %vm3615_vm2 = vcmp.lt.s32.totalorder %v3577_v45, 250 }
 0x328   : > { %vm3634_vm9 = vmand %vm3596_vm7, %vm3615_vm2  ;;  %v3578_v16 = vadd.s32 %v7469_v26, %v6838_v42 }
 0x329   : > { %v3061_v27 = vshll.u32 %v2978_v11, 16  ;;  %v3095_v31 = vrot.slane %v2978_v11, 1 }
 0x32a   : > { %vm3597_vm3 = vcmp.ge.s32.totalorder %v3578_v16, 0  ;;  %vm3616_vm10 = vcmp.lt.s32.totalorder %v3578_v16, 250 }
 0x32b   : > { %v3063_v23 = vrot.slane %v3061_v27, 1  ;;  %v3096_v37 = vsel %vm638_vm1, %v3093_v61, %v3095_v31  ;;  %v3315_v61 = vadd.f32 %v7474_v5, %v3314_v13  ;;  %v3065_v13 = vshrl.u32 %v2978_v11, 16  ;;  %vm3635_vm12 = vmand %vm3597_vm3, %vm3616_vm10 }
 0x32d   : > { %v3064_v29 = vsel %vm548_vm6, %v3059_v55, %v3063_v23 }
 0x32e   : > { %v3319_v20 = vpop.f32.mrf.mxu1 }
 0x32f   : > { %v3320_v6 = vadd.f32 %v7474_v5, %v3319_v20 }
 0x331   : > { %3358 = vmatmul.bf16.gmra.mxu1 %v2978_v11 }
 0x334   : > { %3469 = vmatmul.bf16.gmra.mxu3 %v3096_v37 }
 0x336   : > { %v3321_v44 = vpop.f32.mrf.mxu1  ;;  %3411 = vmatmul.bf16.gmra.mxu2 %v3064_v29 }
 0x337   : > { %v3430_v19 = vpop.f32.mrf.mxu3 }
 0x339   : > { %v3372_v51 = vpop.f32.mrf.mxu2 }
 0x33a   : > { %v3373_v12 = vadd.f32 %v3372_v51, %v3315_v61 }
 0x33c   : > { %v3431_v56 = vadd.f32 %v3430_v19, %v3373_v12 }
 0x33e   : > { %v3555_v40 = vadd.f32 %v7037_v47, %v3431_v56  ;;  %v7481_v41 = vpop.f32.mrf.mxu1  ;;  %v3067_v47 = vor.u32 %v3065_v13, %v3063_v23 }
 0x33f   : > { %v3432_v34 = vpop.f32.mrf.mxu3 }
 0x340   : > { %v3690_v9 = vsel %vm3633_vm5, %v3555_v40, 0.0 }
 0x341   : > { %v3374_v60 = vpop.f32.mrf.mxu2  ;;  %v3728_v17 = vmul.f32 0.1, %v3690_v9  ;;  %vm3709_vm8 = vcmp.ge.f32.partialorder %v3690_v9, 0.0  ;;  %v5063_v61 = vrot.slane %v3690_v9, 6 }
 0x342   : > { %v3375_v27 = vadd.f32 %v3374_v60, %v3317_v10 }
 0x343   : > { %v3747_v29 = vsel %vm3709_vm8, %v3690_v9, %v3728_v17  ;;  %v3579_v9 = vadd.s32 %v7469_v26, %v6843_v28  ;;  %v3322_v17 = vadd.f32 %v7474_v5, %v3321_v44 }
 0x344   : > { %v3433_v7 = vadd.f32 %v3432_v34, %v3375_v27  ;;  %3474 = vmatmul.bf16.gmra.mxu3 %v3095_v31  ;;  %v3766_v12 = vpack.c.bf16 %v3747_v29, %v3747_v29 }
 0x345   : > { %vm3598_vm15 = vcmp.ge.s32.totalorder %v3579_v9, 0  ;;  %vm3617_vm0 = vcmp.lt.s32.totalorder %v3579_v9, 250 }
 0x346   : > { %v3556_v37 = vadd.f32 %v7049_v4, %v3433_v7  ;;  %v7487_v55 = vpop.f32.mrf.mxu1  ;;  %3416 = vmatmul.bf16.gmra.mxu2 %v3067_v47  ;;  %v3803_v10 = vunpack.c.l.b16 %v3766_v12  ;;  %vm3636_vm4 = vmand %vm3598_vm15, %vm3617_vm0  ;;  %v3325_v12 = vadd.f32 %v7474_v5, %v7481_v41  ;;  %v3581_v41 = vadd.s32 %v7469_v26, %v6855_v2 }
 0x347   : > { %v3435_v11 = vpop.f32.mrf.mxu3 }
 0x348   : > { %v3691_v19 = vsel %vm3634_vm9, %v3556_v37, 0.0  ;;  %vm3600_vm9 = vcmp.ge.s32.totalorder %v3581_v41, 0 }
 0x349   : > { %vm3710_vm13 = vcmp.ge.f32.partialorder %v3691_v19, 0.0  ;;  %v3729_v31 = vmul.f32 0.1, %v3691_v19  ;;  %v3377_v23 = vpop.f32.mrf.mxu2  ;;  %v5064_v51 = vrot.slane %v3691_v19, 6 }
 0x34a   : > { %v3378_v56 = vadd.f32 %v3377_v23, %v3320_v6 }
 0x34b   : > { %v3748_v4 = vsel %vm3710_vm13, %v3691_v19, %v3729_v31  ;;  %v7493_v40 = vsel %vm5062_vm11, %v5063_v61, %v5064_v51  ;;  %v3580_v31 = vadd.s32 %v7469_v26, %v6850_v53  ;;  %vm3619_vm13 = vcmp.lt.s32.totalorder %v3581_v41, 250 }
 0x34c   : > { %v3767_v45 = vpack.c.bf16 %v3748_v4, %v3748_v4  ;;  %v3436_v34 = vadd.f32 %v3435_v11, %v3378_v56  ;;  %v6050_v4 = vld [vmem:[#allocation10 + $0x1b8] sm:$0xff]  ;;  %vm3638_vm10 = vmand %vm3600_vm9, %vm3619_vm13 }
 0x34d   : > { %vm3599_vm7 = vcmp.ge.s32.totalorder %v3580_v31, 0  ;;  %vm3618_vm2 = vcmp.lt.s32.totalorder %v3580_v31, 250  ;;  %4885 = vmatpush.bf16.msra.mxu3 %v6050_v4 }
 0x34e   : > { %v7495_v20 = vunpack.c.l.b16 %v3767_v45  ;;  %v3557_v60 = vadd.f32 %v7059_v46, %v3436_v34  ;;  %v7498_v27 = vpop.f32.mrf.mxu1  ;;  %vm3637_vm8 = vmand %vm3599_vm7, %vm3618_vm2 }
 0x34f   : > { %v3437_v13 = vpop.f32.mrf.mxu3 }
 0x350   : > { %v3692_v8 = vsel %vm3635_vm12, %v3557_v60, 0.0  ;;  %v3821_v59 = vpack.c.b16 %v7495_v20, %v3803_v10  ;;  %vm3839_vm12 = vsmask.f32 5376 }
 0x351   : > { %v3730_v7 = vmul.f32 0.1, %v3692_v8  ;;  %v3379_v47 = vpop.f32.mrf.mxu2  ;;  %vm3711_vm14 = vcmp.ge.f32.partialorder %v3692_v8, 0.0  ;;  %v5066_v37 = vrot.slane %v3692_v8, 6 }
 0x352   : > { %v3380_v16 = vadd.f32 %v3379_v47, %v3322_v17  ;;  %4172 = vmatmul.bf16.vlgmr.msrb.gmra.mxu0 %v3821_v59 }
 0x353   : > { %v3749_v46 = vsel %vm3711_vm14, %v3692_v8, %v3730_v7  ;;  %v7505_v29 = vsel %vm5062_vm11, %v5064_v51, %v5066_v37 }
 0x354   : > { %v3438_v11 = vadd.f32 %v3437_v13, %v3380_v16  ;;  %v3768_v6 = vpack.c.bf16 %v3749_v46, %v3749_v46  ;;  %v3844_v16 = vshll.u32 %v3821_v59, 16  ;;  %v3327_v46 = vadd.f32 %v7474_v5, %v7487_v55 }
 0x356   : > { %v3558_v44 = vadd.f32 %v7074_v50, %v3438_v11  ;;  %v7508_v19 = vpop.f32.mrf.mxu1  ;;  %v7512_v23 = vunpack.c.l.b16 %v3768_v6 }
 0x357   : > { %v3440_v61 = vpop.f32.mrf.mxu3 }
 0x358   : > { %v3693_v56 = vsel %vm3636_vm4, %v3558_v44, 0.0  ;;  %v3931_v51 = vpack.c.b16 %v7512_v23, %v7495_v20  ;;  %v3841_v20 = vshrl.u32 %v3821_v59, 16 }
 0x359   : > { %v3382_v45 = vpop.f32.mrf.mxu2  ;;  %vm3712_vm5 = vcmp.ge.f32.partialorder %v3693_v56, 0.0  ;;  %v3731_v34 = vmul.f32 0.1, %v3693_v56  ;;  %v5068_v50 = vrot.slane %v3693_v56, 6 }
 0x35a   : > { %v3383_v10 = vadd.f32 %v3382_v45, %v3325_v12  ;;  %v3846_v45 = vrot.slane %v3844_v16, 3 }
 0x35b   : > { %v3750_v60 = vsel %vm3712_vm5, %v3693_v56, %v3731_v34  ;;  %v7519_v9 = vsel %vm5062_vm11, %v5066_v37, %v5068_v50 }
 0x35c   : > { %v3441_v13 = vadd.f32 %v3440_v61, %v3383_v10  ;;  %v3769_v17 = vpack.c.bf16 %v3750_v60, %v3750_v60  ;;  %v3843_v61 = vrot.slane %v3841_v20, 2 }
 0x35e   : > { %v3559_v8 = vadd.f32 %v7092_v25, %v3441_v13  ;;  %v7524_v7 = vpop.f32.mrf.mxu1  ;;  %v3806_v47 = vunpack.c.l.b16 %v3769_v17  ;;  %v3847_v16 = vor.u32 %v3846_v45, %v3843_v61 }
 0x35f   : > { %v3442_v11 = vpop.f32.mrf.mxu3 }
 0x360   : > { %v3694_v6 = vsel %vm3637_vm8, %v3559_v8, 0.0  ;;  %v3822_v37 = vpack.c.b16 %v3806_v47, %v7512_v23  ;;  %v3582_v23 = vadd.s32 %v7469_v26, %v6869_v38 }
 0x361   : > { %vm3713_vm3 = vcmp.ge.f32.partialorder %v3694_v6, 0.0  ;;  %v3732_v44 = vmul.f32 0.1, %v3694_v6  ;;  %v3384_v31 = vpop.f32.mrf.mxu2  ;;  %v5070_v12 = vrot.slane %v3694_v6, 6 }
 0x362   : > { %v3385_v56 = vadd.f32 %v3384_v31, %v3327_v46  ;;  %v3849_v25 = vshrl.u32 %v3822_v37, 16  ;;  %v3852_v4 = vshll.u32 %v3822_v37, 16  ;;  %4177 = vmatmul.bf16.gmra.mxu0 %v3822_v37  ;;  %vm3601_vm14 = vcmp.ge.s32.totalorder %v3582_v23, 0 }
 0x363   : > { %v3751_v59 = vsel %vm3713_vm3, %v3694_v6, %v3732_v44  ;;  %v7530_v34 = vsel %vm5062_vm11, %v5068_v50, %v5070_v12  ;;  %v6049_v44 = vld [vmem:[#allocation10 + $0x1b0] sm:$0xff]  ;;  %vm3620_vm0 = vcmp.lt.s32.totalorder %v3582_v23, 250  ;;  %v6066_v23 = vld [vmem:[#allocation10 + $0x238] sm:$0xff] }
 0x364   : > { %v3443_v55 = vadd.f32 %v3442_v11, %v3385_v56  ;;  %v3770_v10 = vpack.c.bf16 %v3751_v59, %v3751_v59  ;;  %v3851_v60 = vrot.slane %v3849_v25, 2  ;;  %v3854_v13 = vrot.slane %v3852_v4, 3  ;;  %4886 = vmatpush.bf16.msra.mxu3 %v6049_v44  ;;  %vm3639_vm4 = vmand %vm3601_vm14, %vm3620_vm0  ;;  %4991 = vmatpush.bf16.msra.mxu1 %v6066_v23 }
 0x365   : > { %v3330_v11 = vadd.f32 %v7474_v5, %v7498_v27  ;;  %v3940_v25 = vrot.slane %v3931_v51, 1 }
 0x366   : > { %v3560_v17 = vadd.f32 %v7106_v30, %v3443_v55  ;;  %v3807_v20 = vunpack.c.l.b16 %v3770_v10  ;;  %v7537_v8 = vpop.f32.mrf.mxu1  ;;  %v7539_v46 = vor.u32 %v3854_v13, %v3851_v60  ;;  %v3583_v55 = vadd.s32 %v7469_v26, %v6874_v48 }
 0x367   : > { %v3445_v50 = vpop.f32.mrf.mxu3 }
 0x368   : > { %v3695_v6 = vsel %vm3638_vm10, %v3560_v17, 0.0  ;;  %v3932_v37 = vpack.c.b16 %v3807_v20, %v3806_v47  ;;  %v3856_v41 = vsel %vm3839_vm12, %v3847_v16, %v7539_v46  ;;  %vm3602_vm5 = vcmp.ge.s32.totalorder %v3583_v55, 0 }
 0x369   : > { %v3387_v31 = vpop.f32.mrf.mxu2  ;;  %4226 = vmatmul.bf16.vlgmr.msrb.gmra.mxu1 %v3856_v41  ;;  %vm3714_vm15 = vcmp.ge.f32.partialorder %v3695_v6, 0.0  ;;  %v3733_v30 = vmul.f32 0.1, %v3695_v6  ;;  %v5072_v56 = vrot.slane %v3695_v6, 6  ;;  %vm3621_vm2 = vcmp.lt.s32.totalorder %v3583_v55, 250 }
 0x36a   : > { %v7545_v61 = vrot.slane %v3932_v37, 1  ;;  %v3388_v4 = vadd.f32 %v3387_v31, %v3330_v11  ;;  %v6058_v37 = vld [vmem:[#allocation10 + $0x1f8] sm:$0xff]  ;;  %vm3640_vm8 = vmand %vm3602_vm5, %vm3621_vm2 }
 0x36b   : > { %v3752_v45 = vsel %vm3714_vm15, %v3695_v6, %v3733_v30  ;;  %v7548_v27 = vsel %vm5062_vm11, %v5070_v12, %v5072_v56  ;;  %v3332_v12 = vadd.f32 %v7474_v5, %v7508_v19  ;;  %4938 = vmatpush.bf16.msra.mxu0 %v6058_v37 }
 0x36c   : > { %v3446_v47 = vadd.f32 %v3445_v50, %v3388_v4  ;;  %v3942_v59 = vsel %vm638_vm1, %v3940_v25, %v7545_v61  ;;  %v3771_v10 = vpack.c.bf16 %v3752_v45, %v3752_v45 }
 0x36d   : > { %4280 = vmatmul.bf16.vlgmr.msra.gmra.mxu2 %v3942_v59 }
 0x36e   : > { %v3561_v51 = vadd.f32 %v7127_v43, %v3446_v47  ;;  %v7556_v60 = vpop.f32.mrf.mxu1  ;;  %v3808_v13 = vunpack.c.l.b16 %v3771_v10  ;;  %v3584_v10 = vadd.s32 %v7469_v26, %v6889_v14 }
 0x36f   : > { %v3447_v17 = vpop.f32.mrf.mxu3 }
 0x370   : > { %v3696_v16 = vsel %vm3639_vm4, %v3561_v51, 0.0  ;;  %v3823_v50 = vpack.c.b16 %v3808_v13, %v3807_v20  ;;  %vm3603_vm13 = vcmp.ge.s32.totalorder %v3584_v10, 0  ;;  %vm3622_vm3 = vcmp.lt.s32.totalorder %v3584_v10, 250 }
 0x371   : > { %vm3715_vm7 = vcmp.ge.f32.partialorder %v3696_v16, 0.0  ;;  %v3734_v11 = vmul.f32 0.1, %v3696_v16  ;;  %v3389_v6 = vpop.f32.mrf.mxu2  ;;  %v5074_v43 = vrot.slane %v3696_v16, 6  ;;  %vm3641_vm10 = vmand %vm3603_vm13, %vm3622_vm3 }
 0x372   : > { %v3390_v41 = vadd.f32 %v3389_v6, %v3332_v12  ;;  %v3858_v44 = vshrl.u32 %v3823_v50, 16  ;;  %v3861_v31 = vshll.u32 %v3823_v50, 16  ;;  %4182 = vmatmul.bf16.gmra.mxu0 %v3823_v50 }
 0x373   : > { %v3753_v30 = vsel %vm3715_vm7, %v3696_v16, %v3734_v11  ;;  %v7563_v20 = vsel %vm5062_vm11, %v5072_v56, %v5074_v43  ;;  %v3335_v16 = vadd.f32 %v7474_v5, %v7524_v7 }
 0x374   : > { %v3448_v25 = vadd.f32 %v3447_v17, %v3390_v41  ;;  %v3860_v4 = vrot.slane %v3858_v44, 2  ;;  %v3863_v19 = vrot.slane %v3861_v31, 3  ;;  %v3772_v45 = vpack.c.bf16 %v3753_v30, %v3753_v30 }
 0x376   : > { %v3562_v47 = vadd.f32 %v7141_v63, %v3448_v25  ;;  %v7566_v59 = vpop.f32.mrf.mxu1  ;;  %v7570_v51 = vor.u32 %v3863_v19, %v3860_v4  ;;  %v3809_v12 = vunpack.c.l.b16 %v3772_v45  ;;  %v3337_v19 = vadd.f32 %v7474_v5, %v7537_v8 }
 0x377   : > { %v3450_v17 = vpop.f32.mrf.mxu3 }
 0x378   : > { %v3697_v50 = vsel %vm3640_vm8, %v3562_v47, 0.0  ;;  %v3865_v56 = vsel %vm3839_vm12, %v7539_v46, %v7570_v51  ;;  %v3933_v55 = vpack.c.b16 %v3809_v12, %v3808_v13  ;;  %v3585_v46 = vadd.s32 %v7469_v26, %v6894_v33 }
 0x379   : > { %v3392_v11 = vpop.f32.mrf.mxu2  ;;  %4231 = vmatmul.bf16.gmra.mxu1 %v3865_v56  ;;  %vm3716_vm9 = vcmp.ge.f32.partialorder %v3697_v50, 0.0  ;;  %v3735_v63 = vmul.f32 0.1, %v3697_v50  ;;  %v5076_v6 = vrot.slane %v3697_v50, 6 }
 0x37a   : > { %v3393_v37 = vadd.f32 %v3392_v11, %v3335_v16  ;;  %v3943_v23 = vrot.slane %v3933_v55, 1  ;;  %vm3604_vm14 = vcmp.ge.s32.totalorder %v3585_v46, 0  ;;  %vm3623_vm15 = vcmp.lt.s32.totalorder %v3585_v46, 250  ;;  %v6057_v16 = vld [vmem:[#allocation10 + $0x1f0] sm:$0xff] }
 0x37b   : > { %v3754_v41 = vsel %vm3716_vm9, %v3697_v50, %v3735_v63  ;;  %v7578_v44 = vsel %vm5062_vm11, %v5074_v43, %v5076_v6  ;;  %v6065_v50 = vld [vmem:[#allocation10 + $0x230] sm:$0xff]  ;;  %4939 = vmatpush.bf16.msra.mxu0 %v6057_v16  ;;  %vm3642_vm4 = vmand %vm3604_vm14, %vm3623_vm15 }
 0x37c   : > { %v3451_v7 = vadd.f32 %v3450_v17, %v3393_v37  ;;  %v3944_v31 = vsel %vm638_vm1, %v7545_v61, %v3943_v23  ;;  %v3773_v13 = vpack.c.bf16 %v3754_v41, %v3754_v41  ;;  %v6048_v17 = vld [vmem:[#allocation10 + $0x1a8] sm:$0xff]  ;;  %4992 = vmatpush.bf16.msra.mxu1 %v6065_v50 }
 0x37d   : > { %4285 = vmatmul.bf16.gmra.mxu2 %v3944_v31  ;;  %4887 = vmatpush.bf16.msra.mxu3 %v6048_v17 }
 0x37e   : > { %v3563_v30 = vadd.f32 %v7162_v52, %v3451_v7  ;;  %v7585_v25 = vpop.f32.mrf.mxu1  ;;  %v3810_v4 = vunpack.c.l.b16 %v3773_v13 }
 0x37f   : > { %v3452_v43 = vpop.f32.mrf.mxu3 }
 0x380   : > { %v3698_v45 = vsel %vm3641_vm10, %v3563_v30, 0.0  ;;  %v3824_v47 = vpack.c.b16 %v3810_v4, %v3809_v12  ;;  %v3586_v30 = vadd.s32 %v7469_v26, %v6909_v1 }
 0x381   : > { %vm3717_vm0 = vcmp.ge.f32.partialorder %v3698_v45, 0.0  ;;  %v3736_v61 = vmul.f32 0.1, %v3698_v45  ;;  %v3394_v10 = vpop.f32.mrf.mxu2  ;;  %v5078_v11 = vrot.slane %v3698_v45, 6 }
 0x382   : > { %v3395_v56 = vadd.f32 %v3394_v10, %v3337_v19  ;;  %v3867_v55 = vshrl.u32 %v3824_v47, 16  ;;  %v3870_v52 = vshll.u32 %v3824_v47, 16  ;;  %4187 = vmatmul.bf16.gmra.mxu0 %v3824_v47  ;;  %v3340_v47 = vadd.f32 %v7474_v5, %v7556_v60 }
 0x383   : > { %v3755_v63 = vsel %vm3717_vm0, %v3698_v45, %v3736_v61  ;;  %v7592_v12 = vsel %vm5062_vm11, %v5076_v6, %v5078_v11  ;;  %vm3605_vm7 = vcmp.ge.s32.totalorder %v3586_v30, 0  ;;  %vm3624_vm2 = vcmp.lt.s32.totalorder %v3586_v30, 250 }
 0x384   : > { %v3453_v8 = vadd.f32 %v3452_v43, %v3395_v56  ;;  %v3869_v37 = vrot.slane %v3867_v55, 2  ;;  %v3872_v41 = vrot.slane %v3870_v52, 3  ;;  %v3774_v7 = vpack.c.bf16 %v3755_v63, %v3755_v63  ;;  %vm3643_vm8 = vmand %vm3605_vm7, %vm3624_vm2 }
 0x386   : > { %v3564_v31 = vadd.f32 %v7178_v36, %v3453_v8  ;;  %v7595_v13 = vpop.f32.mrf.mxu1  ;;  %v7599_v19 = vor.u32 %v3872_v41, %v3869_v37  ;;  %v3811_v43 = vunpack.c.l.b16 %v3774_v7  ;;  %v3342_v41 = vadd.f32 %v7474_v5, %v7566_v59 }
 0x387   : > { %v3455_v45 = vpop.f32.mrf.mxu3 }
 0x388   : > { %v3699_v61 = vsel %vm3642_vm4, %v3564_v31, 0.0  ;;  %v3874_v6 = vsel %vm3839_vm12, %v7570_v51, %v7599_v19  ;;  %v3934_v46 = vpack.c.b16 %v3811_v43, %v3810_v4  ;;  %v3587_v51 = vadd.s32 %v7469_v26, %v6914_v21 }
 0x389   : > { %v3397_v10 = vpop.f32.mrf.mxu2  ;;  %4236 = vmatmul.bf16.gmra.mxu1 %v3874_v6  ;;  %vm3718_vm5 = vcmp.ge.f32.partialorder %v3699_v61, 0.0  ;;  %v3737_v36 = vmul.f32 0.1, %v3699_v61  ;;  %v5080_v17 = vrot.slane %v3699_v61, 6 }
 0x38a   : > { %v3398_v16 = vadd.f32 %v3397_v10, %v3340_v47  ;;  %v3945_v50 = vrot.slane %v3934_v46, 1  ;;  %vm3606_vm9 = vcmp.ge.s32.totalorder %v3587_v51, 0  ;;  %vm3625_vm13 = vcmp.lt.s32.totalorder %v3587_v51, 250  ;;  %v6056_v47 = vld [vmem:[#allocation10 + $0x1e8] sm:$0xff] }
 0x38b   : > { %v3756_v56 = vsel %vm3718_vm5, %v3699_v61, %v3737_v36  ;;  %v7607_v55 = vsel %vm5062_vm11, %v5078_v11, %v5080_v17  ;;  %v6064_v61 = vld [vmem:[#allocation10 + $0x228] sm:$0xff]  ;;  %4940 = vmatpush.bf16.msra.mxu0 %v6056_v47  ;;  %vm3644_vm10 = vmand %vm3606_vm9, %vm3625_vm13 }
 0x38c   : > { %v3456_v60 = vadd.f32 %v3455_v45, %v3398_v16  ;;  %v3946_v52 = vsel %vm638_vm1, %v3943_v23, %v3945_v50  ;;  %v3775_v4 = vpack.c.bf16 %v3756_v56, %v3756_v56  ;;  %v6047_v45 = vld [vmem:[#allocation10 + $0x1a0] sm:$0xff]  ;;  %4993 = vmatpush.bf16.msra.mxu1 %v6064_v61 }
 0x38d   : > { %4290 = vmatmul.bf16.gmra.mxu2 %v3946_v52  ;;  %4888 = vmatpush.bf16.msra.mxu3 %v6047_v45 }
 0x38e   : > { %v3565_v63 = vadd.f32 %v7196_v35, %v3456_v60  ;;  %v7613_v8 = vpop.f32.mrf.mxu1  ;;  %v3812_v37 = vunpack.c.l.b16 %v3775_v4 }
 0x38f   : > { %v3457_v7 = vpop.f32.mrf.mxu3 }
 0x390   : > { %v3700_v11 = vsel %vm3643_vm8, %v3565_v63, 0.0  ;;  %v3825_v31 = vpack.c.b16 %v3812_v37, %v3811_v43  ;;  %v3588_v63 = vadd.s32 %v7469_v26, %v6930_v49 }
 0x391   : > { %vm3719_vm3 = vcmp.ge.f32.partialorder %v3700_v11, 0.0  ;;  %v3738_v23 = vmul.f32 0.1, %v3700_v11  ;;  %v3399_v30 = vpop.f32.mrf.mxu2  ;;  %v5082_v10 = vrot.slane %v3700_v11, 6 }
 0x392   : > { %v3400_v6 = vadd.f32 %v3399_v30, %v3342_v41  ;;  %v3876_v46 = vshrl.u32 %v3825_v31, 16  ;;  %v3879_v35 = vshll.u32 %v3825_v31, 16  ;;  %4192 = vmatmul.bf16.gmra.mxu0 %v3825_v31  ;;  %v3345_v31 = vadd.f32 %v7474_v5, %v7585_v25 }
 0x393   : > { %v3757_v36 = vsel %vm3719_vm3, %v3700_v11, %v3738_v23  ;;  %v7620_v43 = vsel %vm5062_vm11, %v5080_v17, %v5082_v10  ;;  %vm3607_vm15 = vcmp.ge.s32.totalorder %v3588_v63, 0  ;;  %vm3626_vm0 = vcmp.lt.s32.totalorder %v3588_v63, 250 }
 0x394   : > { %v3458_v59 = vadd.f32 %v3457_v7, %v3400_v6  ;;  %v3878_v16 = vrot.slane %v3876_v46, 2  ;;  %v3881_v56 = vrot.slane %v3879_v35, 3  ;;  %v3776_v60 = vpack.c.bf16 %v3757_v36, %v3757_v36  ;;  %vm3645_vm4 = vmand %vm3607_vm15, %vm3626_vm0 }
 0x396   : > { %v3566_v52 = vadd.f32 %v7211_v57, %v3458_v59  ;;  %v7623_v4 = vpop.f32.mrf.mxu1  ;;  %v3882_v41 = vor.u32 %v3881_v56, %v3878_v16  ;;  %v3813_v11 = vunpack.c.l.b16 %v3776_v60  ;;  %v3347_v60 = vadd.f32 %v7474_v5, %v7595_v13 }
 0x397   : > { %v3460_v7 = vpop.f32.mrf.mxu3 }
 0x398   : > { %v3701_v23 = vsel %vm3644_vm10, %v3566_v52, 0.0  ;;  %v3883_v51 = vsel %vm3839_vm12, %v7599_v19, %v3882_v41  ;;  %v3935_v30 = vpack.c.b16 %v3813_v11, %v3812_v37  ;;  %v3589_v19 = vadd.s32 %v7469_v26, %v6935_v15 }
 0x399   : > { %v3402_v17 = vpop.f32.mrf.mxu2  ;;  %4241 = vmatmul.bf16.gmra.mxu1 %v3883_v51  ;;  %vm3720_vm14 = vcmp.ge.f32.partialorder %v3701_v23, 0.0  ;;  %v3739_v57 = vmul.f32 0.1, %v3701_v23  ;;  %v5084_v45 = vrot.slane %v3701_v23, 6 }
 0x39a   : > { %v3403_v47 = vadd.f32 %v3402_v17, %v3345_v31  ;;  %v3947_v61 = vrot.slane %v3935_v30, 1  ;;  %vm3608_vm5 = vcmp.ge.s32.totalorder %v3589_v19, 0  ;;  %v6063_v31 = vld [vmem:[#allocation10 + $0x220] sm:$0xff]  ;;  %vm3627_vm2 = vcmp.lt.s32.totalorder %v3589_v19, 250 }
 0x39b   : > { %v3758_v6 = vsel %vm3720_vm14, %v3701_v23, %v3739_v57  ;;  %v7632_v46 = vsel %vm5062_vm11, %v5082_v10, %v5084_v45  ;;  %4994 = vmatpush.bf16.msra.mxu1 %v6063_v31  ;;  %vm3646_vm8 = vmand %vm3608_vm5, %vm3627_vm2 }
 0x39c   : > { %v3461_v35 = vadd.f32 %v3460_v7, %v3403_v47  ;;  %v3948_v25 = vsel %vm638_vm1, %v3945_v50, %v3947_v61  ;;  %v3777_v37 = vpack.c.bf16 %v3758_v6, %v3758_v6  ;;  %v6055_v7 = vld [vmem:[#allocation10 + $0x1e0] sm:$0xff] }
 0x39d   : > { %4295 = vmatmul.bf16.gmra.mxu2 %v3948_v25  ;;  %4941 = vmatpush.bf16.msra.mxu0 %v6055_v7 }
 0x39e   : > { %v3567_v36 = vadd.f32 %v7231_v62, %v3461_v35  ;;  %v7638_v59 = vpop.f32.mrf.mxu1  ;;  %v3814_v16 = vunpack.c.l.b16 %v3777_v37  ;;  %v3590_v37 = vadd.s32 %v7469_v26, %v6952_v39 }
 0x39f   : > { %v3462_v56 = vpop.f32.mrf.mxu3 }
 0x3a0   : > { %v3702_v10 = vsel %vm3645_vm4, %v3567_v36, 0.0  ;;  %v3826_v52 = vpack.c.b16 %v3814_v16, %v3813_v11  ;;  %vm3609_vm13 = vcmp.ge.s32.totalorder %v3590_v37, 0  ;;  %vm3628_vm3 = vcmp.lt.s32.totalorder %v3590_v37, 250 }
 0x3a1   : > { %vm3721_vm7 = vcmp.ge.f32.partialorder %v3702_v10, 0.0  ;;  %v3740_v50 = vmul.f32 0.1, %v3702_v10  ;;  %v3404_v63 = vpop.f32.mrf.mxu2  ;;  %v5086_v23 = vrot.slane %v3702_v10, 6  ;;  %vm3647_vm10 = vmand %vm3609_vm13, %vm3628_vm3 }
 0x3a2   : > { %v3405_v51 = vadd.f32 %v3404_v63, %v3347_v60  ;;  %v3885_v30 = vshrl.u32 %v3826_v52, 16  ;;  %v3888_v62 = vshll.u32 %v3826_v52, 16  ;;  %4197 = vmatmul.bf16.gmra.mxu0 %v3826_v52  ;;  %v6046_v63 = vld [vmem:[#allocation10 + $0x198] sm:$0xff] }
 0x3a3   : > { %v3759_v17 = vsel %vm3721_vm7, %v3702_v10, %v3740_v50  ;;  %v7643_v57 = vsel %vm5062_vm11, %v5084_v45, %v5086_v23  ;;  %v3350_v45 = vadd.f32 %v7474_v5, %v7613_v8  ;;  %4889 = vmatpush.bf16.msra.mxu3 %v6046_v63 }
 0x3a4   : > { %v3463_v13 = vadd.f32 %v3462_v56, %v3405_v51  ;;  %v3887_v47 = vrot.slane %v3885_v30, 2  ;;  %v3890_v11 = vrot.slane %v3888_v62, 3  ;;  %v3778_v6 = vpack.c.bf16 %v3759_v17, %v3759_v17 }
 0x3a5   : > { %v3591_v17 = vadd.s32 %v7469_v26, %v6957_v3 }
 0x3a6   : > { %v3568_v35 = vadd.f32 %v7245_v54, %v3463_v13  ;;  %v7647_v25 = vpop.f32.mrf.mxu1  ;;  %v7651_v36 = vor.u32 %v3890_v11, %v3887_v47  ;;  %v3815_v60 = vunpack.c.l.b16 %v3778_v6 }
 0x3a7   : > { %v3465_v10 = vpop.f32.mrf.mxu3  ;;  %vm3610_vm15 = vcmp.ge.s32.totalorder %v3591_v17, 0  ;;  %vm3629_vm0 = vcmp.lt.s32.totalorder %v3591_v17, 250 }
 0x3a8   : > { %v3703_v56 = vsel %vm3646_vm8, %v3568_v35, 0.0  ;;  %v3892_v52 = vsel %vm3839_vm12, %v3882_v41, %v7651_v36  ;;  %v3936_v19 = vpack.c.b16 %v3815_v60, %v3814_v16  ;;  %vm3648_vm4 = vmand %vm3610_vm15, %vm3629_vm0 }
 0x3a9   : > { %v3407_v50 = vpop.f32.mrf.mxu2  ;;  %4246 = vmatmul.bf16.gmra.mxu1 %v3892_v52  ;;  %vm3722_vm9 = vcmp.ge.f32.partialorder %v3703_v56, 0.0  ;;  %v3741_v54 = vmul.f32 0.1, %v3703_v56  ;;  %v5088_v7 = vrot.slane %v3703_v56, 6 }
 0x3aa   : > { %v3408_v31 = vadd.f32 %v3407_v50, %v3350_v45  ;;  %v7657_v51 = vrot.slane %v3936_v19, 1 }
 0x3ab   : > { %v3760_v30 = vsel %vm3722_vm9, %v3703_v56, %v3741_v54  ;;  %v7660_v8 = vsel %vm5062_vm11, %v5086_v23, %v5088_v7  ;;  %v3352_v23 = vadd.f32 %v7474_v5, %v7623_v4 }
 0x3ac   : > { %v3466_v62 = vadd.f32 %v3465_v10, %v3408_v31  ;;  %v3950_v41 = vsel %vm638_vm1, %v3947_v61, %v7657_v51  ;;  %v3779_v16 = vpack.c.bf16 %v3760_v30, %v3760_v30  ;;  %v6054_v30 = vld [vmem:[#allocation10 + $0x1d8] sm:$0xff] }
 0x3ad   : > { %4300 = vmatmul.bf16.gmra.mxu2 %v3950_v41  ;;  %v7941_v41 = vld [vmem:[#allocation25_spill] sm:$0xff]  ;;  %4942 = vmatpush.bf16.msra.mxu0 %v6054_v30 }
 0x3ae   : > { %v3569_v13 = vadd.f32 %v7266_v24, %v3466_v62  ;;  %v7667_v47 = vpop.f32.mrf.mxu1  ;;  %v3816_v11 = vunpack.c.l.b16 %v3779_v16  ;;  %v6045_v62 = vld [vmem:[#allocation10 + $0x190] sm:$0xff] }
 0x3af   : > { %v3467_v6 = vpop.f32.mrf.mxu3  ;;  %4890 = vmatpush.bf16.msra.mxu3 %v6045_v62 }
 0x3b0   : > { %v3704_v35 = vsel %vm3647_vm10, %v3569_v13, 0.0  ;;  %v3827_v37 = vpack.c.b16 %v3816_v11, %v3815_v60  ;;  %v6062_v60 = vld [vmem:[#allocation10 + $0x218] sm:$0xff] }
 0x3b1   : > { %vm3723_vm14 = vcmp.ge.f32.partialorder %v3704_v35, 0.0  ;;  %v3742_v10 = vmul.f32 0.1, %v3704_v35  ;;  %v3409_v61 = vpop.f32.mrf.mxu2  ;;  %v5090_v45 = vrot.slane %v3704_v35, 6  ;;  %4995 = vmatpush.bf16.msra.mxu1 %v6062_v60 }
 0x3b2   : > { %v3410_v56 = vadd.f32 %v3409_v61, %v3352_v23  ;;  %v3894_v52 = vshrl.u32 %v3827_v37, 16  ;;  %v3897_v19 = vshll.u32 %v3827_v37, 16  ;;  %4202 = vmatmul.bf16.gmra.mxu0 %v3827_v37  ;;  %v3592_v23 = vadd.s32 %v7469_v26, %v6974_v22 }
 0x3b3   : > { %v3761_v24 = vsel %vm3723_vm14, %v3704_v35, %v3742_v10  ;;  %v7672_v50 = vsel %vm5062_vm11, %v5088_v7, %v5090_v45 }
 0x3b4   : > { %v3468_v54 = vadd.f32 %v3467_v6, %v3410_v56  ;;  %v3896_v63 = vrot.slane %v3894_v52, 2  ;;  %v3899_v31 = vrot.slane %v3897_v19, 3  ;;  %v3780_v4 = vpack.c.bf16 %v3761_v24, %v3761_v24 }
 0x3b5   : > { %v3355_v6 = vadd.f32 %v7474_v5, %v7638_v59  ;;  %vm3611_vm7 = vcmp.ge.s32.totalorder %v3592_v23, 0  ;;  %vm3630_vm2 = vcmp.lt.s32.totalorder %v3592_v23, 250  ;;  %v6053_v23 = vld [vmem:[#allocation10 + $0x1d0] sm:$0xff] }
 0x3b6   : > { %v3570_v16 = vadd.f32 %v7941_v41, %v3468_v54  ;;  %v3361_v13 = vpop.f32.mrf.mxu1  ;;  %v3900_v37 = vor.u32 %v3899_v31, %v3896_v63  ;;  %v3817_v35 = vunpack.c.l.b16 %v3780_v4  ;;  %vm3649_vm8 = vmand %vm3611_vm7, %vm3630_vm2  ;;  %4943 = vmatpush.bf16.msra.mxu0 %v6053_v23 }
 0x3b7   : > { %v3470_v7 = vpop.f32.mrf.mxu3 }
 0x3b8   : > { %v3705_v10 = vsel %vm3648_vm4, %v3570_v16, 0.0  ;;  %v3901_v17 = vsel %vm3839_vm12, %v7651_v36, %v3900_v37  ;;  %v3937_v61 = vpack.c.b16 %v3817_v35, %v3816_v11  ;;  %v3593_v36 = vadd.s32 %v7469_v26, %v6979_v32  ;;  %v7942_v11 = vld [vmem:[#allocation26_spill] sm:$0xff] }
 0x3b9   : > { %v3743_v56 = vmul.f32 0.1, %v3705_v10  ;;  %v3412_v52 = vpop.f32.mrf.mxu2  ;;  %4251 = vmatmul.bf16.gmra.mxu1 %v3901_v17  ;;  %vm3724_vm5 = vcmp.ge.f32.partialorder %v3705_v10, 0.0  ;;  %v5092_v19 = vrot.slane %v3705_v10, 6  ;;  %v3357_v16 = vadd.f32 %v7474_v5, %v7647_v25 }
 0x3ba   : > { %v3413_v24 = vadd.f32 %v3412_v52, %v3355_v6  ;;  %v3951_v54 = vrot.slane %v3937_v61, 1  ;;  %vm3612_vm13 = vcmp.ge.s32.totalorder %v3593_v36, 0  ;;  %vm3631_vm3 = vcmp.lt.s32.totalorder %v3593_v36, 250  ;;  %v6044_v36 = vld [vmem:[#allocation10 + $0x188] sm:$0xff] }
 0x3bb   : > { %v3762_v63 = vsel %vm3724_vm5, %v3705_v10, %v3743_v56  ;;  %v7683_v31 = vsel %vm5062_vm11, %v5090_v45, %v5092_v19  ;;  %vm3650_vm10 = vmand %vm3612_vm13, %vm3631_vm3  ;;  %4891 = vmatpush.bf16.msra.mxu3 %v6044_v36 }
 0x3bc   : > { %v3471_v4 = vadd.f32 %v3470_v7, %v3413_v24  ;;  %v3952_v59 = vsel %vm638_vm1, %v7657_v51, %v3951_v54  ;;  %v3781_v30 = vpack.c.bf16 %v3762_v63, %v3762_v63  ;;  %v6061_v7 = vld [vmem:[#allocation10 + $0x210] sm:$0xff] }
 0x3bd   : > { %4305 = vmatmul.bf16.gmra.mxu2 %v3952_v59  ;;  %4996 = vmatpush.bf16.msra.mxu1 %v6061_v7  ;;  %v7943_v59 = vld [vmem:[#allocation28_spill] sm:$0xff] }
 0x3be   : > { %v3571_v60 = vadd.f32 %v7942_v11, %v3471_v4  ;;  %v3818_v62 = vunpack.c.l.b16 %v3781_v30  ;;  %v3594_v11 = vadd.s32 %v7469_v26, %v6991_v18 }
 0x3bf   : > { %v3472_v41 = vpop.f32.mrf.mxu3 }
 0x3c0   : > { %v3706_v13 = vsel %vm3649_vm8, %v3571_v60, 0.0  ;;  %v3828_v45 = vpack.c.b16 %v3818_v62, %v3817_v35  ;;  %vm3613_vm15 = vcmp.ge.s32.totalorder %v3594_v11, 0  ;;  %vm3632_vm0 = vcmp.lt.s32.totalorder %v3594_v11, 250 }
 0x3c1   : > { %vm3725_vm9 = vcmp.ge.f32.partialorder %v3706_v13, 0.0  ;;  %v3744_v6 = vmul.f32 0.1, %v3706_v13  ;;  %v3414_v51 = vpop.f32.mrf.mxu2  ;;  %v5094_v10 = vrot.slane %v3706_v13, 6  ;;  %vm3651_vm4 = vmand %vm3613_vm15, %vm3632_vm0 }
 0x3c2   : > { %v3415_v17 = vadd.f32 %v3414_v51, %v3357_v16  ;;  %v3903_v61 = vshrl.u32 %v3828_v45, 16  ;;  %v3906_v56 = vshll.u32 %v3828_v45, 16  ;;  %4207 = vmatmul.bf16.gmra.mxu0 %v3828_v45 }
 0x3c3   : > { %v3763_v52 = vsel %vm3725_vm9, %v3706_v13, %v3744_v6  ;;  %v7693_v24 = vsel %vm5062_vm11, %v5092_v19, %v5094_v10  ;;  %v3360_v13 = vadd.f32 %v7474_v5, %v7667_v47 }
 0x3c4   : > { %v3473_v25 = vadd.f32 %v3472_v41, %v3415_v17  ;;  %v3905_v35 = vrot.slane %v3903_v61, 2  ;;  %v3908_v63 = vrot.slane %v3906_v56, 3  ;;  %v3782_v4 = vpack.c.bf16 %v3763_v52, %v3763_v52 }
 0x3c6   : > { %v3572_v30 = vadd.f32 %v7943_v59, %v3473_v25  ;;  %v3909_v60 = vor.u32 %v3908_v63, %v3905_v35  ;;  %v3819_v16 = vunpack.c.l.b16 %v3782_v4 }
 0x3c7   : > { %v3475_v45 = vpop.f32.mrf.mxu3 }
 0x3c8   : > { %v3707_v23 = vsel %vm3650_vm10, %v3572_v30, 0.0  ;;  %v3910_v19 = vsel %vm3839_vm12, %v3900_v37, %v3909_v60  ;;  %v3938_v41 = vpack.c.b16 %v3819_v16, %v3818_v62  ;;  %v7944_v62 = vld [vmem:[#allocation27_spill] sm:$0xff] }
 0x3c9   : > { %v3745_v7 = vmul.f32 0.1, %v3707_v23  ;;  %v3417_v6 = vpop.f32.mrf.mxu2  ;;  %4256 = vmatmul.bf16.gmra.mxu1 %v3910_v19  ;;  %vm3726_vm14 = vcmp.ge.f32.partialorder %v3707_v23, 0.0  ;;  %v5096_v51 = vrot.slane %v3707_v23, 6  ;;  %v7945_v56 = vrot.slane %v7944_v62, 4 }
 0x3ca   : > { %v3418_v17 = vadd.f32 %v3417_v6, %v3360_v13  ;;  %v3953_v18 = vrot.slane %v3938_v41, 1 }
 0x3cb   : > { %v3764_v26 = vsel %vm3726_vm14, %v3707_v23, %v3745_v7  ;;  %v7703_v61 = vsel %vm5062_vm11, %v5094_v10, %v5096_v51 }
 0x3cc   : > { %v3476_v5 = vadd.f32 %v3475_v45, %v3418_v17  ;;  %v3954_v47 = vsel %vm638_vm1, %v3951_v54, %v3953_v18  ;;  %v3783_v37 = vpack.c.bf16 %v3764_v26, %v3764_v26  ;;  %v6052_v17 = vld [vmem:[#allocation10 + $0x1c8] sm:$0xff] }
 0x3cd   : > { %4310 = vmatmul.bf16.gmra.mxu2 %v3954_v47  ;;  %4944 = vmatpush.bf16.msra.mxu0 %v6052_v17 }
 0x3ce   : > { %v3573_v52 = vadd.f32 %v7945_v56, %v3476_v5  ;;  %v3820_v25 = vunpack.c.l.b16 %v3783_v37  ;;  %v6043_v37 = vld [vmem:[#allocation10 + $0x180] sm:$0xff] }
 0x3cf   : > { %v3477_v35 = vpop.f32.mrf.mxu3  ;;  %v4173_v63 = vpop.f32.mrf.mxu0  ;;  %4892 = vmatpush.bf16.msra.mxu3 %v6043_v37 }
 0x3d0   : > { %v3708_v4 = vsel %vm3651_vm4, %v3573_v52, 0.0  ;;  %v3829_v59 = vpack.c.b16 %v3820_v25, %v3819_v16  ;;  %v6060_v16 = vld [vmem:[#allocation10 + $0x208] sm:$0xff]  ;;  %v7710_v52 = vld [vmem:[#allocation8 + $0x2] ss:$0 sm:$0xff] }
 0x3d1   : > { %vm3727_vm5 = vcmp.ge.f32.partialorder %v3708_v4, 0.0  ;;  %v3746_v30 = vmul.f32 0.1, %v3708_v4  ;;  %v3419_v11 = vpop.f32.mrf.mxu2  ;;  %4997 = vmatpush.bf16.msra.mxu1 %v6060_v16 }
 0x3d2   : > { %v3912_v13 = vshrl.u32 %v3829_v59, 16  ;;  %v3915_v10 = vshll.u32 %v3829_v59, 16  ;;  %4212 = vmatmul.bf16.gmra.mxu0 %v3829_v59 }
 0x3d3   : > { %v3765_v45 = vsel %vm3727_vm5, %v3708_v4, %v3746_v30 }
 0x3d4   : > { %v3784_v23 = vpack.c.bf16 %v3765_v45, %v3765_v45  ;;  %v3914_v54 = vrot.slane %v3912_v13, 2  ;;  %v3917_v19 = vrot.slane %v3915_v10, 3  ;;  %v6051_v13 = vld [vmem:[#allocation10 + $0x1c0] sm:$0xff] }
 0x3d5   : > { %v6059_v10 = vld [vmem:[#allocation10 + $0x200] sm:$0xff]  ;;  %4945 = vmatpush.bf16.msra.mxu0 %v6051_v13 }
 0x3d6   : > { %v3918_v41 = vor.u32 %v3917_v19, %v3914_v54  ;;  %v3930_v7 = vunpack.c.l.b16 %v3784_v23  ;;  %4998 = vmatpush.bf16.msra.mxu1 %v6059_v10 }
 0x3d7   : > { %v4175_v6 = vpop.f32.mrf.mxu0 }
 0x3d8   : > { %v3919_v36 = vsel %vm3839_vm12, %v3909_v60, %v3918_v41  ;;  %v3939_v51 = vpack.c.b16 %v3930_v7, %v3820_v25  ;;  %v4174_v60 = vadd.f32 %v7710_v52, %v4173_v63  ;;  %v7714_v25 = vstv %s5819_s18 }
 0x3d9   : > { %4261 = vmatmul.bf16.gmra.mxu1 %v3919_v36  ;;  %v4383_v63 = vadd.s32 %v7714_v25, %v6831_v0  ;;  %v4176_v23 = vadd.f32 %v7710_v52, %v4175_v6 }
 0x3da   : > { %v3955_v26 = vrot.slane %v3939_v51, 1 }
 0x3db   : > { %vm4401_vm8 = vcmp.ge.s32.totalorder %v4383_v63, 0  ;;  %vm4419_vm9 = vcmp.lt.s32.totalorder %v4383_v63, 250 }
 0x3dc   : > { %v3956_v5 = vsel %vm638_vm1, %v3953_v18, %v3955_v26  ;;  %v4382_v18 = vadd.s32 %v7714_v25, %v6824_v58  ;;  %vm4437_vm3 = vmand %vm4401_vm8, %vm4419_vm9 }
 0x3dd   : > { %4315 = vmatmul.bf16.gmra.mxu2 %v3956_v5 }
 0x3de   : > { %vm4400_vm12 = vcmp.ge.s32.totalorder %v4382_v18, 0  ;;  %vm4418_vm7 = vcmp.lt.s32.totalorder %v4382_v18, 250 }
 0x3df   : > { %v4178_v47 = vpop.f32.mrf.mxu0  ;;  %vm4436_vm2 = vmand %vm4400_vm12, %vm4418_vm7 }
 0x3e0   : > { %v4179_v16 = vadd.f32 %v7710_v52, %v4178_v47  ;;  %v4385_v47 = vadd.s32 %v7714_v25, %v6843_v28 }
 0x3e2   : > { %vm4403_vm4 = vcmp.ge.s32.totalorder %v4385_v47, 0  ;;  %vm4421_vm5 = vcmp.lt.s32.totalorder %v4385_v47, 250 }
 0x3e3   : > { %vm4439_vm12 = vmand %vm4403_vm4, %vm4421_vm5 }
 0x3e6   : > { %v4227_v62 = vpop.f32.mrf.mxu1 }
 0x3e7   : > { %v4180_v56 = vpop.f32.mrf.mxu0  ;;  %v4228_v4 = vadd.f32 %v4227_v62, %v4174_v60 }
 0x3e9   : > { %4266 = vmatmul.bf16.gmra.mxu1 %v3918_v41 }
 0x3ed   : > { %4320 = vmatmul.bf16.gmra.mxu2 %v3955_v26 }
 0x3ee   : > { %v4229_v35 = vpop.f32.mrf.mxu1 }
 0x3ef   : > { %v4183_v59 = vpop.f32.mrf.mxu0  ;;  %v4230_v19 = vadd.f32 %v4229_v35, %v4176_v23  ;;  %v4384_v35 = vadd.s32 %v7714_v25, %v6838_v42 }
 0x3f0   : > { %v4281_v30 = vpop.f32.mrf.mxu2 }
 0x3f1   : > { %v4282_v11 = vadd.f32 %v4281_v30, %v4228_v4  ;;  %vm4402_vm14 = vcmp.ge.s32.totalorder %v4384_v35, 0  ;;  %vm4420_vm15 = vcmp.lt.s32.totalorder %v4384_v35, 250 }
 0x3f2   : > { %vm4438_vm0 = vmand %vm4402_vm14, %vm4420_vm15 }
 0x3f3   : > { %v4344_v45 = vmul.f32 0.1, %v4282_v11  ;;  %vm4326_vm11 = vcmp.ge.f32.partialorder %v4282_v11, 0.0 }
 0x3f5   : > { %v4362_v41 = vsel %vm4326_vm11, %v4282_v11, %v4344_v45  ;;  %v4181_v45 = vadd.f32 %v7710_v52, %v4180_v56 }
 0x3f6   : > { %v4232_v54 = vpop.f32.mrf.mxu1  ;;  %v4490_v51 = vsel %vm4436_vm2, %v4362_v41, 0.0 }
 0x3f7   : > { %v4185_v58 = vpop.f32.mrf.mxu0  ;;  %v4508_v26 = vpack.c.bf16 %v4490_v51, %v4490_v51  ;;  %v4233_v6 = vadd.f32 %v4232_v54, %v4179_v16 }
 0x3f8   : > { %v4283_v7 = vpop.f32.mrf.mxu2  ;;  %v4186_v47 = vadd.f32 %v7710_v52, %v4185_v58 }
 0x3f9   : > { %v4284_v36 = vadd.f32 %v4283_v7, %v4230_v19  ;;  %v4543_v4 = vunpack.c.l.b16 %v4508_v26 }
 0x3fb   : > { %vm4327_vm13 = vcmp.ge.f32.partialorder %v4284_v36, 0.0  ;;  %v4345_v17 = vmul.f32 0.1, %v4284_v36 }
 0x3fd   : > { %v4363_v5 = vsel %vm4327_vm13, %v4284_v36, %v4345_v17  ;;  %v4184_v36 = vadd.f32 %v7710_v52, %v4183_v59 }
 0x3fe   : > { %v4491_v0 = vsel %vm4437_vm3, %v4363_v5, 0.0  ;;  %v4234_v37 = vpop.f32.mrf.mxu1 }
 0x3ff   : > { %v4509_v62 = vpack.c.bf16 %v4491_v0, %v4491_v0  ;;  %v7724_v13 = vpop.f32.mrf.mxu0  ;;  %v4235_v23 = vadd.f32 %v4234_v37, %v4181_v45  ;;  %v4386_v37 = vadd.s32 %v7714_v25, %v6850_v53 }
 0x400   : > { %v4286_v60 = vpop.f32.mrf.mxu2 }
 0x401   : > { %v4544_v30 = vunpack.c.l.b16 %v4509_v62  ;;  %v4287_v18 = vadd.f32 %v4286_v60, %v4233_v6  ;;  %vm4404_vm7 = vcmp.ge.s32.totalorder %v4386_v37, 0  ;;  %vm4422_vm8 = vcmp.lt.s32.totalorder %v4386_v37, 250 }
 0x402   : > { %vm4440_vm9 = vmand %vm4404_vm7, %vm4422_vm8 }
 0x403   : > { %v4560_v11 = vpack.c.b16 %v4544_v30, %v4543_v4  ;;  %v4346_v10 = vmul.f32 0.1, %v4287_v18  ;;  %vm4328_vm10 = vcmp.ge.f32.partialorder %v4287_v18, 0.0 }
 0x405   : > { %4893 = vmatmul.bf16.vlgmr.msra.gmra.mxu3 %v4560_v11  ;;  %v4364_v54 = vsel %vm4328_vm10, %v4287_v18, %v4346_v10  ;;  %v4584_v26 = vshll.u32 %v4560_v11, 16  ;;  %v4387_v18 = vadd.s32 %v7714_v25, %v6855_v2  ;;  %v4582_v10 = vshrl.u32 %v4560_v11, 16 }
 0x406   : > { %v4237_v63 = vpop.f32.mrf.mxu1  ;;  %v4492_v41 = vsel %vm4438_vm0, %v4364_v54, 0.0  ;;  %v4661_v45 = vrot.slane %v4560_v11, 1 }
 0x407   : > { %v4510_v51 = vpack.c.bf16 %v4492_v41, %v4492_v41  ;;  %v7730_v17 = vpop.f32.mrf.mxu0  ;;  %v4238_v5 = vadd.f32 %v4237_v63, %v4184_v36  ;;  %v4586_v4 = vrot.slane %v4584_v26, 1  ;;  %vm4405_vm13 = vcmp.ge.s32.totalorder %v4387_v18, 0 }
 0x408   : > { %v4288_v42 = vpop.f32.mrf.mxu2  ;;  %vm4423_vm3 = vcmp.lt.s32.totalorder %v4387_v18, 250 }
 0x409   : > { %v4289_v19 = vadd.f32 %v4288_v42, %v4235_v23  ;;  %v4545_v62 = vunpack.c.l.b16 %v4510_v51  ;;  %v4587_v54 = vor.u32 %v4586_v4, %v4582_v10  ;;  %vm4441_vm14 = vmand %vm4405_vm13, %vm4423_vm3 }
 0x40b   : > { %vm4329_vm11 = vcmp.ge.f32.partialorder %v4289_v19, 0.0  ;;  %v4347_v7 = vmul.f32 0.1, %v4289_v19 }
 0x40d   : > { %v4365_v28 = vsel %vm4329_vm11, %v4289_v19, %v4347_v7 }
 0x40e   : > { %v4493_v56 = vsel %vm4439_vm12, %v4365_v28, 0.0  ;;  %v4239_v16 = vpop.f32.mrf.mxu1 }
 0x40f   : > { %v4511_v0 = vpack.c.bf16 %v4493_v56, %v4493_v56  ;;  %v4240_v42 = vadd.f32 %v4239_v16, %v4186_v47  ;;  %v4193_v19 = vpop.f32.mrf.mxu0  ;;  %v4189_v56 = vadd.f32 %v7710_v52, %v7724_v13  ;;  %v4389_v13 = vadd.s32 %v7714_v25, %v6874_v48 }
 0x410   : > { %v4291_v6 = vpop.f32.mrf.mxu2 }
 0x411   : > { %v4546_v60 = vunpack.c.l.b16 %v4511_v0  ;;  %v4292_v35 = vadd.f32 %v4291_v6, %v4238_v5  ;;  %vm4407_vm11 = vcmp.ge.s32.totalorder %v4389_v13, 0  ;;  %vm4425_vm12 = vcmp.lt.s32.totalorder %v4389_v13, 250 }
 0x413   : > { %v4348_v30 = vmul.f32 0.1, %v4292_v35  ;;  %v4561_v59 = vpack.c.b16 %v4546_v60, %v4545_v62  ;;  %vm4330_vm2 = vcmp.ge.f32.partialorder %v4292_v35, 0.0  ;;  %v4388_v62 = vadd.s32 %v7714_v25, %v6869_v38 }
 0x415   : > { %4898 = vmatmul.bf16.gmra.mxu3 %v4561_v59  ;;  %v4662_v63 = vrot.slane %v4561_v59, 1  ;;  %v4589_v53 = vshll.u32 %v4561_v59, 16  ;;  %v4366_v41 = vsel %vm4330_vm2, %v4292_v35, %v4348_v30  ;;  %vm4406_vm15 = vcmp.ge.s32.totalorder %v4388_v62, 0  ;;  %vm4443_vm2 = vmand %vm4407_vm11, %vm4425_vm12 }
 0x416   : > { %v4242_v23 = vpop.f32.mrf.mxu1  ;;  %v4494_v11 = vsel %vm4440_vm9, %v4366_v41, 0.0  ;;  %vm4424_vm4 = vcmp.lt.s32.totalorder %v4388_v62, 250 }
 0x417   : > { %v4663_v7 = vsel %vm638_vm1, %v4661_v45, %v4662_v63  ;;  %v4591_v36 = vrot.slane %v4589_v53, 1  ;;  %v4512_v16 = vpack.c.bf16 %v4494_v11, %v4494_v11  ;;  %v4243_v37 = vadd.f32 %v4242_v23, %v4189_v56  ;;  %v4195_v4 = vpop.f32.mrf.mxu0  ;;  %vm4442_vm5 = vmand %vm4406_vm15, %vm4424_vm4 }
 0x418   : > { %v4293_v51 = vpop.f32.mrf.mxu2  ;;  %4999 = vmatmul.bf16.vlgmr.msra.gmra.mxu1 %v4663_v7  ;;  %v4593_v45 = vshrl.u32 %v4561_v59, 16  ;;  %v4191_v53 = vadd.f32 %v7710_v52, %v7730_v17  ;;  %v4196_v13 = vadd.f32 %v7710_v52, %v4195_v4 }
 0x419   : > { %v4294_v2 = vadd.f32 %v4293_v51, %v4240_v42  ;;  %v4592_v58 = vsel %vm548_vm6, %v4587_v54, %v4591_v36  ;;  %v4547_v35 = vunpack.c.l.b16 %v4512_v16 }
 0x41a   : > { %4946 = vmatmul.bf16.vlgmr.msra.gmra.mxu0 %v4592_v58  ;;  %v4595_v42 = vor.u32 %v4593_v45, %v4591_v36  ;;  %v4194_v36 = vadd.f32 %v7710_v52, %v4193_v19  ;;  %v4391_v19 = vadd.s32 %v7714_v25, %v6894_v33 }
 0x41b   : > { %vm4331_vm10 = vcmp.ge.f32.partialorder %v4294_v2, 0.0  ;;  %v4349_v28 = vmul.f32 0.1, %v4294_v2 }
 0x41d   : > { %v4367_v26 = vsel %vm4331_vm10, %v4294_v2, %v4349_v28  ;;  %vm4409_vm10 = vcmp.ge.s32.totalorder %v4391_v19, 0 }
 0x41e   : > { %v4495_v5 = vsel %vm4441_vm14, %v4367_v26, 0.0  ;;  %v4244_v0 = vpop.f32.mrf.mxu1  ;;  %vm4427_vm14 = vcmp.lt.s32.totalorder %v4391_v19, 250 }
 0x41f   : > { %v4513_v6 = vpack.c.bf16 %v4495_v5, %v4495_v5  ;;  %v4245_v41 = vadd.f32 %v4244_v0, %v4191_v53  ;;  %v4198_v17 = vpop.f32.mrf.mxu0 }
 0x420   : > { %v4296_v60 = vpop.f32.mrf.mxu2 }
 0x421   : > { %v4548_v30 = vunpack.c.l.b16 %v4513_v6  ;;  %v4297_v18 = vadd.f32 %v4296_v60, %v4243_v37  ;;  %v4390_v37 = vadd.s32 %v7714_v25, %v6889_v14 }
 0x423   : > { %v4350_v10 = vmul.f32 0.1, %v4297_v18  ;;  %v4562_v47 = vpack.c.b16 %v4548_v30, %v4547_v35  ;;  %vm4332_vm0 = vcmp.ge.f32.partialorder %v4297_v18, 0.0  ;;  %vm4408_vm8 = vcmp.ge.s32.totalorder %v4390_v37, 0 }
 0x424   : > { %vm4426_vm13 = vcmp.lt.s32.totalorder %v4390_v37, 250 }
 0x425   : > { %4903 = vmatmul.bf16.gmra.mxu3 %v4562_v47  ;;  %v4664_v23 = vrot.slane %v4562_v47, 1  ;;  %v4597_v38 = vshll.u32 %v4562_v47, 16  ;;  %v4368_v7 = vsel %vm4332_vm0, %v4297_v18, %v4350_v10  ;;  %v4601_v10 = vshrl.u32 %v4562_v47, 16  ;;  %vm4444_vm3 = vmand %vm4408_vm8, %vm4426_vm13 }
 0x426   : > { %v4247_v54 = vpop.f32.mrf.mxu1  ;;  %v4496_v11 = vsel %vm4442_vm5, %v4368_v7, 0.0  ;;  %vm4445_vm0 = vmand %vm4409_vm10, %vm4427_vm14 }
 0x427   : > { %v4665_v51 = vsel %vm638_vm1, %v4662_v63, %v4664_v23  ;;  %v4599_v2 = vrot.slane %v4597_v38, 1  ;;  %v4514_v56 = vpack.c.bf16 %v4496_v11, %v4496_v11  ;;  %v4248_v5 = vadd.f32 %v4247_v54, %v4194_v36  ;;  %v4200_v45 = vpop.f32.mrf.mxu0 }
 0x428   : > { %v4298_v58 = vpop.f32.mrf.mxu2  ;;  %5004 = vmatmul.bf16.gmra.mxu1 %v4665_v51 }
 0x429   : > { %v4299_v48 = vadd.f32 %v4298_v58, %v4245_v41  ;;  %v4600_v59 = vsel %vm548_vm6, %v4595_v42, %v4599_v2  ;;  %v4549_v62 = vunpack.c.l.b16 %v4514_v56  ;;  %v4603_v54 = vor.u32 %v4601_v10, %v4599_v2 }
 0x42a   : > { %4951 = vmatmul.bf16.gmra.mxu0 %v4600_v59  ;;  %v4199_v2 = vadd.f32 %v7710_v52, %v4198_v17  ;;  %v4393_v17 = vadd.s32 %v7714_v25, %v6914_v21 }
 0x42b   : > { %vm4333_vm7 = vcmp.ge.f32.partialorder %v4299_v48, 0.0  ;;  %v4351_v28 = vmul.f32 0.1, %v4299_v48 }
 0x42d   : > { %v4369_v16 = vsel %vm4333_vm7, %v4299_v48, %v4351_v28  ;;  %vm4411_vm7 = vcmp.ge.s32.totalorder %v4393_v17, 0 }
 0x42e   : > { %v4497_v26 = vsel %vm4443_vm2, %v4369_v16, 0.0  ;;  %v4249_v63 = vpop.f32.mrf.mxu1  ;;  %vm4429_vm2 = vcmp.lt.s32.totalorder %v4393_v17, 250 }
 0x42f   : > { %v4515_v0 = vpack.c.bf16 %v4497_v26, %v4497_v26  ;;  %v4250_v42 = vadd.f32 %v4249_v63, %v4196_v13  ;;  %v4392_v26 = vadd.s32 %v7714_v25, %v6909_v1 }
 0x430   : > { %v4301_v6 = vpop.f32.mrf.mxu2 }
 0x431   : > { %v4550_v60 = vunpack.c.l.b16 %v4515_v0  ;;  %v4302_v35 = vadd.f32 %v4301_v6, %v4248_v5  ;;  %vm4410_vm4 = vcmp.ge.s32.totalorder %v4392_v26, 0  ;;  %vm4428_vm11 = vcmp.lt.s32.totalorder %v4392_v26, 250 }
 0x432   : > { %vm4446_vm12 = vmand %vm4410_vm4, %vm4428_vm11 }
 0x433   : > { %v4352_v30 = vmul.f32 0.1, %v4302_v35  ;;  %v4563_v18 = vpack.c.b16 %v4550_v60, %v4549_v62  ;;  %vm4334_vm9 = vcmp.ge.f32.partialorder %v4302_v35, 0.0 }
 0x435   : > { %4908 = vmatmul.bf16.gmra.mxu3 %v4563_v18  ;;  %v4666_v53 = vrot.slane %v4563_v18, 1  ;;  %v4605_v38 = vshll.u32 %v4563_v18, 16  ;;  %v4370_v41 = vsel %vm4334_vm9, %v4302_v35, %v4352_v30  ;;  %v4609_v60 = vshrl.u32 %v4563_v18, 16  ;;  %vm4447_vm9 = vmand %vm4411_vm7, %vm4429_vm2 }
 0x436   : > { %v4252_v14 = vpop.f32.mrf.mxu1  ;;  %v4498_v47 = vsel %vm4444_vm3, %v4370_v41, 0.0  ;;  %v4201_v35 = vadd.f32 %v7710_v52, %v4200_v45 }
 0x437   : > { %v4667_v7 = vsel %vm638_vm1, %v4664_v23, %v4666_v53  ;;  %v4607_v51 = vrot.slane %v4605_v38, 1  ;;  %v4516_v59 = vpack.c.bf16 %v4498_v47, %v4498_v47  ;;  %v4203_v23 = vpop.f32.mrf.mxu0  ;;  %v4253_v56 = vadd.f32 %v4252_v14, %v4199_v2 }
 0x438   : > { %v4303_v58 = vpop.f32.mrf.mxu2  ;;  %5009 = vmatmul.bf16.gmra.mxu1 %v4667_v7  ;;  %v4394_v2 = vadd.s32 %v7714_v25, %v6930_v49 }
 0x439   : > { %v4304_v33 = vadd.f32 %v4303_v58, %v4250_v42  ;;  %v4608_v4 = vsel %vm548_vm6, %v4603_v54, %v4607_v51  ;;  %v4551_v5 = vunpack.c.l.b16 %v4516_v59  ;;  %v4611_v1 = vor.u32 %v4609_v60, %v4607_v51 }
 0x43a   : > { %4956 = vmatmul.bf16.gmra.mxu0 %v4608_v4  ;;  %v4204_v51 = vadd.f32 %v7710_v52, %v4203_v23  ;;  %vm4412_vm13 = vcmp.ge.s32.totalorder %v4394_v2, 0  ;;  %vm4430_vm10 = vcmp.lt.s32.totalorder %v4394_v2, 250  ;;  %v4395_v23 = vadd.s32 %v7714_v25, %v6935_v15 }
 0x43b   : > { %vm4335_vm15 = vcmp.ge.f32.partialorder %v4304_v33, 0.0  ;;  %v4353_v48 = vmul.f32 0.1, %v4304_v33  ;;  %vm4448_vm14 = vmand %vm4412_vm13, %vm4430_vm10 }
 0x43d   : > { %v4371_v11 = vsel %vm4335_vm15, %v4304_v33, %v4353_v48  ;;  %vm4413_vm15 = vcmp.ge.s32.totalorder %v4395_v23, 0 }
 0x43e   : > { %v4499_v28 = vsel %vm4445_vm0, %v4371_v11, 0.0  ;;  %v4254_v36 = vpop.f32.mrf.mxu1  ;;  %vm4431_vm0 = vcmp.lt.s32.totalorder %v4395_v23, 250 }
 0x43f   : > { %v4517_v16 = vpack.c.bf16 %v4499_v28, %v4499_v28  ;;  %v4255_v13 = vadd.f32 %v4254_v36, %v4201_v35  ;;  %v4205_v41 = vpop.f32.mrf.mxu0 }
 0x440   : > { %v4306_v63 = vpop.f32.mrf.mxu2 }
 0x441   : > { %v4552_v0 = vunpack.c.l.b16 %v4517_v16  ;;  %v4307_v37 = vadd.f32 %v4306_v63, %v4253_v56 }
 0x443   : > { %v4354_v6 = vmul.f32 0.1, %v4307_v37  ;;  %v4564_v62 = vpack.c.b16 %v4552_v0, %v4551_v5  ;;  %vm4336_vm5 = vcmp.ge.f32.partialorder %v4307_v37, 0.0  ;;  %v4206_v5 = vadd.f32 %v7710_v52, %v4205_v41 }
 0x445   : > { %4913 = vmatmul.bf16.gmra.mxu3 %v4564_v62  ;;  %v4668_v30 = vrot.slane %v4564_v62, 1  ;;  %v4613_v19 = vshll.u32 %v4564_v62, 16  ;;  %v4372_v38 = vsel %vm4336_vm5, %v4307_v37, %v4354_v6  ;;  %v4617_v63 = vshrl.u32 %v4564_v62, 16  ;;  %vm4449_vm5 = vmand %vm4413_vm15, %vm4431_vm0 }
 0x446   : > { %v4257_v10 = vpop.f32.mrf.mxu1  ;;  %v4500_v45 = vsel %vm4446_vm12, %v4372_v38, 0.0 }
 0x447   : > { %v4669_v14 = vsel %vm638_vm1, %v4666_v53, %v4668_v30  ;;  %v4615_v54 = vrot.slane %v4613_v19, 1  ;;  %v4518_v58 = vpack.c.bf16 %v4500_v45, %v4500_v45  ;;  %v4258_v47 = vadd.f32 %v4257_v10, %v4204_v51  ;;  %v4208_v56 = vpop.f32.mrf.mxu0 }
 0x448   : > { %v4308_v42 = vpop.f32.mrf.mxu2  ;;  %5014 = vmatmul.bf16.gmra.mxu1 %v4669_v14  ;;  %v4209_v38 = vadd.f32 %v7710_v52, %v4208_v56 }
 0x449   : > { %v4309_v21 = vadd.f32 %v4308_v42, %v4255_v13  ;;  %v4616_v18 = vsel %vm548_vm6, %v4611_v1, %v4615_v54  ;;  %v4553_v11 = vunpack.c.l.b16 %v4518_v58  ;;  %v4619_v6 = vor.u32 %v4617_v63, %v4615_v54 }
 0x44a   : > { %4961 = vmatmul.bf16.gmra.mxu0 %v4616_v18  ;;  %v4396_v18 = vadd.s32 %v7714_v25, %v6952_v39 }
 0x44b   : > { %vm4337_vm8 = vcmp.ge.f32.partialorder %v4309_v21, 0.0  ;;  %v4355_v7 = vmul.f32 0.1, %v4309_v21 }
 0x44c   : > { %vm4414_vm11 = vcmp.ge.s32.totalorder %v4396_v18, 0  ;;  %vm4432_vm7 = vcmp.lt.s32.totalorder %v4396_v18, 250 }
 0x44d   : > { %v4373_v33 = vsel %vm4337_vm8, %v4309_v21, %v4355_v7  ;;  %vm4450_vm2 = vmand %vm4414_vm11, %vm4432_vm7 }
 0x44e   : > { %v4501_v4 = vsel %vm4447_vm9, %v4373_v33, 0.0  ;;  %v4259_v53 = vpop.f32.mrf.mxu1 }
 0x44f   : > { %v4519_v48 = vpack.c.bf16 %v4501_v4, %v4501_v4  ;;  %v4260_v17 = vadd.f32 %v4259_v53, %v4206_v5  ;;  %v4210_v14 = vpop.f32.mrf.mxu0 }
 0x450   : > { %v4311_v59 = vpop.f32.mrf.mxu2  ;;  %v4211_v2 = vadd.f32 %v7710_v52, %v4210_v14 }
 0x451   : > { %v4554_v28 = vunpack.c.l.b16 %v4519_v48  ;;  %v4312_v36 = vadd.f32 %v4311_v59, %v4258_v47  ;;  %v4397_v47 = vadd.s32 %v7714_v25, %v6957_v3 }
 0x453   : > { %v4356_v16 = vmul.f32 0.1, %v4312_v36  ;;  %v4565_v26 = vpack.c.b16 %v4554_v28, %v4553_v11  ;;  %vm4338_vm3 = vcmp.ge.f32.partialorder %v4312_v36, 0.0  ;;  %vm4415_vm8 = vcmp.ge.s32.totalorder %v4397_v47, 0 }
 0x454   : > { %vm4433_vm9 = vcmp.lt.s32.totalorder %v4397_v47, 250 }
 0x455   : > { %4918 = vmatmul.bf16.gmra.mxu3 %v4565_v26  ;;  %v4670_v0 = vrot.slane %v4565_v26, 1  ;;  %v4621_v37 = vshll.u32 %v4565_v26, 16  ;;  %v4374_v60 = vsel %vm4338_vm3, %v4312_v36, %v4356_v16  ;;  %v4625_v48 = vshrl.u32 %v4565_v26, 16  ;;  %vm4451_vm3 = vmand %vm4415_vm8, %vm4433_vm9 }
 0x456   : > { %v4262_v49 = vpop.f32.mrf.mxu1  ;;  %v4502_v62 = vsel %vm4448_vm14, %v4374_v60, 0.0 }
 0x457   : > { %v4671_v35 = vsel %vm638_vm1, %v4668_v30, %v4670_v0  ;;  %v4623_v19 = vrot.slane %v4621_v37, 1  ;;  %v4520_v54 = vpack.c.bf16 %v4502_v62, %v4502_v62  ;;  %v4263_v30 = vadd.f32 %v4262_v49, %v4209_v38  ;;  %v4213_v28 = vpop.f32.mrf.mxu0 }
 0x458   : > { %v4313_v10 = vpop.f32.mrf.mxu2  ;;  %5019 = vmatmul.bf16.gmra.mxu1 %v4671_v35 }
 0x459   : > { %v4314_v1 = vadd.f32 %v4313_v10, %v4260_v17  ;;  %v4624_v15 = vsel %vm548_vm6, %v4619_v6, %v4623_v19  ;;  %v4555_v51 = vunpack.c.l.b16 %v4520_v54  ;;  %v4627_v39 = vor.u32 %v4625_v48, %v4623_v19 }
 0x45a   : > { %4966 = vmatmul.bf16.gmra.mxu0 %v4624_v15  ;;  %v4214_v6 = vadd.f32 %v7710_v52, %v4213_v28 }
 0x45b   : > { %vm4339_vm4 = vcmp.ge.f32.partialorder %v4314_v1, 0.0  ;;  %v4357_v13 = vmul.f32 0.1, %v4314_v1 }
 0x45d   : > { %v4375_v42 = vsel %vm4339_vm4, %v4314_v1, %v4357_v13 }
 0x45e   : > { %v4503_v41 = vsel %vm4449_vm5, %v4375_v42, 0.0  ;;  %v4264_v45 = vpop.f32.mrf.mxu1 }
 0x45f   : > { %v4521_v21 = vpack.c.bf16 %v4503_v41, %v4503_v41  ;;  %v4265_v36 = vadd.f32 %v4264_v45, %v4211_v2  ;;  %v4215_v15 = vpop.f32.mrf.mxu0 }
 0x460   : > { %v4316_v7 = vpop.f32.mrf.mxu2  ;;  %v4216_v42 = vadd.f32 %v7710_v52, %v4215_v15 }
 0x461   : > { %v4556_v58 = vunpack.c.l.b16 %v4521_v21  ;;  %v4317_v33 = vadd.f32 %v4316_v7, %v4263_v30  ;;  %v4399_v30 = vadd.s32 %v7714_v25, %v6979_v32 }
 0x463   : > { %v4358_v4 = vmul.f32 0.1, %v4317_v33  ;;  %v4566_v53 = vpack.c.b16 %v4556_v58, %v4555_v51  ;;  %vm4340_vm12 = vcmp.ge.f32.partialorder %v4317_v33, 0.0  ;;  %vm4417_vm4 = vcmp.ge.s32.totalorder %v4399_v30, 0 }
 0x464   : > { %vm4435_vm5 = vcmp.lt.s32.totalorder %v4399_v30, 250 }
 0x465   : > { %4923 = vmatmul.bf16.gmra.mxu3 %v4566_v53  ;;  %v4672_v59 = vrot.slane %v4566_v53, 1  ;;  %v4629_v11 = vshll.u32 %v4566_v53, 16  ;;  %v4376_v56 = vsel %vm4340_vm12, %v4317_v33, %v4358_v4  ;;  %v4633_v18 = vshrl.u32 %v4566_v53, 16  ;;  %vm4453_vm12 = vmand %vm4417_vm4, %vm4435_vm5 }
 0x466   : > { %v4504_v26 = vsel %vm4450_vm2, %v4376_v56, 0.0  ;;  %v4267_v37 = vpop.f32.mrf.mxu1 }
 0x467   : > { %v4673_v16 = vsel %vm638_vm1, %v4670_v0, %v4672_v59  ;;  %v4631_v23 = vrot.slane %v4629_v11, 1  ;;  %v4522_v17 = vpack.c.bf16 %v4504_v26, %v4504_v26  ;;  %v4398_v0 = vadd.s32 %v7714_v25, %v6974_v22 }
 0x468   : > { %v4318_v63 = vpop.f32.mrf.mxu2  ;;  %5024 = vmatmul.bf16.gmra.mxu1 %v4673_v16  ;;  %v4268_v19 = vadd.f32 %v4267_v37, %v4214_v6  ;;  %v7796_v6 = vld [vmem:[%s7903_s5 + $0x2] ss:$0 sm:$0xff] }
 0x469   : > { %v4319_v5 = vadd.f32 %v4318_v63, %v4265_v36  ;;  %v4632_v3 = vsel %vm548_vm6, %v4627_v39, %v4631_v23  ;;  %v4557_v62 = vunpack.c.l.b16 %v4522_v17  ;;  %vm4416_vm10 = vcmp.ge.s32.totalorder %v4398_v0, 0 }
 0x46a   : > { %4971 = vmatmul.bf16.gmra.mxu0 %v4632_v3  ;;  %vm4434_vm14 = vcmp.lt.s32.totalorder %v4398_v0, 250  ;;  %v4635_v58 = vor.u32 %v4633_v18, %v4631_v23 }
 0x46b   : > { %vm4341_vm13 = vcmp.ge.f32.partialorder %v4319_v5, 0.0  ;;  %v4359_v49 = vmul.f32 0.1, %v4319_v5  ;;  %vm4452_vm0 = vmand %vm4416_vm10, %vm4434_vm14 }
 0x46d   : > { %v4377_v60 = vsel %vm4341_vm13, %v4319_v5, %v4359_v49 }
 0x46e   : > { %v4505_v35 = vsel %vm4451_vm3, %v4377_v60, 0.0  ;;  %v4269_v41 = vpop.f32.mrf.mxu1 }
 0x46f   : > { %v4523_v10 = vpack.c.bf16 %v4505_v35, %v4505_v35  ;;  %v4270_v7 = vadd.f32 %v4269_v41, %v4216_v42 }
 0x470   : > { %v4321_v1 = vpop.f32.mrf.mxu2 }
 0x471   : > { %v4558_v13 = vunpack.c.l.b16 %v4523_v10  ;;  %v4322_v38 = vadd.f32 %v4321_v1, %v4268_v19 }
 0x473   : > { %vm4342_vm15 = vcmp.ge.f32.partialorder %v4322_v38, 0.0  ;;  %v4360_v14 = vmul.f32 0.1, %v4322_v38  ;;  %v4567_v54 = vpack.c.b16 %v4558_v13, %v4557_v62 }
 0x475   : > { %v4378_v21 = vsel %vm4342_vm15, %v4322_v38, %v4360_v14  ;;  %4928 = vmatmul.bf16.gmra.mxu3 %v4567_v54  ;;  %v4674_v22 = vrot.slane %v4567_v54, 1  ;;  %v4637_v45 = vshll.u32 %v4567_v54, 16  ;;  %v4641_v16 = vshrl.u32 %v4567_v54, 16 }
 0x476   : > { %v4506_v4 = vsel %vm4452_vm0, %v4378_v21, 0.0 }
 0x477   : > { %v4675_v51 = vsel %vm638_vm1, %v4672_v59, %v4674_v22  ;;  %v4639_v33 = vrot.slane %v4637_v45, 1  ;;  %v4524_v32 = vpack.c.bf16 %v4506_v4, %v4506_v4 }
 0x478   : > { %v4323_v47 = vpop.f32.mrf.mxu2  ;;  %5029 = vmatmul.bf16.gmra.mxu1 %v4675_v51 }
 0x479   : > { %v4324_v52 = vadd.f32 %v4323_v47, %v4270_v7  ;;  %v4640_v48 = vsel %vm548_vm6, %v4635_v58, %v4639_v33  ;;  %v4559_v39 = vunpack.c.l.b16 %v4524_v32  ;;  %v4643_v5 = vor.u32 %v4641_v16, %v4639_v33 }
 0x47a   : > { %4976 = vmatmul.bf16.gmra.mxu0 %v4640_v48 }
 0x47b   : > { %vm4343_vm11 = vcmp.ge.f32.partialorder %v4324_v52, 0.0  ;;  %v4361_v25 = vmul.f32 0.1, %v4324_v52  ;;  %v4568_v28 = vpack.c.b16 %v4559_v39, %v4559_v39 }
 0x47d   : > { %v4379_v53 = vsel %vm4343_vm11, %v4324_v52, %v4361_v25 }
 0x47e   : > { %v4507_v2 = vsel %vm4453_vm12, %v4379_v53, 0.0 }
 0x47f   : > { %v4525_v11 = vpack.c.bf16 %v4507_v2, %v4507_v2 }
 0x481   : > { %v4579_v59 = vunpack.c.l.b16 %v4525_v11 }
 0x483   : > { %v4580_v36 = vpack.c.b16 %v4579_v59, %v4559_v39 }
 0x485   : > { %4933 = vmatmul.bf16.gmra.mxu3 %v4568_v28  ;;  %v4676_v56 = vrot.slane %v4580_v36, 1  ;;  %v4645_v23 = vshll.u32 %v4580_v36, 16  ;;  %v4649_v35 = vshrl.u32 %v4580_v36, 16 }
 0x487   : > { %v4677_v63 = vsel %vm638_vm1, %v4674_v22, %v4676_v56  ;;  %v4647_v3 = vrot.slane %v4645_v23, 1 }
 0x488   : > { %v4894_v26 = vpop.f32.mrf.mxu3  ;;  %5034 = vmatmul.bf16.gmra.mxu1 %v4677_v63 }
 0x489   : > { %v4648_v37 = vsel %vm548_vm6, %v4643_v5, %v4647_v3  ;;  %v4895_v60 = vadd.f32 %v7796_v6, %v4894_v26  ;;  %v4651_v1 = vor.u32 %v4649_v35, %v4647_v3 }
 0x48a   : > { %4981 = vmatmul.bf16.gmra.mxu0 %v4648_v37 }
 0x490   : > { %v4896_v49 = vpop.f32.mrf.mxu3 }
 0x491   : > { %v4897_v38 = vadd.f32 %v7796_v6, %v4896_v49 }
 0x495   : > { %v5000_v17 = vpop.f32.mrf.mxu1 }
 0x497   : > { %v4947_v0 = vpop.f32.mrf.mxu0 }
 0x498   : > { %v4948_v19 = vadd.f32 %v4947_v0, %v4895_v60  ;;  %v4899_v10 = vpop.f32.mrf.mxu3  ;;  %5039 = vmatmul.bf16.gmra.mxu1 %v4676_v56 }
 0x499   : > { %v4900_v22 = vadd.f32 %v7796_v6, %v4899_v10 }
 0x49a   : > { %v5001_v15 = vadd.f32 %v5000_v17, %v4948_v19  ;;  %4986 = vmatmul.bf16.gmra.mxu0 %v4651_v1 }
 0x49c   : > { %v5115_v62 = vadd.f32 %v7493_v40, %v5001_v15 }
 0x49d   : > { %v5002_v13 = vpop.f32.mrf.mxu1 }
 0x49e   : > { %5132 = vst [vmem:[%s7803_s10 - $0x4] sm:$0xf0] %v5115_v62 }
 0x49f   : > { %v4949_v14 = vpop.f32.mrf.mxu0 }
 0x4a0   : > { %v4950_v54 = vadd.f32 %v4949_v14, %v4897_v38  ;;  %v4901_v42 = vpop.f32.mrf.mxu3 }
 0x4a1   : > { %v4902_v33 = vadd.f32 %v7796_v6, %v4901_v42 }
 0x4a2   : > { %v5003_v41 = vadd.f32 %v5002_v13, %v4950_v54 }
 0x4a4   : > { %v5116_v30 = vadd.f32 %v7505_v29, %v5003_v41 }
 0x4a5   : > { %v5005_v21 = vpop.f32.mrf.mxu1 }
 0x4a6   : > { %5133 = vst [vmem:[%s7803_s10 + $0x4] sm:$0xff] %v5116_v30 }
 0x4a7   : > { %v4952_v40 = vpop.f32.mrf.mxu0 }
 0x4a8   : > { %v4953_v18 = vadd.f32 %v4952_v40, %v4900_v22  ;;  %v4904_v45 = vpop.f32.mrf.mxu3 }
 0x4a9   : > { %v4905_v25 = vadd.f32 %v7796_v6, %v4904_v45 }
 0x4aa   : > { %v5006_v7 = vadd.f32 %v5005_v21, %v4953_v18 }
 0x4ac   : > { %v5117_v51 = vadd.f32 %v7519_v9, %v5006_v7 }
 0x4ad   : > { %v5007_v58 = vpop.f32.mrf.mxu1 }
 0x4ae   : > { %5134 = vst [vmem:[%s7803_s10 + $0xc] sm:$0xff] %v5117_v51 }
 0x4af   : > { %v4954_v4 = vpop.f32.mrf.mxu0 }
 0x4b0   : > { %v4955_v47 = vadd.f32 %v4954_v4, %v4902_v33  ;;  %v4906_v52 = vpop.f32.mrf.mxu3 }
 0x4b1   : > { %v4907_v28 = vadd.f32 %v7796_v6, %v4906_v52 }
 0x4b2   : > { %v5008_v29 = vadd.f32 %v5007_v58, %v4955_v47 }
 0x4b4   : > { %v5118_v48 = vadd.f32 %v7530_v34, %v5008_v29 }
 0x4b5   : > { %v5010_v32 = vpop.f32.mrf.mxu1 }
 0x4b6   : > { %5135 = vst [vmem:[%s7803_s10 + $0x14] sm:$0xff] %v5118_v48 }
 0x4b7   : > { %v4957_v53 = vpop.f32.mrf.mxu0 }
 0x4b8   : > { %v4958_v2 = vadd.f32 %v4957_v53, %v4905_v25  ;;  %v4909_v11 = vpop.f32.mrf.mxu3 }
 0x4b9   : > { %v4910_v5 = vadd.f32 %v7796_v6, %v4909_v11 }
 0x4ba   : > { %v5011_v9 = vadd.f32 %v5010_v32, %v4958_v2 }
 0x4bc   : > { %v5119_v39 = vadd.f32 %v7548_v27, %v5011_v9 }
 0x4bd   : > { %v5012_v59 = vpop.f32.mrf.mxu1 }
 0x4be   : > { %5136 = vst [vmem:[%s7803_s10 + $0x1c] sm:$0xff] %v5119_v39 }
 0x4bf   : > { %v4959_v36 = vpop.f32.mrf.mxu0 }
 0x4c0   : > { %v4960_v56 = vadd.f32 %v4959_v36, %v4907_v28  ;;  %v4911_v16 = vpop.f32.mrf.mxu3 }
 0x4c1   : > { %v4912_v60 = vadd.f32 %v7796_v6, %v4911_v16 }
 0x4c2   : > { %v5013_v34 = vadd.f32 %v5012_v59, %v4960_v56 }
 0x4c4   : > { %v5120_v23 = vadd.f32 %v7563_v20, %v5013_v34 }
 0x4c5   : > { %v5015_v63 = vpop.f32.mrf.mxu1 }
 0x4c6   : > { %5137 = vst [vmem:[%s7803_s10 + $0x24] sm:$0xff] %v5120_v23 }
 0x4c7   : > { %v4962_v3 = vpop.f32.mrf.mxu0 }
 0x4c8   : > { %v4963_v26 = vadd.f32 %v4962_v3, %v4910_v5  ;;  %v4914_v37 = vpop.f32.mrf.mxu3 }
 0x4c9   : > { %v4915_v15 = vadd.f32 %v7796_v6, %v4914_v37 }
 0x4ca   : > { %v5016_v27 = vadd.f32 %v5015_v63, %v4963_v26 }
 0x4cc   : > { %v5121_v49 = vadd.f32 %v7578_v44, %v5016_v27 }
 0x4cd   : > { %v5017_v17 = vpop.f32.mrf.mxu1 }
 0x4ce   : > { %5138 = vst [vmem:[%s7803_s10 + $0x2c] sm:$0xff] %v5121_v49 }
 0x4cf   : > { %v4964_v35 = vpop.f32.mrf.mxu0 }
 0x4d0   : > { %v4965_v0 = vadd.f32 %v4964_v35, %v4912_v60  ;;  %v4916_v19 = vpop.f32.mrf.mxu3 }
 0x4d1   : > { %v4917_v42 = vadd.f32 %v7796_v6, %v4916_v19 }
 0x4d2   : > { %v5018_v20 = vadd.f32 %v5017_v17, %v4965_v0 }
 0x4d4   : > { %v5122_v10 = vadd.f32 %v7592_v12, %v5018_v20 }
 0x4d5   : > { %v5020_v1 = vpop.f32.mrf.mxu1 }
 0x4d6   : > { %5139 = vst [vmem:[%s7803_s10 + $0x34] sm:$0xff] %v5122_v10 }
 0x4d7   : > { %v4967_v62 = vpop.f32.mrf.mxu0 }
 0x4d8   : > { %v4968_v13 = vadd.f32 %v4967_v62, %v4915_v15  ;;  %v4919_v38 = vpop.f32.mrf.mxu3 }
 0x4d9   : > { %v4920_v18 = vadd.f32 %v7796_v6, %v4919_v38 }
 0x4da   : > { %v5021_v44 = vadd.f32 %v5020_v1, %v4968_v13 }
 0x4dc   : > { %v5123_v14 = vadd.f32 %v7607_v55, %v5021_v44 }
 0x4dd   : > { %v5022_v54 = vpop.f32.mrf.mxu1 }
 0x4de   : > { %5140 = vst [vmem:[%s7803_s10 + $0x3c] sm:$0xff] %v5123_v14 }
 0x4df   : > { %v4969_v41 = vpop.f32.mrf.mxu0 }
 0x4e0   : > { %v4970_v30 = vadd.f32 %v4969_v41, %v4917_v42  ;;  %v4921_v21 = vpop.f32.mrf.mxu3 }
 0x4e1   : > { %v4922_v4 = vadd.f32 %v7796_v6, %v4921_v21 }
 0x4e2   : > { %v5023_v12 = vadd.f32 %v5022_v54, %v4970_v30 }
 0x4e4   : > { %v5124_v22 = vadd.f32 %v7620_v43, %v5023_v12 }
 0x4e5   : > { %v5025_v40 = vpop.f32.mrf.mxu1 }
 0x4e6   : > { %5141 = vst [vmem:[%s7803_s10 + $0x44] sm:$0xff] %v5124_v22 }
 0x4e7   : > { %v4972_v45 = vpop.f32.mrf.mxu0 }
 0x4e8   : > { %v4973_v7 = vadd.f32 %v4972_v45, %v4920_v18  ;;  %v4924_v51 = vpop.f32.mrf.mxu3 }
 0x4e9   : > { %v4925_v25 = vadd.f32 %v7796_v6, %v4924_v51 }
 0x4ea   : > { %v5026_v55 = vadd.f32 %v5025_v40, %v4973_v7 }
 0x4ec   : > { %v5125_v58 = vadd.f32 %v7632_v46, %v5026_v55 }
 0x4ed   : > { %v5027_v33 = vpop.f32.mrf.mxu1 }
 0x4ee   : > { %5142 = vst [vmem:[%s7803_s10 + $0x4c] sm:$0xff] %v5125_v58 }
 0x4ef   : > { %v4974_v47 = vpop.f32.mrf.mxu0 }
 0x4f0   : > { %v4975_v52 = vadd.f32 %v4974_v47, %v4922_v4  ;;  %v4926_v29 = vpop.f32.mrf.mxu3 }
 0x4f1   : > { %v4927_v59 = vadd.f32 %v7796_v6, %v4926_v29 }
 0x4f2   : > { %v5028_v43 = vadd.f32 %v5027_v33, %v4975_v52 }
 0x4f4   : > { %v5126_v48 = vadd.f32 %v7643_v57, %v5028_v43 }
 0x4f5   : > { %v5030_v32 = vpop.f32.mrf.mxu1 }
 0x4f6   : > { %5143 = vst [vmem:[%s7803_s10 + $0x54] sm:$0xff] %v5126_v48 }
 0x4f7   : > { %v4977_v53 = vpop.f32.mrf.mxu0 }
 0x4f8   : > { %v4978_v2 = vadd.f32 %v4977_v53, %v4925_v25  ;;  %v4929_v11 = vpop.f32.mrf.mxu3 }
 0x4f9   : > { %v4930_v23 = vadd.f32 %v7796_v6, %v4929_v11 }
 0x4fa   : > { %v5031_v46 = vadd.f32 %v5030_v32, %v4978_v2 }
 0x4fc   : > { %v5127_v9 = vadd.f32 %v7660_v8, %v5031_v46 }
 0x4fd   : > { %v5032_v39 = vpop.f32.mrf.mxu1 }
 0x4fe   : > { %5144 = vst [vmem:[%s7803_s10 + $0x5c] sm:$0xff] %v5127_v9 }
 0x4ff   : > { %v4979_v28 = vpop.f32.mrf.mxu0 }
 0x500   : > { %v4980_v36 = vadd.f32 %v4979_v28, %v4927_v59  ;;  %v4931_v57 = vpop.f32.mrf.mxu3 }
 0x501   : > { %v4932_v27 = vadd.f32 %v7796_v6, %v4931_v57 }
 0x502   : > { %v5033_v56 = vadd.f32 %v5032_v39, %v4980_v36 }
 0x504   : > { %v5128_v16 = vadd.f32 %v7672_v50, %v5033_v56 }
 0x505   : > { %v5035_v34 = vpop.f32.mrf.mxu1 }
 0x506   : > { %5145 = vst [vmem:[%s7803_s10 + $0x64] sm:$0xff] %v5128_v16 }
 0x507   : > { %v4982_v63 = vpop.f32.mrf.mxu0 }
 0x508   : > { %v4983_v5 = vadd.f32 %v4982_v63, %v4930_v23  ;;  %v4934_v8 = vpop.f32.mrf.mxu3 }
 0x50a   : > { %v5036_v3 = vadd.f32 %v5035_v34, %v4983_v5 }
 0x50c   : > { %v5129_v26 = vadd.f32 %v7683_v31, %v5036_v3  ;;  %v4935_v31 = vadd.f32 %v7796_v6, %v4934_v8 }
 0x50d   : > { %v5037_v37 = vpop.f32.mrf.mxu1 }
 0x50e   : > { %5146 = vst [vmem:[%s7803_s10 + $0x6c] sm:$0xff] %v5129_v26 }
 0x50f   : > { %v4984_v49 = vpop.f32.mrf.mxu0 }
 0x510   : > { %v4985_v50 = vadd.f32 %v4984_v49, %v4932_v27  ;;  %v4936_v17 = vpop.f32.mrf.mxu3 }
 0x512   : > { %v5038_v60 = vadd.f32 %v5037_v37, %v4985_v50 }
 0x514   : > { %v5130_v35 = vadd.f32 %v7693_v24, %v5038_v60 }
 0x515   : > { %v5040_v0 = vpop.f32.mrf.mxu1 }
 0x516   : > { %5147 = vst [vmem:[%s7803_s10 + $0x74] sm:$0xff] %v5130_v35 }
 0x517   : > { %v4987_v19 = vpop.f32.mrf.mxu0 }
 0x518   : > { %v4988_v20 = vadd.f32 %v4987_v19, %v4935_v31 }
 0x51a   : > { %v5041_v10 = vadd.f32 %v5040_v0, %v4988_v20 }
 0x51c   : > { %v5131_v1 = vadd.f32 %v7703_v61, %v5041_v10 }
 0x51d   : > { %v5042_v24 = vpop.f32.mrf.mxu1 }
 0x51e   : > { %5148 = vst [vmem:[%s7803_s10 + $0x7c] sm:$0xf] %v5131_v1 }
 0x51f   : > { %v4989_v15 = vpop.f32.mrf.mxu0 }
 0x520   : > { %6409 = shalt.err (!%p6406_p13)
}
 0x521   : > { %s6503_s19 = smov 128   ;;  %s6504_s9 = smov 8  }
 0x522   : > { %6099 = dma.vmem_to_hbm [thread:$0]  (%p6640_p3), %s5165_s14, 2048, %s5167_s13, %s5150_s17, %s6503_s19, %s6503_s19, %s6504_s9  }
 0x523 PF: > { %s7950_s10 = sld [smem:[#allocation17_spill]]  ;;  %p6129_p0 = scmp.ge.s32.totalorder %s6492_s28, 2 }
 0x525   : > { %p6119_p5 = pnand %p6129_p0, %p6595_p6 }
 0x527   : > { %p6120_p7 = pneg %p6119_p5 }
 0x529   : > { %s5181_s11 = sand.u32 1, %s7950_s10  }
 0x52a   : > { %s5182_s6 = scalar_lea.sflag [#allocation4], %s5181_s11 }
 0x52b   : > { %6459 = dma.done.wait (%p6120_p7), %s5182_s6, 2048  }
 0x52c   : > { %6461 = vsyncadd (%p6120_p7), %s5182_s6, 4294965248  ;;  %s26_s28 = sadd.s32 1, %s6492_s28   ;;  %s7952_s3 = sld [smem:[#allocation18_spill]] }
 0x52d   : > { %p23_p9 = scmp.ge.s32.totalorder %s26_s28, 6   ;;  %s7953_s23 = sld [smem:[#allocation24_spill]] }
 0x52e   : > { %s7954_s12 = sld [smem:[#allocation21_spill]]  ;;  %s7956_s21 = smov %s6468_s22 }
 0x52f   : > { %s7955_s7 = sld [smem:[#allocation23_spill]]  ;;  %s7958_s24 = smov %s6484_s26 }
 0x530   : > { %s7959_s25 = smov %s6488_s27 }
 0x531   :  { %25 = sbr.rel (!%p23_p9) target bundleno = 15 (0xf), region = 122 }
 0x532   : > { %s7957_s22 = smov %s7952_s3 }
 0x534   : > { %s7960_s26 = smov %s7954_s12 }
 0x535   : > { %s7961_s27 = smov %s7955_s7 }
 0x536   :  { %5188 = vsyncpa [#allocation3], 1 }
 0x537   :  { %5190 = vsyncpa [#allocation3 + $0x1], 1 }
 0x538   :  { %5191 = vsyncpa [#allocation6], 1 }
 0x539   :  { %5193 = vsyncpa [#allocation6 + $0x1], 1 }
 0x53a   :  { %5194 = vsyncpa [#allocation9], 1 }
 0x53b   :  { %5195 = vsyncpa [#allocation4], 1 }
 0x53c   :  { %5197 = vsyncpa [#allocation4 + $0x1], 1 }

</bundles_post_ra>
